<compile_context>
chip_gen: v6e
topology: v6e:2x2x1
jax: 0.10.0
libtpu: 0.0.40
codegen_flags: <defaults>
</compile_context>

<pallas_src>
import functools

import jax
import jax.numpy as jnp
from jax import lax
from jax.experimental import pallas as pl
from jax.experimental.pallas import tpu as pltpu


def gat_layer_kernel(hq_ref, hk_ref, adj_ref, wq_ref, wk_ref, wv_ref,
                     bqkv_ref, wl_ref, bl_ref, out_ref,
                     m_sc, l_sc, acc_sc, *, num_heads):
    """One (dst-tile, kv-tile) step of a GAT layer with online masked softmax.

    hq_ref : [TQ, in]  bf16   destination-row node features
    hk_ref : [TK, in]  bf16   source-column node features
    adj_ref: [TQ, TK]  int8   adj[i, j] = 1 iff edge  src j -> dst i
    wq/wk/wv_ref: [H, in, hid] bf16 per-head projection weights
    bqkv_ref   : [3, H, hid]   f32  biases (Q, K, V)
    wl_ref     : [H, hid, out] bf16 per-head apply linear, placed as the head's
                                   row-slab of the block-diagonal merge matrix
    bl_ref     : [1, out]      f32
    out_ref    : [TQ, out]     f32
    scratch    : m/l [H, TQ, 1] f32, acc [H, TQ, hid] f32
    """
    j = pl.program_id(1)
    nj = pl.num_programs(1)

    @pl.when(j == 0)
    def _init():
        m_sc[...] = jnp.full_like(m_sc, -jnp.inf)
        l_sc[...] = jnp.zeros_like(l_sc)
        acc_sc[...] = jnp.zeros_like(acc_sc)

    hq = hq_ref[...]                                   # [TQ, in] bf16
    hk = hk_ref[...]                                   # [TK, in] bf16
    adj = adj_ref[...].astype(jnp.float32)             # [TQ, TK]
    wq_all, wk_all, wv_all = wq_ref[...], wk_ref[...], wv_ref[...]
    b_all = bqkv_ref[...]                              # [3, H, hid] f32

    for h in range(num_heads):                         # small, unrolled
        # Projections: bf16 MXU operands, f32 accumulate, f32 bias add.
        q = jnp.dot(hq, wq_all[h], preferred_element_type=jnp.float32) + b_all[0, h]
        k = jnp.dot(hk, wk_all[h], preferred_element_type=jnp.float32) + b_all[1, h]
        v = jnp.dot(hk, wv_all[h], preferred_element_type=jnp.float32) + b_all[2, h]

        # scores[i, j] = q_i . k_j ; contract last dims of both operands so no
        # explicit k.T / XLU transpose is materialized.
        s = lax.dot_general(q.astype(jnp.bfloat16), k.astype(jnp.bfloat16),
                            (((1,), (1,)), ((), ())),
                            preferred_element_type=jnp.float32)   # [TQ, TK] f32
        # Masking matches the reference exactly (incl. zero-in-degree rows).
        s = jnp.where(adj > 0.0, s, -1e30)

        # Online softmax update (f32 statistics).
        m_prev = m_sc[h]                                           # [TQ, 1]
        m_new = jnp.maximum(m_prev, jnp.max(s, axis=-1, keepdims=True))
        alpha = jnp.exp(m_prev - m_new)
        p = jnp.exp(s - m_new)                                     # [TQ, TK] f32
        l_sc[h] = alpha * l_sc[h] + jnp.sum(p, axis=-1, keepdims=True)
        acc_sc[h] = alpha * acc_sc[h] + jnp.dot(
            p.astype(jnp.bfloat16), v.astype(jnp.bfloat16),
            preferred_element_type=jnp.float32)
        m_sc[h] = m_new

    @pl.when(j == nj - 1)
    def _finalize():
        wl_all = wl_ref[...]                                       # [H, hid, out]
        o = jnp.zeros(out_ref.shape, jnp.float32)
        for h in range(num_heads):
            agg = acc_sc[h] / l_sc[h]          # exact normalization (finalize only)
            # Per-head row-slab of the block-diagonal merge == concat over heads,
            # without any lane-offset concat/relayout.
            o = o + jnp.dot(agg.astype(jnp.bfloat16), wl_all[h],
                            preferred_element_type=jnp.float32)
        # apply_nodes: relu(linear(v)).
        # TODO(synk): reference GATLayer.apply uses an undefined `self.linear`;
        # modeled as an out_feats -> out_feats Linear followed by ReLU.
        out_ref[...] = jnp.maximum(o + bl_ref[...], 0.0)


def init_gat_layer_params(key, in_feats, out_feats):
    """Per-head parameters; weights stored [in, out] (PyTorch Linear weight.T)."""
    ks = jax.random.split(key, 8)
    scale = 0.1

    def lin(kw, kb, fi, fo):
        return (jax.random.normal(kw, (fi, fo), jnp.float32) * scale,
                jax.random.normal(kb, (fo,), jnp.float32) * scale)

    wq, bq = lin(ks[0], ks[1], in_feats, out_feats)
    wk, bk = lin(ks[2], ks[3], in_feats, out_feats)
    wv, bv = lin(ks[4], ks[5], in_feats, out_feats)
    wl, bl = lin(ks[6], ks[7], out_feats, out_feats)
    return dict(wq=wq, bq=bq, wk=wk, bk=bk, wv=wv, bv=bv, wl=wl, bl=bl)


def _pack_layer(heads):
    """Stack per-head params into head-major arrays the kernel consumes."""
    num_heads = len(heads)
    hid = heads[0]["wq"].shape[1]
    out_cols = num_heads * hid                          # merge='cat'
    wq = jnp.stack([p["wq"] for p in heads]).astype(jnp.bfloat16)   # [H, in, hid]
    wk = jnp.stack([p["wk"] for p in heads]).astype(jnp.bfloat16)
    wv = jnp.stack([p["wv"] for p in heads]).astype(jnp.bfloat16)
    bqkv = jnp.stack([jnp.stack([p["bq"] for p in heads]),
                      jnp.stack([p["bk"] for p in heads]),
                      jnp.stack([p["bv"] for p in heads])])          # [3, H, hid]
    # Per-head apply-linear as its row-slab of the block-diagonal merge matrix.
    wl = jnp.zeros((num_heads, hid, out_cols), jnp.float32)
    for i, p in enumerate(heads):
        wl = wl.at[i, :, i * hid:(i + 1) * hid].set(p["wl"])
    wl = wl.astype(jnp.bfloat16)
    bl = jnp.concatenate([p["bl"] for p in heads]).reshape(1, out_cols)
    return wq, wk, wv, bqkv, wl, bl, hid, out_cols


def gat_layer_forward(h, adj_i8, heads, *, tq=128, tk=128):
    """One multi-head GAT layer as a tiled flash-style pallas_call."""
    n, in_dim = h.shape
    num_heads = len(heads)
    wq, wk, wv, bqkv, wl, bl, hid, out_cols = _pack_layer(heads)

    tq = min(tq, n)
    tk = min(tk, n)
    # TODO(synk): pad N to a tile multiple for ragged graphs.
    assert n % tq == 0 and n % tk == 0, (n, tq, tk)
    grid = (n // tq, n // tk)

    h_bf16 = h.astype(jnp.bfloat16)
    const3 = lambda i, j: (0, 0, 0)
    const2 = lambda i, j: (0, 0)

    kernel = functools.partial(gat_layer_kernel, num_heads=num_heads)
    return pl.pallas_call(
        kernel,
        out_shape=jax.ShapeDtypeStruct((n, out_cols), jnp.float32),
        grid=grid,
        in_specs=[
            pl.BlockSpec((tq, in_dim), lambda i, j: (i, 0)),         # dst rows
            pl.BlockSpec((tk, in_dim), lambda i, j: (j, 0)),         # src cols
            pl.BlockSpec((tq, tk), lambda i, j: (i, j)),             # int8 adj tile
            pl.BlockSpec((num_heads, in_dim, hid), const3),          # Wq (resident)
            pl.BlockSpec((num_heads, in_dim, hid), const3),          # Wk
            pl.BlockSpec((num_heads, in_dim, hid), const3),          # Wv
            pl.BlockSpec((3, num_heads, hid), const3),               # biases QKV
            pl.BlockSpec((num_heads, hid, out_cols), const3),        # apply linear
            pl.BlockSpec((1, out_cols), const2),                     # apply bias
        ],
        out_specs=pl.BlockSpec((tq, out_cols), lambda i, j: (i, 0)),
        scratch_shapes=[
            pltpu.VMEM((num_heads, tq, 1), jnp.float32),   # running max
            pltpu.VMEM((num_heads, tq, 1), jnp.float32),   # running sum
            pltpu.VMEM((num_heads, tq, hid), jnp.float32),  # running aggregate
        ],
        compiler_params=pltpu.CompilerParams(
            dimension_semantics=("parallel", "arbitrary"),
            vmem_limit_bytes=64 * 1024 * 1024,
        ),
    )(h_bf16, h_bf16, adj_i8, wq, wk, wv, bqkv, wl, bl)


def gat_forward(h, adj, layer1_heads, layer2_head, *, tq=128, tk=128):
    # int8 adjacency: 4x less HBM/DMA/VMEM than an f32 additive mask; the
    # -1e30 bias is built per tile inside the kernel.
    adj_i8 = (adj > 0).astype(jnp.int8)
    h1 = gat_layer_forward(h, adj_i8, layer1_heads, tq=tq, tk=tk)
    # F.elu(h1) is the identity here: apply_nodes already ReLU'd h1, and
    # ELU(x) == x for x >= 0, so it is skipped (saves full-tile expm1 on EUP).
    return gat_layer_forward(h1, adj_i8, [layer2_head], tq=tq, tk=tk)


# ---------------- pure-JAX reference (for correctness check) ----------------
def _ref_gat_layer(h, adj, p):
    q = h @ p["wq"] + p["bq"]
    k = h @ p["wk"] + p["bk"]
    v = h @ p["wv"] + p["bv"]
    scores = jnp.where(adj > 0, q @ k.T, -1e30)
    s = jax.nn.softmax(scores, axis=-1)
    return jnp.maximum((s @ v) @ p["wl"] + p["bl"], 0.0)


def _ref_gat_forward(h, adj, layer1_heads, layer2_head):
    h1 = jnp.concatenate([_ref_gat_layer(h, adj, p) for p in layer1_heads],
                         axis=1)
    h1 = jnp.where(h1 > 0, h1, jnp.expm1(h1))   # F.elu (identity after ReLU)
    return _ref_gat_layer(h1, adj, layer2_head)


if __name__ == "__main__":
    # Small but multi-tile: N=256 with 128x128 tiles -> grid (2, 2).
    N, in_dim, hidden_dim, out_dim, num_heads = 256, 16, 8, 4, 2

    key = jax.random.PRNGKey(0)
    kh, k1, k2 = jax.random.split(key, 3)

    # Node features.
    h = jax.random.normal(kh, (N, in_dim), jnp.float32)

    # Graph: self-loops + ring (i-1 -> i) + a deterministic long-range edge per
    # node so attention spans multiple KV tiles.  Dense [dst, src] adjacency.
    idx = jnp.arange(N)
    adj = jnp.eye(N, dtype=jnp.float32)
    adj = adj.at[idx, (idx - 1) % N].set(1.0)
    adj = adj.at[idx, (idx * 7 + 3) % N].set(1.0)

    keys1 = jax.random.split(k1, num_heads)
    layer1_heads = [init_gat_layer_params(keys1[i], in_dim, hidden_dim)
                    for i in range(num_heads)]
    layer2_head = init_gat_layer_params(k2, hidden_dim * num_heads, out_dim)

    out = gat_forward(h, adj, layer1_heads, layer2_head)
    jax.block_until_ready(out)

    ref = _ref_gat_forward(h, adj, layer1_heads, layer2_head)
    assert out.shape == (N, out_dim), out.shape
    assert bool(jnp.all(jnp.isfinite(out)))
    # Tolerance accounts for bf16 MXU operands (softmax stats stay f32).
    assert bool(jnp.allclose(out, ref, atol=1e-2, rtol=1e-2)), (
        float(jnp.max(jnp.abs(out - ref))))
    print("KERNEL_OK")
</pallas_src>

<mosaic_0001>
module attributes {stable_mosaic.version = 11 : i64} {
  func.func @gat_layer_kernel(%arg0: i32, %arg1: i32, %arg2: memref<128x16xbf16, #tpu.memory_space<vmem>>, %arg3: memref<128x16xbf16, #tpu.memory_space<vmem>>, %arg4: memref<128x128xi8, #tpu.memory_space<vmem>>, %arg5: memref<2x16x8xbf16, #tpu.memory_space<vmem>>, %arg6: memref<2x16x8xbf16, #tpu.memory_space<vmem>>, %arg7: memref<2x16x8xbf16, #tpu.memory_space<vmem>>, %arg8: memref<3x2x8xf32, #tpu.memory_space<vmem>>, %arg9: memref<2x8x16xbf16, #tpu.memory_space<vmem>>, %arg10: memref<1x16xf32, #tpu.memory_space<vmem>>, %arg11: memref<128x16xf32, #tpu.memory_space<vmem>>, %arg12: memref<2x128x1xf32, #tpu.memory_space<vmem>>, %arg13: memref<2x128x1xf32, #tpu.memory_space<vmem>>, %arg14: memref<2x128x8xf32, #tpu.memory_space<vmem>>) attributes {dimension_semantics = [#tpu.dimension_semantics<parallel>, #tpu.dimension_semantics<arbitrary>], iteration_bounds = array<i64: 2, 2>, scalar_prefetch = 0 : i64, scratch_operands = 3 : i64, tpu.core_type = #tpu.core_type<tc>, window_params = [{transform_indices = @transform_0, window_bounds = array<i64: 128, 16>}, {transform_indices = @transform_1, window_bounds = array<i64: 128, 16>}, {transform_indices = @transform_2, window_bounds = array<i64: 128, 128>}, {pipeline_mode = #tpu.pipeline_mode<synchronous>, transform_indices = @transform_3, window_bounds = array<i64: 2, 16, 8>}, {pipeline_mode = #tpu.pipeline_mode<synchronous>, transform_indices = @transform_4, window_bounds = array<i64: 2, 16, 8>}, {pipeline_mode = #tpu.pipeline_mode<synchronous>, transform_indices = @transform_5, window_bounds = array<i64: 2, 16, 8>}, {pipeline_mode = #tpu.pipeline_mode<synchronous>, transform_indices = @transform_6, window_bounds = array<i64: 3, 2, 8>}, {pipeline_mode = #tpu.pipeline_mode<synchronous>, transform_indices = @transform_7, window_bounds = array<i64: 2, 8, 16>}, {pipeline_mode = #tpu.pipeline_mode<synchronous>, transform_indices = @transform_8, window_bounds = array<i64: 1, 16>}, {transform_indices = @transform_9, window_bounds = array<i64: 128, 16>}]} {
    %c0_i32 = arith.constant 0 : i32
    %0 = arith.cmpi eq, %arg1, %c0_i32 : i32
    %1 = arith.extui %0 : i1 to i32
    %c0_i32_0 = arith.constant 0 : i32
    %2 = arith.cmpi ne, %1, %c0_i32_0 : i32
    scf.if %2 {
      %cst_71 = arith.constant 0xFF800000 : f32
      %142 = vector.broadcast %cst_71 : f32 to vector<2x128x1xf32>
      %c0_72 = arith.constant 0 : index
      %c0_73 = arith.constant 0 : index
      %c0_74 = arith.constant 0 : index
      %143 = vector.load %arg12[%c0_72, %c0_73, %c0_74] : memref<2x128x1xf32, #tpu.memory_space<vmem>>, vector<2x128x1xf32>
      tpu.vector_store %arg12[%c0_72, %c0_73, %c0_74], %142 {strides = array<i32>} : memref<2x128x1xf32, #tpu.memory_space<vmem>>, vector<2x128x1xf32>,
      %cst_75 = arith.constant 0.000000e+00 : f32
      %144 = vector.broadcast %cst_75 : f32 to vector<2x128x1xf32>
      %c0_76 = arith.constant 0 : index
      %c0_77 = arith.constant 0 : index
      %c0_78 = arith.constant 0 : index
      %145 = vector.load %arg13[%c0_76, %c0_77, %c0_78] : memref<2x128x1xf32, #tpu.memory_space<vmem>>, vector<2x128x1xf32>
      tpu.vector_store %arg13[%c0_76, %c0_77, %c0_78], %144 {strides = array<i32>} : memref<2x128x1xf32, #tpu.memory_space<vmem>>, vector<2x128x1xf32>,
      %cst_79 = arith.constant 0.000000e+00 : f32
      %146 = vector.broadcast %cst_79 : f32 to vector<2x128x8xf32>
      %c0_80 = arith.constant 0 : index
      %c0_81 = arith.constant 0 : index
      %c0_82 = arith.constant 0 : index
      %147 = vector.load %arg14[%c0_80, %c0_81, %c0_82] : memref<2x128x8xf32, #tpu.memory_space<vmem>>, vector<2x128x8xf32>
      tpu.vector_store %arg14[%c0_80, %c0_81, %c0_82], %146 {strides = array<i32>} : memref<2x128x8xf32, #tpu.memory_space<vmem>>, vector<2x128x8xf32>,
    } else {
    }
    %c0 = arith.constant 0 : index
    %c0_1 = arith.constant 0 : index
    %3 = vector.load %arg2[%c0, %c0_1] : memref<128x16xbf16, #tpu.memory_space<vmem>>, vector<128x16xbf16>
    %c0_2 = arith.constant 0 : index
    %c0_3 = arith.constant 0 : index
    %4 = vector.load %arg3[%c0_2, %c0_3] : memref<128x16xbf16, #tpu.memory_space<vmem>>, vector<128x16xbf16>
    %c0_4 = arith.constant 0 : index
    %c0_5 = arith.constant 0 : index
    %5 = vector.load %arg4[%c0_4, %c0_5] : memref<128x128xi8, #tpu.memory_space<vmem>>, vector<128x128xi8>
    %6 = arith.sitofp %5 : vector<128x128xi8> to vector<128x128xf32>
    %c0_6 = arith.constant 0 : index
    %c0_7 = arith.constant 0 : index
    %c0_8 = arith.constant 0 : index
    %7 = vector.load %arg5[%c0_6, %c0_7, %c0_8] : memref<2x16x8xbf16, #tpu.memory_space<vmem>>, vector<2x16x8xbf16>
    %c0_9 = arith.constant 0 : index
    %c0_10 = arith.constant 0 : index
    %c0_11 = arith.constant 0 : index
    %8 = vector.load %arg6[%c0_9, %c0_10, %c0_11] : memref<2x16x8xbf16, #tpu.memory_space<vmem>>, vector<2x16x8xbf16>
    %c0_12 = arith.constant 0 : index
    %c0_13 = arith.constant 0 : index
    %c0_14 = arith.constant 0 : index
    %9 = vector.load %arg7[%c0_12, %c0_13, %c0_14] : memref<2x16x8xbf16, #tpu.memory_space<vmem>>, vector<2x16x8xbf16>
    %c0_15 = arith.constant 0 : index
    %c0_16 = arith.constant 0 : index
    %c0_17 = arith.constant 0 : index
    %10 = vector.load %arg8[%c0_15, %c0_16, %c0_17] : memref<3x2x8xf32, #tpu.memory_space<vmem>>, vector<3x2x8xf32>
    %11 = vector.extract_strided_slice %7 {offsets = [0, 0, 0], sizes = [1, 16, 8], strides = [1, 1, 1]} : vector<2x16x8xbf16> to vector<1x16x8xbf16>
    %12 = vector.shape_cast %11 : vector<1x16x8xbf16> to vector<16x8xbf16>
    %cst = arith.constant dense<0.000000e+00> : vector<128x8xf32>
    %13 = tpu.matmul %3, %12, %cst {dimension_numbers = #tpu.dot_dimension_numbers<[1], [0], [0], [1], [0, 0, 1, 1], [], []>} : vector<128x16xbf16>, vector<16x8xbf16>, vector<128x8xf32> -> vector<128x8xf32>
    %14 = vector.extract_strided_slice %10 {offsets = [0, 0, 0], sizes = [1, 1, 8], strides = [1, 1, 1]} : vector<3x2x8xf32> to vector<1x1x8xf32>
    %15 = vector.shape_cast %14 : vector<1x1x8xf32> to vector<8xf32>
    %16 = vector.shape_cast %15 : vector<8xf32> to vector<1x8xf32>
    %17 = vector.broadcast %16 : vector<1x8xf32> to vector<128x8xf32>
    %18 = arith.addf %13, %17 : vector<128x8xf32>
    %19 = vector.extract_strided_slice %8 {offsets = [0, 0, 0], sizes = [1, 16, 8], strides = [1, 1, 1]} : vector<2x16x8xbf16> to vector<1x16x8xbf16>
    %20 = vector.shape_cast %19 : vector<1x16x8xbf16> to vector<16x8xbf16>
    %cst_18 = arith.constant dense<0.000000e+00> : vector<128x8xf32>
    %21 = tpu.matmul %4, %20, %cst_18 {dimension_numbers = #tpu.dot_dimension_numbers<[1], [0], [0], [1], [0, 0, 1, 1], [], []>} : vector<128x16xbf16>, vector<16x8xbf16>, vector<128x8xf32> -> vector<128x8xf32>
    %22 = vector.extract_strided_slice %10 {offsets = [1, 0, 0], sizes = [1, 1, 8], strides = [1, 1, 1]} : vector<3x2x8xf32> to vector<1x1x8xf32>
    %23 = vector.shape_cast %22 : vector<1x1x8xf32> to vector<8xf32>
    %24 = vector.shape_cast %23 : vector<8xf32> to vector<1x8xf32>
    %25 = vector.broadcast %24 : vector<1x8xf32> to vector<128x8xf32>
    %26 = arith.addf %21, %25 : vector<128x8xf32>
    %27 = vector.extract_strided_slice %9 {offsets = [0, 0, 0], sizes = [1, 16, 8], strides = [1, 1, 1]} : vector<2x16x8xbf16> to vector<1x16x8xbf16>
    %28 = vector.shape_cast %27 : vector<1x16x8xbf16> to vector<16x8xbf16>
    %cst_19 = arith.constant dense<0.000000e+00> : vector<128x8xf32>
    %29 = tpu.matmul %4, %28, %cst_19 {dimension_numbers = #tpu.dot_dimension_numbers<[1], [0], [0], [1], [0, 0, 1, 1], [], []>} : vector<128x16xbf16>, vector<16x8xbf16>, vector<128x8xf32> -> vector<128x8xf32>
    %30 = vector.extract_strided_slice %10 {offsets = [2, 0, 0], sizes = [1, 1, 8], strides = [1, 1, 1]} : vector<3x2x8xf32> to vector<1x1x8xf32>
    %31 = vector.shape_cast %30 : vector<1x1x8xf32> to vector<8xf32>
    %32 = vector.shape_cast %31 : vector<8xf32> to vector<1x8xf32>
    %33 = vector.broadcast %32 : vector<1x8xf32> to vector<128x8xf32>
    %34 = arith.addf %29, %33 : vector<128x8xf32>
    %35 = arith.truncf %18 : vector<128x8xf32> to vector<128x8xbf16>
    %36 = arith.truncf %26 : vector<128x8xf32> to vector<128x8xbf16>
    %cst_20 = arith.constant dense<0.000000e+00> : vector<128x128xf32>
    %37 = tpu.matmul %35, %36, %cst_20 {dimension_numbers = #tpu.dot_dimension_numbers<[1], [1], [0], [0], [0, 0, 1, 0], [], []>} : vector<128x8xbf16>, vector<128x8xbf16>, vector<128x128xf32> -> vector<128x128xf32>
    %cst_21 = arith.constant 0.000000e+00 : f32
    %38 = vector.broadcast %cst_21 : f32 to vector<128x128xf32>
    %39 = arith.cmpf ogt, %6, %38 : vector<128x128xf32>
    %cst_22 = arith.constant -1.000000e+30 : f32
    %40 = vector.broadcast %cst_22 : f32 to vector<128x128xf32>
    %41 = arith.select %39, %37, %40 : vector<128x128xi1>, vector<128x128xf32>
    %c0_23 = arith.constant 0 : index
    %c0_24 = arith.constant 0 : index
    %c0_25 = arith.constant 0 : index
    %42 = vector.load %arg12[%c0_23, %c0_24, %c0_25] : memref<2x128x1xf32, #tpu.memory_space<vmem>>, vector<1x128x1xf32>
    %43 = vector.shape_cast %42 : vector<1x128x1xf32> to vector<128x1xf32>
    %cst_26 = arith.constant dense<0xFF800000> : vector<128xf32>
    %44 = vector.multi_reduction <maximumf>, %41, %cst_26 [1] : vector<128x128xf32> to vector<128xf32>
    %45 = vector.shape_cast %44 : vector<128xf32> to vector<128x1xf32>
    %46 = arith.maximumf %43, %45 : vector<128x1xf32>
    %47 = arith.subf %43, %46 : vector<128x1xf32>
    %48 = math.exp %47 : vector<128x1xf32>
    %49 = vector.broadcast %46 : vector<128x1xf32> to vector<128x128xf32>
    %50 = arith.subf %41, %49 : vector<128x128xf32>
    %51 = math.exp %50 : vector<128x128xf32>
    %c0_27 = arith.constant 0 : index
    %c0_28 = arith.constant 0 : index
    %c0_29 = arith.constant 0 : index
    %52 = vector.load %arg13[%c0_27, %c0_28, %c0_29] : memref<2x128x1xf32, #tpu.memory_space<vmem>>, vector<1x128x1xf32>
    %53 = vector.shape_cast %52 : vector<1x128x1xf32> to vector<128x1xf32>
    %54 = arith.mulf %48, %53 : vector<128x1xf32>
    %cst_30 = arith.constant dense<0.000000e+00> : vector<128xf32>
    %55 = vector.multi_reduction <add>, %51, %cst_30 [1] : vector<128x128xf32> to vector<128xf32>
    %56 = vector.shape_cast %55 : vector<128xf32> to vector<128x1xf32>
    %57 = arith.addf %54, %56 : vector<128x1xf32>
    %c0_31 = arith.constant 0 : index
    %c0_32 = arith.constant 0 : index
    %c0_33 = arith.constant 0 : index
    %58 = vector.load %arg13[%c0_31, %c0_32, %c0_33] : memref<2x128x1xf32, #tpu.memory_space<vmem>>, vector<1x128x1xf32>
    %59 = vector.shape_cast %58 : vector<1x128x1xf32> to vector<128x1xf32>
    %60 = vector.shape_cast %57 : vector<128x1xf32> to vector<1x128x1xf32>
    tpu.vector_store %arg13[%c0_31, %c0_32, %c0_33], %60 {strides = array<i32>} : memref<2x128x1xf32, #tpu.memory_space<vmem>>, vector<1x128x1xf32>,
    %c0_34 = arith.constant 0 : index
    %c0_35 = arith.constant 0 : index
    %c0_36 = arith.constant 0 : index
    %61 = vector.load %arg14[%c0_34, %c0_35, %c0_36] : memref<2x128x8xf32, #tpu.memory_space<vmem>>, vector<1x128x8xf32>
    %62 = vector.shape_cast %61 : vector<1x128x8xf32> to vector<128x8xf32>
    %63 = vector.broadcast %48 : vector<128x1xf32> to vector<128x8xf32>
    %64 = arith.mulf %63, %62 : vector<128x8xf32>
    %65 = arith.truncf %51 : vector<128x128xf32> to vector<128x128xbf16>
    %66 = arith.truncf %34 : vector<128x8xf32> to vector<128x8xbf16>
    %cst_37 = arith.constant dense<0.000000e+00> : vector<128x8xf32>
    %67 = tpu.matmul %65, %66, %cst_37 {dimension_numbers = #tpu.dot_dimension_numbers<[1], [0], [0], [1], [0, 0, 1, 1], [], []>} : vector<128x128xbf16>, vector<128x8xbf16>, vector<128x8xf32> -> vector<128x8xf32>
    %68 = arith.addf %64, %67 : vector<128x8xf32>
    %c0_38 = arith.constant 0 : index
    %c0_39 = arith.constant 0 : index
    %c0_40 = arith.constant 0 : index
    %69 = vector.load %arg14[%c0_38, %c0_39, %c0_40] : memref<2x128x8xf32, #tpu.memory_space<vmem>>, vector<1x128x8xf32>
    %70 = vector.shape_cast %69 : vector<1x128x8xf32> to vector<128x8xf32>
    %71 = vector.shape_cast %68 : vector<128x8xf32> to vector<1x128x8xf32>
    tpu.vector_store %arg14[%c0_38, %c0_39, %c0_40], %71 {strides = array<i32>} : memref<2x128x8xf32, #tpu.memory_space<vmem>>, vector<1x128x8xf32>,
    %c0_41 = arith.constant 0 : index
    %c0_42 = arith.constant 0 : index
    %c0_43 = arith.constant 0 : index
    %72 = vector.load %arg12[%c0_41, %c0_42, %c0_43] : memref<2x128x1xf32, #tpu.memory_space<vmem>>, vector<1x128x1xf32>
    %73 = vector.shape_cast %72 : vector<1x128x1xf32> to vector<128x1xf32>
    %74 = vector.shape_cast %46 : vector<128x1xf32> to vector<1x128x1xf32>
    tpu.vector_store %arg12[%c0_41, %c0_42, %c0_43], %74 {strides = array<i32>} : memref<2x128x1xf32, #tpu.memory_space<vmem>>, vector<1x128x1xf32>,
    %75 = vector.extract_strided_slice %7 {offsets = [1, 0, 0], sizes = [1, 16, 8], strides = [1, 1, 1]} : vector<2x16x8xbf16> to vector<1x16x8xbf16>
    %76 = vector.shape_cast %75 : vector<1x16x8xbf16> to vector<16x8xbf16>
    %cst_44 = arith.constant dense<0.000000e+00> : vector<128x8xf32>
    %77 = tpu.matmul %3, %76, %cst_44 {dimension_numbers = #tpu.dot_dimension_numbers<[1], [0], [0], [1], [0, 0, 1, 1], [], []>} : vector<128x16xbf16>, vector<16x8xbf16>, vector<128x8xf32> -> vector<128x8xf32>
    %78 = vector.extract_strided_slice %10 {offsets = [0, 1, 0], sizes = [1, 1, 8], strides = [1, 1, 1]} : vector<3x2x8xf32> to vector<1x1x8xf32>
    %79 = vector.shape_cast %78 : vector<1x1x8xf32> to vector<8xf32>
    %80 = vector.shape_cast %79 : vector<8xf32> to vector<1x8xf32>
    %81 = vector.broadcast %80 : vector<1x8xf32> to vector<128x8xf32>
    %82 = arith.addf %77, %81 : vector<128x8xf32>
    %83 = vector.extract_strided_slice %8 {offsets = [1, 0, 0], sizes = [1, 16, 8], strides = [1, 1, 1]} : vector<2x16x8xbf16> to vector<1x16x8xbf16>
    %84 = vector.shape_cast %83 : vector<1x16x8xbf16> to vector<16x8xbf16>
    %cst_45 = arith.constant dense<0.000000e+00> : vector<128x8xf32>
    %85 = tpu.matmul %4, %84, %cst_45 {dimension_numbers = #tpu.dot_dimension_numbers<[1], [0], [0], [1], [0, 0, 1, 1], [], []>} : vector<128x16xbf16>, vector<16x8xbf16>, vector<128x8xf32> -> vector<128x8xf32>
    %86 = vector.extract_strided_slice %10 {offsets = [1, 1, 0], sizes = [1, 1, 8], strides = [1, 1, 1]} : vector<3x2x8xf32> to vector<1x1x8xf32>
    %87 = vector.shape_cast %86 : vector<1x1x8xf32> to vector<8xf32>
    %88 = vector.shape_cast %87 : vector<8xf32> to vector<1x8xf32>
    %89 = vector.broadcast %88 : vector<1x8xf32> to vector<128x8xf32>
    %90 = arith.addf %85, %89 : vector<128x8xf32>
    %91 = vector.extract_strided_slice %9 {offsets = [1, 0, 0], sizes = [1, 16, 8], strides = [1, 1, 1]} : vector<2x16x8xbf16> to vector<1x16x8xbf16>
    %92 = vector.shape_cast %91 : vector<1x16x8xbf16> to vector<16x8xbf16>
    %cst_46 = arith.constant dense<0.000000e+00> : vector<128x8xf32>
    %93 = tpu.matmul %4, %92, %cst_46 {dimension_numbers = #tpu.dot_dimension_numbers<[1], [0], [0], [1], [0, 0, 1, 1], [], []>} : vector<128x16xbf16>, vector<16x8xbf16>, vector<128x8xf32> -> vector<128x8xf32>
    %94 = vector.extract_strided_slice %10 {offsets = [2, 1, 0], sizes = [1, 1, 8], strides = [1, 1, 1]} : vector<3x2x8xf32> to vector<1x1x8xf32>
    %95 = vector.shape_cast %94 : vector<1x1x8xf32> to vector<8xf32>
    %96 = vector.shape_cast %95 : vector<8xf32> to vector<1x8xf32>
    %97 = vector.broadcast %96 : vector<1x8xf32> to vector<128x8xf32>
    %98 = arith.addf %93, %97 : vector<128x8xf32>
    %99 = arith.truncf %82 : vector<128x8xf32> to vector<128x8xbf16>
    %100 = arith.truncf %90 : vector<128x8xf32> to vector<128x8xbf16>
    %cst_47 = arith.constant dense<0.000000e+00> : vector<128x128xf32>
    %101 = tpu.matmul %99, %100, %cst_47 {dimension_numbers = #tpu.dot_dimension_numbers<[1], [1], [0], [0], [0, 0, 1, 0], [], []>} : vector<128x8xbf16>, vector<128x8xbf16>, vector<128x128xf32> -> vector<128x128xf32>
    %cst_48 = arith.constant 0.000000e+00 : f32
    %102 = vector.broadcast %cst_48 : f32 to vector<128x128xf32>
    %103 = arith.cmpf ogt, %6, %102 : vector<128x128xf32>
    %cst_49 = arith.constant -1.000000e+30 : f32
    %104 = vector.broadcast %cst_49 : f32 to vector<128x128xf32>
    %105 = arith.select %103, %101, %104 : vector<128x128xi1>, vector<128x128xf32>
    %c1 = arith.constant 1 : index
    %c0_50 = arith.constant 0 : index
    %c0_51 = arith.constant 0 : index
    %106 = vector.load %arg12[%c1, %c0_50, %c0_51] : memref<2x128x1xf32, #tpu.memory_space<vmem>>, vector<1x128x1xf32>
    %107 = vector.shape_cast %106 : vector<1x128x1xf32> to vector<128x1xf32>
    %cst_52 = arith.constant dense<0xFF800000> : vector<128xf32>
    %108 = vector.multi_reduction <maximumf>, %105, %cst_52 [1] : vector<128x128xf32> to vector<128xf32>
    %109 = vector.shape_cast %108 : vector<128xf32> to vector<128x1xf32>
    %110 = arith.maximumf %107, %109 : vector<128x1xf32>
    %111 = arith.subf %107, %110 : vector<128x1xf32>
    %112 = math.exp %111 : vector<128x1xf32>
    %113 = vector.broadcast %110 : vector<128x1xf32> to vector<128x128xf32>
    %114 = arith.subf %105, %113 : vector<128x128xf32>
    %115 = math.exp %114 : vector<128x128xf32>
    %c1_53 = arith.constant 1 : index
    %c0_54 = arith.constant 0 : index
    %c0_55 = arith.constant 0 : index
    %116 = vector.load %arg13[%c1_53, %c0_54, %c0_55] : memref<2x128x1xf32, #tpu.memory_space<vmem>>, vector<1x128x1xf32>
    %117 = vector.shape_cast %116 : vector<1x128x1xf32> to vector<128x1xf32>
    %118 = arith.mulf %112, %117 : vector<128x1xf32>
    %cst_56 = arith.constant dense<0.000000e+00> : vector<128xf32>
    %119 = vector.multi_reduction <add>, %115, %cst_56 [1] : vector<128x128xf32> to vector<128xf32>
    %120 = vector.shape_cast %119 : vector<128xf32> to vector<128x1xf32>
    %121 = arith.addf %118, %120 : vector<128x1xf32>
    %c1_57 = arith.constant 1 : index
    %c0_58 = arith.constant 0 : index
    %c0_59 = arith.constant 0 : index
    %122 = vector.load %arg13[%c1_57, %c0_58, %c0_59] : memref<2x128x1xf32, #tpu.memory_space<vmem>>, vector<1x128x1xf32>
    %123 = vector.shape_cast %122 : vector<1x128x1xf32> to vector<128x1xf32>
    %124 = vector.shape_cast %121 : vector<128x1xf32> to vector<1x128x1xf32>
    tpu.vector_store %arg13[%c1_57, %c0_58, %c0_59], %124 {strides = array<i32>} : memref<2x128x1xf32, #tpu.memory_space<vmem>>, vector<1x128x1xf32>,
    %c1_60 = arith.constant 1 : index
    %c0_61 = arith.constant 0 : index
    %c0_62 = arith.constant 0 : index
    %125 = vector.load %arg14[%c1_60, %c0_61, %c0_62] : memref<2x128x8xf32, #tpu.memory_space<vmem>>, vector<1x128x8xf32>
    %126 = vector.shape_cast %125 : vector<1x128x8xf32> to vector<128x8xf32>
    %127 = vector.broadcast %112 : vector<128x1xf32> to vector<128x8xf32>
    %128 = arith.mulf %127, %126 : vector<128x8xf32>
    %129 = arith.truncf %115 : vector<128x128xf32> to vector<128x128xbf16>
    %130 = arith.truncf %98 : vector<128x8xf32> to vector<128x8xbf16>
    %cst_63 = arith.constant dense<0.000000e+00> : vector<128x8xf32>
    %131 = tpu.matmul %129, %130, %cst_63 {dimension_numbers = #tpu.dot_dimension_numbers<[1], [0], [0], [1], [0, 0, 1, 1], [], []>} : vector<128x128xbf16>, vector<128x8xbf16>, vector<128x8xf32> -> vector<128x8xf32>
    %132 = arith.addf %128, %131 : vector<128x8xf32>
    %c1_64 = arith.constant 1 : index
    %c0_65 = arith.constant 0 : index
    %c0_66 = arith.constant 0 : index
    %133 = vector.load %arg14[%c1_64, %c0_65, %c0_66] : memref<2x128x8xf32, #tpu.memory_space<vmem>>, vector<1x128x8xf32>
    %134 = vector.shape_cast %133 : vector<1x128x8xf32> to vector<128x8xf32>
    %135 = vector.shape_cast %132 : vector<128x8xf32> to vector<1x128x8xf32>
    tpu.vector_store %arg14[%c1_64, %c0_65, %c0_66], %135 {strides = array<i32>} : memref<2x128x8xf32, #tpu.memory_space<vmem>>, vector<1x128x8xf32>,
    %c1_67 = arith.constant 1 : index
    %c0_68 = arith.constant 0 : index
    %c0_69 = arith.constant 0 : index
    %136 = vector.load %arg12[%c1_67, %c0_68, %c0_69] : memref<2x128x1xf32, #tpu.memory_space<vmem>>, vector<1x128x1xf32>
    %137 = vector.shape_cast %136 : vector<1x128x1xf32> to vector<128x1xf32>
    %138 = vector.shape_cast %110 : vector<128x1xf32> to vector<1x128x1xf32>
    tpu.vector_store %arg12[%c1_67, %c0_68, %c0_69], %138 {strides = array<i32>} : memref<2x128x1xf32, #tpu.memory_space<vmem>>, vector<1x128x1xf32>,
    %c1_i32 = arith.constant 1 : i32
    %139 = arith.cmpi eq, %arg1, %c1_i32 : i32
    %140 = arith.extui %139 : i1 to i32
    %c0_i32_70 = arith.constant 0 : i32
    %141 = arith.cmpi ne, %140, %c0_i32_70 : i32
    scf.if %141 {
      %c0_71 = arith.constant 0 : index
      %c0_72 = arith.constant 0 : index
      %c0_73 = arith.constant 0 : index
      %142 = vector.load %arg9[%c0_71, %c0_72, %c0_73] : memref<2x8x16xbf16, #tpu.memory_space<vmem>>, vector<2x8x16xbf16>
      %cst_74 = arith.constant 0.000000e+00 : f32
      %143 = vector.broadcast %cst_74 : f32 to vector<128x16xf32>
      %c0_75 = arith.constant 0 : index
      %c0_76 = arith.constant 0 : index
      %c0_77 = arith.constant 0 : index
      %144 = vector.load %arg14[%c0_75, %c0_76, %c0_77] : memref<2x128x8xf32, #tpu.memory_space<vmem>>, vector<1x128x8xf32>
      %145 = vector.shape_cast %144 : vector<1x128x8xf32> to vector<128x8xf32>
      %c0_78 = arith.constant 0 : index
      %c0_79 = arith.constant 0 : index
      %c0_80 = arith.constant 0 : index
      %146 = vector.load %arg13[%c0_78, %c0_79, %c0_80] : memref<2x128x1xf32, #tpu.memory_space<vmem>>, vector<1x128x1xf32>
      %147 = vector.shape_cast %146 : vector<1x128x1xf32> to vector<128x1xf32>
      %148 = vector.broadcast %147 : vector<128x1xf32> to vector<128x8xf32>
      %149 = arith.divf %145, %148 : vector<128x8xf32>
      %150 = arith.truncf %149 : vector<128x8xf32> to vector<128x8xbf16>
      %151 = vector.extract_strided_slice %142 {offsets = [0, 0, 0], sizes = [1, 8, 16], strides = [1, 1, 1]} : vector<2x8x16xbf16> to vector<1x8x16xbf16>
      %152 = vector.shape_cast %151 : vector<1x8x16xbf16> to vector<8x16xbf16>
      %cst_81 = arith.constant dense<0.000000e+00> : vector<128x16xf32>
      %153 = tpu.matmul %150, %152, %cst_81 {dimension_numbers = #tpu.dot_dimension_numbers<[1], [0], [0], [1], [0, 0, 1, 1], [], []>} : vector<128x8xbf16>, vector<8x16xbf16>, vector<128x16xf32> -> vector<128x16xf32>
      %154 = arith.addf %143, %153 : vector<128x16xf32>
      %c1_82 = arith.constant 1 : index
      %c0_83 = arith.constant 0 : index
      %c0_84 = arith.constant 0 : index
      %155 = vector.load %arg14[%c1_82, %c0_83, %c0_84] : memref<2x128x8xf32, #tpu.memory_space<vmem>>, vector<1x128x8xf32>
      %156 = vector.shape_cast %155 : vector<1x128x8xf32> to vector<128x8xf32>
      %c1_85 = arith.constant 1 : index
      %c0_86 = arith.constant 0 : index
      %c0_87 = arith.constant 0 : index
      %157 = vector.load %arg13[%c1_85, %c0_86, %c0_87] : memref<2x128x1xf32, #tpu.memory_space<vmem>>, vector<1x128x1xf32>
      %158 = vector.shape_cast %157 : vector<1x128x1xf32> to vector<128x1xf32>
      %159 = vector.broadcast %158 : vector<128x1xf32> to vector<128x8xf32>
      %160 = arith.divf %156, %159 : vector<128x8xf32>
      %161 = arith.truncf %160 : vector<128x8xf32> to vector<128x8xbf16>
      %162 = vector.extract_strided_slice %142 {offsets = [1, 0, 0], sizes = [1, 8, 16], strides = [1, 1, 1]} : vector<2x8x16xbf16> to vector<1x8x16xbf16>
      %163 = vector.shape_cast %162 : vector<1x8x16xbf16> to vector<8x16xbf16>
      %cst_88 = arith.constant dense<0.000000e+00> : vector<128x16xf32>
      %164 = tpu.matmul %161, %163, %cst_88 {dimension_numbers = #tpu.dot_dimension_numbers<[1], [0], [0], [1], [0, 0, 1, 1], [], []>} : vector<128x8xbf16>, vector<8x16xbf16>, vector<128x16xf32> -> vector<128x16xf32>
      %165 = arith.addf %154, %164 : vector<128x16xf32>
      %c0_89 = arith.constant 0 : index
      %c0_90 = arith.constant 0 : index
      %166 = vector.load %arg10[%c0_89, %c0_90] : memref<1x16xf32, #tpu.memory_space<vmem>>, vector<1x16xf32>
      %167 = vector.broadcast %166 : vector<1x16xf32> to vector<128x16xf32>
      %168 = arith.addf %165, %167 : vector<128x16xf32>
      %cst_91 = arith.constant 0.000000e+00 : f32
      %169 = vector.broadcast %cst_91 : f32 to vector<128x16xf32>
      %170 = arith.maximumf %168, %169 : vector<128x16xf32>
      %c0_92 = arith.constant 0 : index
      %c0_93 = arith.constant 0 : index
      %171 = vector.load %arg11[%c0_92, %c0_93] : memref<128x16xf32, #tpu.memory_space<vmem>>, vector<128x16xf32>
      tpu.vector_store %arg11[%c0_92, %c0_93], %170 {strides = array<i32>} : memref<128x16xf32, #tpu.memory_space<vmem>>, vector<128x16xf32>,
    } else {
    }
    return
  }
  func.func @transform_0(%arg0: i32, %arg1: i32) -> (i32, i32) {
    %c0_i32 = arith.constant 0 : i32
    %c0_i32_0 = arith.constant 0 : i32
    return %arg0, %c0_i32 : i32, i32
  }
  func.func @transform_1(%arg0: i32, %arg1: i32) -> (i32, i32) {
    %c0_i32 = arith.constant 0 : i32
    %c0_i32_0 = arith.constant 0 : i32
    return %arg1, %c0_i32 : i32, i32
  }
  func.func @transform_2(%arg0: i32, %arg1: i32) -> (i32, i32) {
    %c0_i32 = arith.constant 0 : i32
    return %arg0, %arg1 : i32, i32
  }
  func.func @transform_3(%arg0: i32, %arg1: i32) -> (i32, i32, i32) {
    %c0_i32 = arith.constant 0 : i32
    %c0_i32_0 = arith.constant 0 : i32
    %c0_i32_1 = arith.constant 0 : i32
    %c0_i32_2 = arith.constant 0 : i32
    return %c0_i32, %c0_i32_0, %c0_i32_1 : i32, i32, i32
  }
  func.func @transform_4(%arg0: i32, %arg1: i32) -> (i32, i32, i32) {
    %c0_i32 = arith.constant 0 : i32
    %c0_i32_0 = arith.constant 0 : i32
    %c0_i32_1 = arith.constant 0 : i32
    %c0_i32_2 = arith.constant 0 : i32
    return %c0_i32, %c0_i32_0, %c0_i32_1 : i32, i32, i32
  }
  func.func @transform_5(%arg0: i32, %arg1: i32) -> (i32, i32, i32) {
    %c0_i32 = arith.constant 0 : i32
    %c0_i32_0 = arith.constant 0 : i32
    %c0_i32_1 = arith.constant 0 : i32
    %c0_i32_2 = arith.constant 0 : i32
    return %c0_i32, %c0_i32_0, %c0_i32_1 : i32, i32, i32
  }
  func.func @transform_6(%arg0: i32, %arg1: i32) -> (i32, i32, i32) {
    %c0_i32 = arith.constant 0 : i32
    %c0_i32_0 = arith.constant 0 : i32
    %c0_i32_1 = arith.constant 0 : i32
    %c0_i32_2 = arith.constant 0 : i32
    return %c0_i32, %c0_i32_0, %c0_i32_1 : i32, i32, i32
  }
  func.func @transform_7(%arg0: i32, %arg1: i32) -> (i32, i32, i32) {
    %c0_i32 = arith.constant 0 : i32
    %c0_i32_0 = arith.constant 0 : i32
    %c0_i32_1 = arith.constant 0 : i32
    %c0_i32_2 = arith.constant 0 : i32
    return %c0_i32, %c0_i32_0, %c0_i32_1 : i32, i32, i32
  }
  func.func @transform_8(%arg0: i32, %arg1: i32) -> (i32, i32) {
    %c0_i32 = arith.constant 0 : i32
    %c0_i32_0 = arith.constant 0 : i32
    %c0_i32_1 = arith.constant 0 : i32
    return %c0_i32, %c0_i32_0 : i32, i32
  }
  func.func @transform_9(%arg0: i32, %arg1: i32) -> (i32, i32) {
    %c0_i32 = arith.constant 0 : i32
    %c0_i32_0 = arith.constant 0 : i32
    return %arg0, %c0_i32 : i32, i32
  }
}

</mosaic_0001>

<bundles_post_ra>
// kernel: tpu_custom_call.1
= control target key start
LH: loop header
LB: loop body
LE: loop exit
PB: predicated region body
PF: predicated region fallthrough
CT: control target
= control target key end

     0   :  { %s6269_s0 = inlined_call_operand.vmem [shape: bf16[256,16], index: 0, kind: input, shape index: {}]   ;;  %s6270_s1 = inlined_call_operand.vmem [shape: bf16[256,16], index: 1, kind: input, shape index: {}]   ;;  %s6271_s2 = inlined_call_operand.vmem [shape: s8[256,256], index: 2, kind: input, shape index: {}]   ;;  %s6272_s3 = inlined_call_operand.vmem [shape: bf16[2,16,8], index: 3, kind: input, shape index: {}]   ;;  %s6273_s4 = inlined_call_operand.vmem [shape: bf16[2,16,8], index: 4, kind: input, shape index: {}]   ;;  %s6274_s5 = inlined_call_operand.vmem [shape: bf16[2,16,8], index: 5, kind: input, shape index: {}]   ;;  %s6275_s6 = inlined_call_operand.vmem [shape: f32[3,2,8], index: 6, kind: input, shape index: {}]   ;;  %s6276_s7 = inlined_call_operand.vmem [shape: bf16[2,8,16], index: 7, kind: input, shape index: {}]   ;;  %s6277_s8 = inlined_call_operand.vmem [shape: f32[1,16], index: 8, kind: input, shape index: {}]   ;;  %s6278_s9 = inlined_call_operand.vmem [shape: f32[256,16], index: 9, kind: output, shape index: {}]  }
   0x1   :  { %6325 = sst [smem:[#allocation54_spill]] %s6271_s2 }
   0x2   :  { %s4663_s30 = smov 0   ;;  %s4665_s10 = smov 0  }
   0x3   :  { %s4667_s11 = smov 0   ;;  %s4669_s12 = smov 0  }
   0x4   :  { %s4671_s13 = smov 0   ;;  %s4673_s14 = smov 0  }
   0x5   :  { %s4675_s15 = smov 0  }
   0x6 LB: > { %s28_s16 = sadd.s32 1, %s4599_s13  ;;  %s31_s17 = sadd.s32 1, %s4603_s14  ;;  %s4607_s15 = sphi %s4675_s15, %s19_s15   ;;  %s4603_s14 = sphi %s4673_s14, %s6485_s14   ;;  %s4599_s13 = sphi %s4671_s13, %s6484_s13   ;;  %s4595_s12 = sphi %s4669_s12, %s6483_s12   ;;  %s4591_s11 = sphi %s4667_s11, %s6482_s11   ;;  %s4587_s10 = sphi %s4665_s10, %s6481_s10   ;;  %s4583_s30 = sphi %s4663_s30, %s6480_s30  }
   0x7   : > { %p29_p0 = scmp.ge.s32.totalorder %s28_s16, 2  ;;  %p99_p1 = scmp.ne.s32.totalorder %s4587_s10, %s4583_s30 }
   0x8   : > { %p100_p2 = scmp.eq.s32.totalorder %s4607_s15, 0  ;;  %s92_s21 = sadd.s32 1, %s4587_s10 }
   0x9   : > { %s6487_s16 = smov (%p29_p0, %s28_s16), 0  ;;  %s6489_s17 = smov (!%p29_p0, %s31_s17), %s4603_s14 }
   0xa   : > { %6326 = sst [smem:[#allocation6_spill]] %s6487_s16  ;;  %p101_p3 = por %p100_p2, %p99_p1 }
   0xb   : > { %p33_p4 = scmp.ge.s32.totalorder %s6489_s17, 2  ;;  %s88_s18 = ssub.s32 %s4599_s13, %s6487_s16 }
   0xc   : > { %p3710_p6 = scmp.ge.s32.totalorder %s4607_s15, 4 }
   0xd   : > { %s6491_s17 = smov (%p33_p4, %s6489_s17), 0 }
   0xe   : > { %6327 = sst [smem:[#allocation7_spill]] %s6491_s17  ;;  %s87_s19 = ssub.s32 %s4603_s14, %s6491_s17 }
   0xf   : > { %s89_s20 = sor.u32 %s88_s18, %s87_s19  ;;  %295 = sbr.rel (%p3710_p6) target bundleno = 32 (0x20), region = 40 }
  0x10   : > { %p90_p5 = scmp.eq.s32.totalorder %s89_s20, 0 }
  0x12   : > { %s4714_s22 = scalar_select %p90_p5, %s4587_s10, %s92_s21  }
  0x14   : > { %316 = sbr.rel (!%p101_p3) target bundleno = 32 (0x20), region = 52  ;;  %s318_s23 = sand.u32 (%p101_p3), 1, %s4587_s10  }
  0x15   : > { %s3830_s24 = sshll.u32 (%p101_p3), %s4603_s14, 3  ;;  %s3711_s25 = sshll.u32 (%p101_p3), %s318_s23, 5 }
  0x16   : > { %s323_s26 = sadd.s32 (%p101_p3), %s4599_s13, %s3830_s24  ;;  %s6328_s2 = sld [smem:[#allocation54_spill]] (%p101_p3) }
  0x17   : > { %s3714_s27 = sshll.u32 (%p101_p3), %s323_s26, 3  ;;  %s320_s19 = scalar_lea.vmem (%p101_p3), [#allocation5], %s3711_s25 }
  0x1c   : > { %s325_s18 = scalar_lea.vmem %s6328_s2, %s3714_s27 }
  0x1d   : > { %v360_v0 = vld [vmem:[%s325_s18] sm:$0xff]  ;;  %v362_v1 = vld [vmem:[%s325_s18 + $0x10] sm:$0xff] }
  0x1e   : > { %v364_v2 = vld [vmem:[%s325_s18 + $0x20] sm:$0xff]  ;;  %361 = vst [vmem:[%s320_s19] sm:$0xff] %v360_v0  ;;  %363 = vst [vmem:[%s320_s19 + $0x8] sm:$0xff] %v362_v1  ;;  %v366_v3 = vld [vmem:[%s325_s18 + $0x30] sm:$0xff] }
  0x1f   : > { %365 = vst [vmem:[%s320_s19 + $0x10] sm:$0xff] %v364_v2  ;;  %367 = vst [vmem:[%s320_s19 + $0x18] sm:$0xff] %v366_v3 }
  0x20 PF: > { %p3715_p7 = scmp.ge.s32.totalorder %s4607_s15, 1  ;;  %p372_p8 = scmp.lt.s32.totalorder %s4607_s15, 5 }
  0x22   : > { %p373_p9 = pnand %p3715_p7, %p372_p8 }
  0x24   : > { %376 = sbr.rel (%p373_p9) target bundleno = 2258 (0x8d2), region = 90 }
  0x29   : > { %s379_s20 = sand.u32 1, %s4583_s30   ;;  %s3717_s21 = sshll.u32 %s4595_s12, 4 }
  0x2a   : > { %s3716_s23 = sshll.u32 %s379_s20, 5  ;;  %p425_p10 = scmp.lt.s32.totalorder %s3717_s21, 31 }
  0x2b   : > { %s3719_s24 = sshll.u32 %s4591_s11, 4  ;;  %s4743_s16 = scalar_lea.vmem [#allocation5], %s3716_s23 }
  0x2c   : > { %s6493_s21 = smov (!%p425_p10, %s3717_s21), 31  ;;  %p431_p11 = scmp.lt.s32.totalorder %s3719_s24, 31 }
  0x2d   : > { %s3718_s25 = sshll.u32 %s6493_s21, 2  ;;  %s3722_s26 = sshll.u32 %s6493_s21, 3 }
  0x2e   : > { %s4731_s29 = scalar_lea.vmem %s6269_s0, %s3718_s25  ;;  %s4736_s2 = scalar_lea.vmem %s6278_s9, %s3722_s26 }
  0x2f   : > { %s6495_s24 = smov (!%p431_p11, %s3719_s24), 31  ;;  %p3723_p12 = scmp.ne.s32.totalorder %s4591_s11, 0 }
  0x30   : > { %s3720_s30 = sshll.u32 %s6495_s24, 2 }
  0x31   : > { %s4741_s17 = scalar_lea.vmem %s6270_s1, %s3720_s30  ;;  %447 = sbr.rel (%p3723_p12) target bundleno = 103 (0x67), region = 98 }
  0x36   : > { %vm448_vm0 = vcmask 7168   ;;  %vm513_vm1 = vcmask 64512   ;;  %v4609_v4 = vmov -inf   ;;  %v4610_v5 = vmov 0.0  }
  0x37   : > { %449 = vst.msk [vmem:[#allocation2] sm:$0xff] %vm448_vm0, %v4609_v4  ;;  %450 = vst.msk [vmem:[#allocation2 + $0x8] sm:$0xff] %vm448_vm0, %v4609_v4 }
  0x38   : > { %451 = vst.msk [vmem:[#allocation2 + $0x10] sm:$0xff] %vm448_vm0, %v4609_v4  ;;  %452 = vst.msk [vmem:[#allocation2 + $0x18] sm:$0xff] %vm448_vm0, %v4609_v4 }
  0x39   : > { %453 = vst.msk [vmem:[#allocation2 + $0x20] sm:$0xff] %vm448_vm0, %v4609_v4  ;;  %454 = vst.msk [vmem:[#allocation2 + $0x28] sm:$0xff] %vm448_vm0, %v4609_v4 }
  0x3a   : > { %455 = vst.msk [vmem:[#allocation2 + $0x30] sm:$0xff] %vm448_vm0, %v4609_v4  ;;  %456 = vst.msk [vmem:[#allocation2 + $0x38] sm:$0xff] %vm448_vm0, %v4609_v4 }
  0x3b   : > { %457 = vst.msk [vmem:[#allocation2 + $0x40] sm:$0xff] %vm448_vm0, %v4609_v4  ;;  %458 = vst.msk [vmem:[#allocation2 + $0x48] sm:$0xff] %vm448_vm0, %v4609_v4 }
  0x3c   : > { %459 = vst.msk [vmem:[#allocation2 + $0x50] sm:$0xff] %vm448_vm0, %v4609_v4  ;;  %460 = vst.msk [vmem:[#allocation2 + $0x58] sm:$0xff] %vm448_vm0, %v4609_v4 }
  0x3d   : > { %461 = vst.msk [vmem:[#allocation2 + $0x60] sm:$0xff] %vm448_vm0, %v4609_v4  ;;  %462 = vst.msk [vmem:[#allocation2 + $0x68] sm:$0xff] %vm448_vm0, %v4609_v4 }
  0x3e   : > { %463 = vst.msk [vmem:[#allocation2 + $0x70] sm:$0xff] %vm448_vm0, %v4609_v4  ;;  %464 = vst.msk [vmem:[#allocation2 + $0x78] sm:$0xff] %vm448_vm0, %v4609_v4 }
  0x3f   : > { %465 = vst.msk [vmem:[#allocation2 + $0x80] sm:$0xff] %vm448_vm0, %v4609_v4  ;;  %466 = vst.msk [vmem:[#allocation2 + $0x88] sm:$0xff] %vm448_vm0, %v4609_v4 }
  0x40   : > { %467 = vst.msk [vmem:[#allocation2 + $0x90] sm:$0xff] %vm448_vm0, %v4609_v4  ;;  %468 = vst.msk [vmem:[#allocation2 + $0x98] sm:$0xff] %vm448_vm0, %v4609_v4 }
  0x41   : > { %469 = vst.msk [vmem:[#allocation2 + $0xa0] sm:$0xff] %vm448_vm0, %v4609_v4  ;;  %470 = vst.msk [vmem:[#allocation2 + $0xa8] sm:$0xff] %vm448_vm0, %v4609_v4 }
  0x42   : > { %471 = vst.msk [vmem:[#allocation2 + $0xb0] sm:$0xff] %vm448_vm0, %v4609_v4  ;;  %472 = vst.msk [vmem:[#allocation2 + $0xb8] sm:$0xff] %vm448_vm0, %v4609_v4 }
  0x43   : > { %473 = vst.msk [vmem:[#allocation2 + $0xc0] sm:$0xff] %vm448_vm0, %v4609_v4  ;;  %474 = vst.msk [vmem:[#allocation2 + $0xc8] sm:$0xff] %vm448_vm0, %v4609_v4 }
  0x44   : > { %475 = vst.msk [vmem:[#allocation2 + $0xd0] sm:$0xff] %vm448_vm0, %v4609_v4  ;;  %476 = vst.msk [vmem:[#allocation2 + $0xd8] sm:$0xff] %vm448_vm0, %v4609_v4 }
  0x45   : > { %477 = vst.msk [vmem:[#allocation2 + $0xe0] sm:$0xff] %vm448_vm0, %v4609_v4  ;;  %478 = vst.msk [vmem:[#allocation2 + $0xe8] sm:$0xff] %vm448_vm0, %v4609_v4 }
  0x46   : > { %479 = vst.msk [vmem:[#allocation2 + $0xf0] sm:$0xff] %vm448_vm0, %v4609_v4  ;;  %480 = vst.msk [vmem:[#allocation2 + $0xf8] sm:$0xff] %vm448_vm0, %v4609_v4 }
  0x47   : > { %481 = vst.msk [vmem:[#allocation3] sm:$0xff] %vm448_vm0, %v4610_v5  ;;  %482 = vst.msk [vmem:[#allocation3 + $0x8] sm:$0xff] %vm448_vm0, %v4610_v5 }
  0x48   : > { %483 = vst.msk [vmem:[#allocation3 + $0x10] sm:$0xff] %vm448_vm0, %v4610_v5  ;;  %484 = vst.msk [vmem:[#allocation3 + $0x18] sm:$0xff] %vm448_vm0, %v4610_v5 }
  0x49   : > { %485 = vst.msk [vmem:[#allocation3 + $0x20] sm:$0xff] %vm448_vm0, %v4610_v5  ;;  %486 = vst.msk [vmem:[#allocation3 + $0x28] sm:$0xff] %vm448_vm0, %v4610_v5 }
  0x4a   : > { %487 = vst.msk [vmem:[#allocation3 + $0x30] sm:$0xff] %vm448_vm0, %v4610_v5  ;;  %488 = vst.msk [vmem:[#allocation3 + $0x38] sm:$0xff] %vm448_vm0, %v4610_v5 }
  0x4b   : > { %489 = vst.msk [vmem:[#allocation3 + $0x40] sm:$0xff] %vm448_vm0, %v4610_v5  ;;  %490 = vst.msk [vmem:[#allocation3 + $0x48] sm:$0xff] %vm448_vm0, %v4610_v5 }
  0x4c   : > { %491 = vst.msk [vmem:[#allocation3 + $0x50] sm:$0xff] %vm448_vm0, %v4610_v5  ;;  %492 = vst.msk [vmem:[#allocation3 + $0x58] sm:$0xff] %vm448_vm0, %v4610_v5 }
  0x4d   : > { %493 = vst.msk [vmem:[#allocation3 + $0x60] sm:$0xff] %vm448_vm0, %v4610_v5  ;;  %494 = vst.msk [vmem:[#allocation3 + $0x68] sm:$0xff] %vm448_vm0, %v4610_v5 }
  0x4e   : > { %495 = vst.msk [vmem:[#allocation3 + $0x70] sm:$0xff] %vm448_vm0, %v4610_v5  ;;  %496 = vst.msk [vmem:[#allocation3 + $0x78] sm:$0xff] %vm448_vm0, %v4610_v5 }
  0x4f   : > { %497 = vst.msk [vmem:[#allocation3 + $0x80] sm:$0xff] %vm448_vm0, %v4610_v5  ;;  %498 = vst.msk [vmem:[#allocation3 + $0x88] sm:$0xff] %vm448_vm0, %v4610_v5 }
  0x50   : > { %499 = vst.msk [vmem:[#allocation3 + $0x90] sm:$0xff] %vm448_vm0, %v4610_v5  ;;  %500 = vst.msk [vmem:[#allocation3 + $0x98] sm:$0xff] %vm448_vm0, %v4610_v5 }
  0x51   : > { %501 = vst.msk [vmem:[#allocation3 + $0xa0] sm:$0xff] %vm448_vm0, %v4610_v5  ;;  %502 = vst.msk [vmem:[#allocation3 + $0xa8] sm:$0xff] %vm448_vm0, %v4610_v5 }
  0x52   : > { %503 = vst.msk [vmem:[#allocation3 + $0xb0] sm:$0xff] %vm448_vm0, %v4610_v5  ;;  %504 = vst.msk [vmem:[#allocation3 + $0xb8] sm:$0xff] %vm448_vm0, %v4610_v5 }
  0x53   : > { %505 = vst.msk [vmem:[#allocation3 + $0xc0] sm:$0xff] %vm448_vm0, %v4610_v5  ;;  %506 = vst.msk [vmem:[#allocation3 + $0xc8] sm:$0xff] %vm448_vm0, %v4610_v5 }
  0x54   : > { %507 = vst.msk [vmem:[#allocation3 + $0xd0] sm:$0xff] %vm448_vm0, %v4610_v5  ;;  %508 = vst.msk [vmem:[#allocation3 + $0xd8] sm:$0xff] %vm448_vm0, %v4610_v5 }
  0x55   : > { %509 = vst.msk [vmem:[#allocation3 + $0xe0] sm:$0xff] %vm448_vm0, %v4610_v5  ;;  %510 = vst.msk [vmem:[#allocation3 + $0xe8] sm:$0xff] %vm448_vm0, %v4610_v5 }
  0x56   : > { %511 = vst.msk [vmem:[#allocation3 + $0xf0] sm:$0xff] %vm448_vm0, %v4610_v5  ;;  %512 = vst.msk [vmem:[#allocation3 + $0xf8] sm:$0xff] %vm448_vm0, %v4610_v5 }
  0x57   : > { %514 = vst.msk [vmem:[#allocation4] sm:$0xff] %vm513_vm1, %v4610_v5  ;;  %515 = vst.msk [vmem:[#allocation4 + $0x8] sm:$0xff] %vm513_vm1, %v4610_v5 }
  0x58   : > { %516 = vst.msk [vmem:[#allocation4 + $0x10] sm:$0xff] %vm513_vm1, %v4610_v5  ;;  %517 = vst.msk [vmem:[#allocation4 + $0x18] sm:$0xff] %vm513_vm1, %v4610_v5 }
  0x59   : > { %518 = vst.msk [vmem:[#allocation4 + $0x20] sm:$0xff] %vm513_vm1, %v4610_v5  ;;  %519 = vst.msk [vmem:[#allocation4 + $0x28] sm:$0xff] %vm513_vm1, %v4610_v5 }
  0x5a   : > { %520 = vst.msk [vmem:[#allocation4 + $0x30] sm:$0xff] %vm513_vm1, %v4610_v5  ;;  %521 = vst.msk [vmem:[#allocation4 + $0x38] sm:$0xff] %vm513_vm1, %v4610_v5 }
  0x5b   : > { %522 = vst.msk [vmem:[#allocation4 + $0x40] sm:$0xff] %vm513_vm1, %v4610_v5  ;;  %523 = vst.msk [vmem:[#allocation4 + $0x48] sm:$0xff] %vm513_vm1, %v4610_v5 }
  0x5c   : > { %524 = vst.msk [vmem:[#allocation4 + $0x50] sm:$0xff] %vm513_vm1, %v4610_v5  ;;  %525 = vst.msk [vmem:[#allocation4 + $0x58] sm:$0xff] %vm513_vm1, %v4610_v5 }
  0x5d   : > { %526 = vst.msk [vmem:[#allocation4 + $0x60] sm:$0xff] %vm513_vm1, %v4610_v5  ;;  %527 = vst.msk [vmem:[#allocation4 + $0x68] sm:$0xff] %vm513_vm1, %v4610_v5 }
  0x5e   : > { %528 = vst.msk [vmem:[#allocation4 + $0x70] sm:$0xff] %vm513_vm1, %v4610_v5  ;;  %529 = vst.msk [vmem:[#allocation4 + $0x78] sm:$0xff] %vm513_vm1, %v4610_v5 }
  0x5f   : > { %530 = vst.msk [vmem:[#allocation4 + $0x80] sm:$0xff] %vm513_vm1, %v4610_v5  ;;  %531 = vst.msk [vmem:[#allocation4 + $0x88] sm:$0xff] %vm513_vm1, %v4610_v5 }
  0x60   : > { %532 = vst.msk [vmem:[#allocation4 + $0x90] sm:$0xff] %vm513_vm1, %v4610_v5  ;;  %533 = vst.msk [vmem:[#allocation4 + $0x98] sm:$0xff] %vm513_vm1, %v4610_v5 }
  0x61   : > { %534 = vst.msk [vmem:[#allocation4 + $0xa0] sm:$0xff] %vm513_vm1, %v4610_v5  ;;  %535 = vst.msk [vmem:[#allocation4 + $0xa8] sm:$0xff] %vm513_vm1, %v4610_v5 }
  0x62   : > { %536 = vst.msk [vmem:[#allocation4 + $0xb0] sm:$0xff] %vm513_vm1, %v4610_v5  ;;  %537 = vst.msk [vmem:[#allocation4 + $0xb8] sm:$0xff] %vm513_vm1, %v4610_v5 }
  0x63   : > { %538 = vst.msk [vmem:[#allocation4 + $0xc0] sm:$0xff] %vm513_vm1, %v4610_v5  ;;  %539 = vst.msk [vmem:[#allocation4 + $0xc8] sm:$0xff] %vm513_vm1, %v4610_v5 }
  0x64   : > { %540 = vst.msk [vmem:[#allocation4 + $0xd0] sm:$0xff] %vm513_vm1, %v4610_v5  ;;  %541 = vst.msk [vmem:[#allocation4 + $0xd8] sm:$0xff] %vm513_vm1, %v4610_v5 }
  0x65   : > { %542 = vst.msk [vmem:[#allocation4 + $0xe0] sm:$0xff] %vm513_vm1, %v4610_v5  ;;  %543 = vst.msk [vmem:[#allocation4 + $0xe8] sm:$0xff] %vm513_vm1, %v4610_v5 }
  0x66   : > { %544 = vst.msk [vmem:[#allocation4 + $0xf0] sm:$0xff] %vm513_vm1, %v4610_v5  ;;  %545 = vst.msk [vmem:[#allocation4 + $0xf8] sm:$0xff] %vm513_vm1, %v4610_v5 }
  0x67 PF: > { %v4319_v6 = vld [vmem:[%s6273_s4] sm:$0xff]   ;;  %vm679_vm2 = vcmask 130048   ;;  %v4913_v8 = vld [vmem:[%s4741_s17 + $0x8] sm:$0xff]   ;;  %v4918_v9 = vld [vmem:[%s4741_s17 + $0x10] sm:$0xff]   ;;  %v629_v24 = vlaneseq  ;;  %vm1095_vm3 = vcmask 64512   ;;  %p3810_p13 = scmp.ne.s32.totalorder %s4591_s11, 1 }
  0x68   : > { %v4910_v7 = vld [vmem:[%s4741_s17] sm:$0xff]   ;;  %3985 = vmatprep.subr.bf16.mxu1 %v4319_v6  ;;  %v4925_v10 = vld [vmem:[%s4741_s17 + $0x18] sm:$0xff]   ;;  %v4330_v14 = vld [vmem:[%s4731_s29 + $0x8] sm:$0xff]  }
  0x69   : > { %3986 = vmatpush3.bf16.msra.mxu1 %v4319_v6  ;;  %3987 = vmatprep.mubr.msk.bf16.mxu1 %vm679_vm2, %v4910_v7  ;;  %v4928_v11 = vld [vmem:[%s4741_s17 + $0x20] sm:$0xff]   ;;  %v4331_v15 = vld [vmem:[%s4731_s29 + $0x10] sm:$0xff]   ;;  %v4943_v16 = vld [vmem:[%s4741_s17 + $0x28] sm:$0xff]   ;;  %v4970_v25 = vshrl.u32 %v629_v24, 7 }
  0x6a   : > { %v4328_v12 = vld [vmem:[%s6272_s3] sm:$0xff]   ;;  %v4947_v17 = vld [vmem:[%s4741_s17 + $0x30] sm:$0xff]   ;;  %v4332_v18 = vld [vmem:[%s4731_s29 + $0x18] sm:$0xff]  }
  0x6b   : > { %v4329_v13 = vld [vmem:[%s4731_s29] sm:$0xff]   ;;  %3967 = vmatprep.subr.bf16.mxu0 %v4328_v12  ;;  %v4958_v20 = vld [vmem:[%s4741_s17 + $0x38] sm:$0xff]   ;;  %v4334_v21 = vld [vmem:[%s4731_s29 + $0x28] sm:$0xff]   ;;  %v4976_v27 = vsub.s32 0, %v4970_v25 }
  0x6c   : > { %3988 = vmatmul.mubr.msk.bf16.vlgmr.msra.gmra.mxu1 %vm679_vm2, %v4913_v8  ;;  %3968 = vmatpush3.bf16.msra.mxu0 %v4328_v12  ;;  %v4333_v19 = vld [vmem:[%s4731_s29 + $0x20] sm:$0xff]   ;;  %v4335_v22 = vld [vmem:[%s4731_s29 + $0x30] sm:$0xff]   ;;  %v4336_v23 = vld [vmem:[%s4731_s29 + $0x38] sm:$0xff]  }
  0x6d   : > { %3991 = vmatprep.mubr.msk.bf16.mxu1 %vm679_vm2, %v4918_v9  ;;  %3969 = vmatprep.mubr.msk.bf16.mxu0 %vm679_vm2, %v4329_v13  ;;  %v4337_v26 = vld [vmem:[%s6274_s5] sm:$0xff]  }
  0x6e   : > { %4003 = vmatprep.subr.bf16.mxu0 %v4337_v26  ;;  %v4981_v28 = vld [vmem:[%s6275_s6 + $0x2] sm:$0x3]  ;;  %v626_v32 = vld [vmem:[%s6275_s6] sm:$0x3] }
  0x6f   : > { %3970 = vmatmul.mubr.msk.bf16.vlgmr.msra.gmra.mxu0 %vm679_vm2, %v4330_v14  ;;  %v4989_v30 = vrot.slane %v4981_v28, %v4976_v27  ;;  %v4997_v37 = vrot.slane %v626_v32, %v4976_v27 }
  0x70   : > { %3973 = vmatprep.mubr.msk.bf16.mxu0 %vm679_vm2, %v4331_v15  ;;  %4004 = vmatpush3.bf16.msra.mxu0 %v4337_v26 }
  0x74   : > { %3992 = vmatmul.mubr.msk.bf16.gmra.mxu1 %vm679_vm2, %v4925_v10 }
  0x75   : > { %3995 = vmatprep.mubr.msk.bf16.mxu1 %vm679_vm2, %v4928_v11 }
  0x77   : > { %3974 = vmatmul.mubr.msk.bf16.gmra.mxu0 %vm679_vm2, %v4332_v18 }
  0x78   : > { %3977 = vmatprep.mubr.msk.bf16.mxu0 %vm679_vm2, %v4333_v19 }
  0x7c   : > { %3996 = vmatmul.mubr.msk.bf16.gmra.mxu1 %vm679_vm2, %v4943_v16 }
  0x7d   : > { %3999 = vmatprep.mubr.msk.bf16.mxu1 %vm679_vm2, %v4947_v17 }
  0x7f   : > { %3978 = vmatmul.mubr.msk.bf16.gmra.mxu0 %vm679_vm2, %v4334_v21 }
  0x80   : > { %3981 = vmatprep.mubr.msk.bf16.mxu0 %vm679_vm2, %v4335_v22 }
  0x84   : > { %4000 = vmatmul.mubr.msk.bf16.gmra.mxu1 %vm679_vm2, %v4958_v20 }
  0x87   : > { %3982 = vmatmul.mubr.msk.bf16.gmra.mxu0 %vm679_vm2, %v4336_v23 }
  0x88   : > { %4005 = vmatprep.mubr.msk.bf16.mxu0 %vm679_vm2, %v4910_v7 }
  0x8f   : > { %4006 = vmatmul.mubr.msk.bf16.vlgmr.msra.gmra.mxu0 %vm679_vm2, %v4913_v8 }
  0x90   : > { %4009 = vmatprep.mubr.msk.bf16.mxu0 %vm679_vm2, %v4918_v9 }
  0x97   : > { %4010 = vmatmul.mubr.msk.bf16.gmra.mxu0 %vm679_vm2, %v4925_v10 }
  0x98   : > { %4013 = vmatprep.mubr.msk.bf16.mxu0 %vm679_vm2, %v4928_v11 }
  0x9f   : > { %4014 = vmatmul.mubr.msk.bf16.gmra.mxu0 %vm679_vm2, %v4943_v16 }
  0xa0   : > { %4017 = vmatprep.mubr.msk.bf16.mxu0 %vm679_vm2, %v4947_v17 }
  0xa7   : > { %4018 = vmatmul.mubr.msk.bf16.gmra.mxu0 %vm679_vm2, %v4958_v20 }
 0x12c   : > { %v3989_v29 = vpop.f32.mrf.mxu1 }
 0x12d   : > { %v918_v34 = vadd.f32 %v3989_v29, %v4989_v30 }
 0x12e   : > { %v909_v31 = vpop.f32.mrf.mxu1 }
 0x12f   : > { %v910_v38 = vadd.f32 %v909_v31, %v4989_v30  ;;  %v3971_v43 = vpop.f32.mrf.mxu0 }
 0x130   : > { %v3990_v33 = vpop.f32.mrf.mxu1  ;;  %v5010_v45 = vadd.f32 %v3971_v43, %v4997_v37 }
 0x131   : > { %v921_v35 = vadd.f32 %v3990_v33, %v4989_v30  ;;  %v738_v46 = vpop.f32.mrf.mxu0 }
 0x132   : > { %v912_v36 = vpop.f32.mrf.mxu1  ;;  %v739_v50 = vadd.f32 %v738_v46, %v4997_v37 }
 0x133   : > { %v5000_v39 = vpack.c.bf16 %v921_v35, %v918_v34  ;;  %v913_v40 = vadd.f32 %v912_v36, %v4989_v30  ;;  %v3972_v48 = vpop.f32.mrf.mxu0 }
 0x134   : > { %v3993_v41 = vpop.f32.mrf.mxu1  ;;  %v5014_v51 = vadd.f32 %v3972_v48, %v4997_v37 }
 0x135   : > { %v5007_v42 = vpack.c.bf16 %v913_v40, %v910_v38  ;;  %v741_v52 = vpop.f32.mrf.mxu0  ;;  %v934_v24 = vadd.f32 %v3993_v41, %v4989_v30 }
 0x136   : > { %v925_v44 = vpop.f32.mrf.mxu1  ;;  %v1080_v54 = vpack.c.bf16 %v5014_v51, %v5010_v45  ;;  %v742_v55 = vadd.f32 %v741_v52, %v4997_v37 }
 0x137   : > { %v3975_v32 = vpop.f32.mrf.mxu0  ;;  %v926_v33 = vadd.f32 %v925_v44, %v4989_v30  ;;  %v1121_v48 = vsel %vm1095_vm3, %v5007_v42, 0 }
 0x138   : > { %v3994_v47 = vpop.f32.mrf.mxu1  ;;  %v1079_v57 = vpack.c.bf16 %v742_v55, %v739_v50 }
 0x139   : > { %v937_v23 = vadd.f32 %v3994_v47, %v4989_v30  ;;  %v754_v36 = vpop.f32.mrf.mxu0 }
 0x13a   : > { %v928_v49 = vpop.f32.mrf.mxu1  ;;  %4037 = vmatprep.mubr.msk.bf16.mxu1 %vm1095_vm3, %v1079_v57 }
 0x13b   : > { %v1090_v26 = vpack.c.bf16 %v937_v23, %v934_v24  ;;  %v929_v31 = vadd.f32 %v928_v49, %v4989_v30  ;;  %v3976_v38 = vpop.f32.mrf.mxu0  ;;  %v755_v49 = vadd.f32 %v754_v36, %v4997_v37 }
 0x13c   : > { %v3997_v53 = vpop.f32.mrf.mxu1  ;;  %v766_v57 = vadd.f32 %v3976_v38, %v4997_v37 }
 0x13d   : > { %v950_v13 = vadd.f32 %v3997_v53, %v4989_v30  ;;  %v1089_v34 = vpack.c.bf16 %v929_v31, %v926_v33  ;;  %v1130_v35 = vsel %vm1095_vm3, %v1090_v26, 0  ;;  %v757_v41 = vpop.f32.mrf.mxu0 }
 0x13e   : > { %v941_v56 = vpop.f32.mrf.mxu1  ;;  %v758_v50 = vadd.f32 %v757_v41, %v4997_v37 }
 0x13f   : > { %v942_v19 = vadd.f32 %v941_v56, %v4989_v30  ;;  %v1127_v40 = vsel %vm1095_vm3, %v1089_v34, 0  ;;  %v3979_v43 = vpop.f32.mrf.mxu0 }
 0x140   : > { %v3998_v58 = vpop.f32.mrf.mxu1  ;;  %v1081_v53 = vpack.c.bf16 %v758_v50, %v755_v49 }
 0x141   : > { %v953_v12 = vadd.f32 %v3998_v58, %v4989_v30  ;;  %v770_v46 = vpop.f32.mrf.mxu0 }
 0x142   : > { %v944_v59 = vpop.f32.mrf.mxu1 }
 0x143   : > { %v1092_v14 = vpack.c.bf16 %v953_v12, %v950_v13  ;;  %v945_v18 = vadd.f32 %v944_v59, %v4989_v30  ;;  %v3980_v44 = vpop.f32.mrf.mxu0 }
 0x144   : > { %v4001_v60 = vpop.f32.mrf.mxu1  ;;  %v782_v45 = vadd.f32 %v3980_v44, %v4997_v37 }
 0x145   : > { %v966_v63 = vadd.f32 %v4001_v60, %v4989_v30  ;;  %v1091_v21 = vpack.c.bf16 %v945_v18, %v942_v19  ;;  %v1136_v22 = vsel %vm1095_vm3, %v1092_v14, 0  ;;  %v773_v47 = vpop.f32.mrf.mxu0  ;;  %v579_v18 = vld [vmem:[%s4743_s16 + $0x8] sm:$0xff] }
 0x146   : > { %v957_v61 = vpop.f32.mrf.mxu1  ;;  %v774_v56 = vadd.f32 %v773_v47, %v4997_v37  ;;  %v589_v24 = vunpack.c.3.s8 %v579_v18  ;;  %v587_v36 = vunpack.c.1.s8 %v579_v18 }
 0x147   : > { %v958_v2 = vadd.f32 %v957_v61, %v4989_v30  ;;  %v1133_v29 = vsel %vm1095_vm3, %v1091_v21, 0  ;;  %v3983_v52 = vpop.f32.mrf.mxu0 }
 0x148   : > { %v4002_v62 = vpop.f32.mrf.mxu1  ;;  %v5125_v44 = vcvt.s32.f32 %v587_v36 }
 0x149   : > { %v969_v0 = vadd.f32 %v4002_v62, %v4989_v30  ;;  %v786_v55 = vpop.f32.mrf.mxu0  ;;  %v779_v62 = vadd.f32 %v3979_v43, %v4997_v37 }
 0x14a   : > { %v960_v1 = vpop.f32.mrf.mxu1  ;;  %v787_v51 = vadd.f32 %v786_v55, %v4997_v37  ;;  %6329 = vst [vmem:[#allocation8_spill] sm:$0xff] %v5125_v44  ;;  %v4611_v55 = vmov 0   ;;  %vm1246_vm11 = vcmp.gt.f32.partialorder %v5125_v44, 0.0 }
 0x14b   : > { %v1094_v3 = vpack.c.bf16 %v969_v0, %v966_v63  ;;  %v961_v4 = vadd.f32 %v960_v1, %v4989_v30  ;;  %v1124_v30 = vsel %vm1095_vm3, %v5000_v39, 0  ;;  %v3984_v58 = vpop.f32.mrf.mxu0  ;;  %v1084_v63 = vpack.c.bf16 %v782_v45, %v779_v62  ;;  %4318 = vset.pattern.permute.xlu1 %v4611_v55  ;;  %4317 = vset.pattern.permute.xlu0 %v4611_v55 }
 0x14c   : > { %v795_v1 = vadd.f32 %v3983_v52, %v4997_v37 }
 0x14d   : > { %v1093_v5 = vpack.c.bf16 %v961_v4, %v958_v2  ;;  %4239 = vmatprep.subr.msk.bf16.mxu1 %vm1095_vm3, %v1094_v3  ;;  %v1142_v6 = vsel %vm1095_vm3, %v1094_v3, 0  ;;  %v789_v61 = vpop.f32.mrf.mxu0  ;;  %v798_v2 = vadd.f32 %v3984_v58, %v4997_v37  ;;  %v578_v4 = vld [vmem:[%s4743_s16] sm:$0xff]  ;;  %v581_v58 = vld [vmem:[%s4743_s16 + $0x18] sm:$0xff] }
 0x14e   : > { %4022 = vmatpush3.bf16.xpose.msra.mxu1 %v1142_v6  ;;  %v582_v6 = vunpack.c.0.s8 %v578_v4  ;;  %v585_v13 = vunpack.c.3.s8 %v578_v4 }
 0x14f   : > { %4240 = vmatprep.subr.msk.bf16.mxu1 %vm1095_vm3, %v1093_v5  ;;  %v1139_v15 = vsel %vm1095_vm3, %v1093_v5, 0  ;;  %v1086_v3 = vpack.c.bf16 %v798_v2, %v795_v1  ;;  %v584_v5 = vunpack.c.2.s8 %v578_v4  ;;  %v596_v2 = vunpack.c.2.s8 %v581_v58 }
 0x151   : > { %v5083_v12 = vcvt.s32.f32 %v584_v5 }
 0x153   : > { %vm1243_vm4 = vcmp.gt.f32.partialorder %v5083_v12, 0.0 }
 0x156   : > { %4024 = vmatpush3.bf16.xpose.msra.mxu1 %v1139_v15  ;;  %v583_v15 = vunpack.c.1.s8 %v578_v4 }
 0x157   : > { %4241 = vmatprep.subr.msk.bf16.mxu1 %vm1095_vm3, %v1092_v14  ;;  %v5085_v14 = vcvt.s32.f32 %v582_v6  ;;  %v595_v6 = vunpack.c.1.s8 %v581_v58 }
 0x159   : > { %vm1241_vm5 = vcmp.gt.f32.partialorder %v5085_v14, 0.0 }
 0x15e   : > { %4026 = vmatpush3.bf16.xpose.msra.mxu1 %v1136_v22 }
 0x15f   : > { %4242 = vmatprep.subr.msk.bf16.mxu1 %vm1095_vm3, %v1091_v21  ;;  %v5092_v21 = vcvt.s32.f32 %v583_v15 }
 0x161   : > { %vm1242_vm7 = vcmp.gt.f32.partialorder %v5092_v21, 0.0 }
 0x166   : > { %4028 = vmatpush3.bf16.xpose.msra.mxu1 %v1133_v29 }
 0x167   : > { %4243 = vmatprep.subr.msk.bf16.mxu1 %vm1095_vm3, %v1090_v26 }
 0x16e   : > { %4030 = vmatpush3.bf16.xpose.msra.mxu1 %v1130_v35  ;;  %v5113_v35 = vcvt.s32.f32 %v589_v24 }
 0x16f   : > { %4244 = vmatprep.subr.msk.bf16.mxu1 %vm1095_vm3, %v1089_v34 }
 0x170   : > { %vm1248_vm9 = vcmp.gt.f32.partialorder %v5113_v35, 0.0 }
 0x176   : > { %4032 = vmatpush3.bf16.xpose.msra.mxu1 %v1127_v40  ;;  %v580_v40 = vld [vmem:[%s4743_s16 + $0x10] sm:$0xff] }
 0x177   : > { %4245 = vmatprep.subr.msk.bf16.mxu1 %vm1095_vm3, %v5000_v39  ;;  %v771_v39 = vadd.f32 %v770_v46, %v4997_v37  ;;  %v590_v46 = vunpack.c.0.s8 %v580_v40  ;;  %v593_v47 = vunpack.c.3.s8 %v580_v40  ;;  %v592_v52 = vunpack.c.2.s8 %v580_v40 }
 0x179   : > { %v1083_v59 = vpack.c.bf16 %v774_v56, %v771_v39  ;;  %v5133_v50 = vcvt.s32.f32 %v590_v46  ;;  %v5141_v56 = vcvt.s32.f32 %v593_v47  ;;  %v4007_v46 = vpop.f32.mrf.mxu0 }
 0x17b   : > { %6330 = vst [vmem:[#allocation9_spill] sm:$0xff] %v5133_v50  ;;  %6331 = vst [vmem:[#allocation10_spill] sm:$0xff] %v5141_v56  ;;  %vm1249_vm12 = vcmp.gt.f32.partialorder %v5133_v50, 0.0  ;;  %vm6281_vm13 = vcmp.gt.f32.partialorder %v5141_v56, 0.0 }
 0x17e   : > { %4034 = vmatpush3.bf16.xpose.msra.mxu1 %v1124_v30 }
 0x17f   : > { %4246 = vmatprep.subr.msk.bf16.mxu1 %vm1095_vm3, %v5007_v42  ;;  %v763_v42 = vadd.f32 %v3975_v32, %v4997_v37  ;;  %v588_v32 = vunpack.c.2.s8 %v579_v18 }
 0x181   : > { %v1082_v60 = vpack.c.bf16 %v766_v57, %v763_v42  ;;  %v5122_v43 = vcvt.s32.f32 %v588_v32  ;;  %v591_v42 = vunpack.c.1.s8 %v580_v40 }
 0x183   : > { %vm1247_vm10 = vcmp.gt.f32.partialorder %v5122_v43, 0.0 }
 0x186   : > { %4036 = vmatpush3.bf16.xpose.msra.mxu1 %v1121_v48 }
 0x18d   : > { %4038 = vmatmul.mubr.msk.bf16.vlgmr.msra.gmra.mxu1 %vm1095_vm3, %v1080_v54  ;;  %v790_v54 = vadd.f32 %v789_v61, %v4997_v37  ;;  %v5088_v37 = vcvt.s32.f32 %v585_v13  ;;  %v594_v61 = vunpack.c.0.s8 %v581_v58 }
 0x18e   : > { %4041 = vmatprep.mubr.msk.bf16.mxu1 %vm1095_vm3, %v1081_v53 }
 0x18f   : > { %v1085_v0 = vpack.c.bf16 %v790_v54, %v787_v51  ;;  %vm1244_vm6 = vcmp.gt.f32.partialorder %v5088_v37, 0.0  ;;  %v5158_v51 = vcvt.s32.f32 %v591_v42  ;;  %v597_v54 = vunpack.c.3.s8 %v581_v58 }
 0x190   : > { %v5166_v1 = vcvt.s32.f32 %v594_v61 }
 0x191   : > { %6332 = vst [vmem:[#allocation11_spill] sm:$0xff] %v5158_v51  ;;  %vm6282_vm15 = vcmp.gt.f32.partialorder %v5158_v51, 0.0  ;;  %v5174_v5 = vcvt.s32.f32 %v597_v54 }
 0x192   : > { %6333 = vst [vmem:[#allocation12_spill] sm:$0xff] %v5166_v1  ;;  %vm1253_vm0 = vcmp.gt.f32.partialorder %v5166_v1, 0.0 }
 0x193   : > { %6334 = vst [vmem:[#allocation13_spill] sm:$0xff] %v5174_v5  ;;  %vm1256_vm1 = vcmp.gt.f32.partialorder %v5174_v5, 0.0 }
 0x195   : > { %4042 = vmatmul.mubr.msk.bf16.gmra.mxu1 %vm1095_vm3, %v1082_v60  ;;  %v5150_v60 = vcvt.s32.f32 %v592_v52 }
 0x196   : > { %4045 = vmatprep.mubr.msk.bf16.mxu1 %vm1095_vm3, %v1083_v59 }
 0x197   : > { %vm1251_vm14 = vcmp.gt.f32.partialorder %v5150_v60, 0.0  ;;  %v6385_v60 = vld [vmem:[#allocation10_spill] sm:$0xff] }
 0x19d   : > { %4046 = vmatmul.mubr.msk.bf16.gmra.mxu1 %vm1095_vm3, %v1084_v63 }
 0x19e   : > { %4049 = vmatprep.mubr.msk.bf16.mxu1 %vm1095_vm3, %v1085_v0 }
 0x1a5   : > { %4050 = vmatmul.mubr.msk.bf16.gmra.mxu1 %vm1095_vm3, %v1086_v3 }
 0x1a6   : > { %4105 = vmatprep.mubr.msk.bf16.mxu1 %vm679_vm2, %v4910_v7  ;;  %v586_v7 = vunpack.c.0.s8 %v579_v18  ;;  %v5182_v18 = vcvt.s32.f32 %v596_v2 }
 0x1a8   : > { %v5106_v31 = vcvt.s32.f32 %v586_v7  ;;  %6335 = vst [vmem:[#allocation14_spill] sm:$0xff] %v5182_v18 }
 0x1aa   : > { %vm1245_vm8 = vcmp.gt.f32.partialorder %v5106_v31, 0.0 }
 0x24d   : > { %v4039_v19 = vpop.f32.mrf.mxu1 }
 0x24e   : > { %v5096_v22 = vsel %vm1243_vm4, %v4039_v19, -1e+30 }
 0x24f   : > { %1293 = vmax.xlane.f32.xlu1 %v5096_v22  ;;  %v1178_v23 = vpop.f32.mrf.mxu1 }
 0x250   : > { %v5102_v26 = vsel %vm1241_vm5, %v1178_v23, -1e+30  ;;  %v5190_v23 = vcvt.s32.f32 %v595_v6 }
 0x251   : > { %1289 = vmax.xlane.f32.xlu0 %v5102_v26  ;;  %v4040_v29 = vpop.f32.mrf.mxu1 }
 0x252   : > { %v5110_v33 = vsel %vm1244_vm6, %v4040_v29, -1e+30  ;;  %6336 = vst [vmem:[#allocation15_spill] sm:$0xff] %v5190_v23 }
 0x253   : > { %1295 = vmax.xlane.f32.xlu1 %v5110_v33  ;;  %v1181_v34 = vpop.f32.mrf.mxu1 }
 0x254   : > { %v5117_v38 = vsel %vm1242_vm7, %v1181_v34, -1e+30 }
 0x255   : > { %1291 = vmax.xlane.f32.xlu0 %v5117_v38  ;;  %v4043_v41 = vpop.f32.mrf.mxu1 }
 0x256   : > { %v5145_v57 = vsel %vm1247_vm10, %v4043_v41, -1e+30  ;;  %v4338_v41 = vld [vmem:[%s6273_s4 + $0x8] sm:$0xff]  }
 0x257   : > { %v1194_v30 = vpop.f32.mrf.mxu1  ;;  %4103 = vmatprep.subr.bf16.mxu1 %v4338_v41 }
 0x258   : > { %v5129_v48 = vsel %vm1245_vm8, %v1194_v30, -1e+30  ;;  %4104 = vmatpush3.bf16.msra.mxu1 %v4338_v41  ;;  %v1016_v30 = vpop.f32.mrf.mxu0 }
 0x259   : > { %1297 = vmax.xlane.f32.xlu0 %v5129_v48  ;;  %v4044_v49 = vpop.f32.mrf.mxu1 }
 0x25a   : > { %v5137_v53 = vsel %vm1248_vm9, %v4044_v49, -1e+30  ;;  %v4008_v47 = vpop.f32.mrf.mxu0 }
 0x25b   : > { %1303 = vmax.xlane.f32.xlu1 %v5137_v53  ;;  %v1197_v39 = vpop.f32.mrf.mxu1  ;;  %4106 = vmatmul.mubr.msk.bf16.vlgmr.msra.gmra.mxu1 %vm679_vm2, %v4913_v8 }
 0x25c   : > { %v5154_v62 = vsel %vm1246_vm11, %v1197_v39, -1e+30  ;;  %4109 = vmatprep.mubr.msk.bf16.mxu1 %vm679_vm2, %v4918_v9  ;;  %v1019_v49 = vpop.f32.mrf.mxu0 }
 0x25d   : > { %1301 = vmax.xlane.f32.xlu0 %v5145_v57  ;;  %v4047_v59 = vpop.f32.mrf.mxu1 }
 0x25e   : > { %v5178_v13 = vsel %vm1251_vm14, %v4047_v59, -1e+30  ;;  %v4011_v8 = vpop.f32.mrf.mxu0 }
 0x25f   : > { %1299 = vmax.xlane.f32.xlu1 %v5154_v62  ;;  %v1210_v45 = vpop.f32.mrf.mxu1 }
 0x260   : > { %v5162_v63 = vsel %vm1249_vm12, %v1210_v45, -1e+30  ;;  %v1032_v52 = vpop.f32.mrf.mxu0 }
 0x261   : > { %1305 = vmax.xlane.f32.xlu0 %v5162_v63  ;;  %v4048_v0 = vpop.f32.mrf.mxu1 }
 0x262   : > { %v5170_v3 = vsel %vm6281_vm13, %v4048_v0, -1e+30  ;;  %vm1255_vm13 = vcmp.gt.f32.partialorder %v5182_v18, 0.0  ;;  %v4012_v9 = vpop.f32.mrf.mxu0 }
 0x263   : > { %1311 = vmax.xlane.f32.xlu1 %v5170_v3  ;;  %v1213_v4 = vpop.f32.mrf.mxu1  ;;  %4110 = vmatmul.mubr.msk.bf16.gmra.mxu1 %vm679_vm2, %v4925_v10 }
 0x264   : > { %v5186_v19 = vsel %vm6282_vm15, %v1213_v4, -1e+30  ;;  %vm6284_vm15 = vcmp.gt.f32.partialorder %v5190_v23, 0.0  ;;  %4113 = vmatprep.mubr.msk.bf16.mxu1 %vm679_vm2, %v4928_v11  ;;  %v1035_v10 = vpop.f32.mrf.mxu0  ;;  %v628_v11 = vld [vmem:[%s6275_s6 + $0x4] sm:$0x3] }
 0x265   : > { %1309 = vmax.xlane.f32.xlu0 %v5178_v13  ;;  %v4051_v15 = vpop.f32.mrf.mxu1  ;;  %v975_v58 = vrot.slane %v628_v11, %v4976_v27 }
 0x266   : > { %v5206_v36 = vsel %vm1255_vm13, %v4051_v15, -1e+30  ;;  %v4015_v55 = vpop.f32.mrf.mxu0 }
 0x267   : > { %1307 = vmax.xlane.f32.xlu1 %v5186_v19  ;;  %v1226_v7 = vpop.f32.mrf.mxu1  ;;  %v1041_v27 = vadd.f32 %v4011_v8, %v975_v58  ;;  %v1044_v11 = vadd.f32 %v4012_v9, %v975_v58 }
 0x268   : > { %v5194_v24 = vsel %vm1253_vm0, %v1226_v7, -1e+30  ;;  %v1048_v39 = vpop.f32.mrf.mxu0 }
 0x269   : > { %1313 = vmax.xlane.f32.xlu0 %v5194_v24  ;;  %v4052_v29 = vpop.f32.mrf.mxu1 }
 0x26a   : > { %v5200_v32 = vsel %vm1256_vm1, %v4052_v29, -1e+30  ;;  %v4016_v42 = vpop.f32.mrf.mxu0  ;;  %v1049_v29 = vadd.f32 %v1048_v39, %v975_v58  ;;  %v1017_v39 = vadd.f32 %v1016_v30, %v975_v58  ;;  %v5242_v30 = vld [vmem:[#allocation2 + $0x18] sm:$0xff] }
 0x26b   : > { %1319 = vmax.xlane.f32.xlu1 %v5200_v32  ;;  %v1229_v34 = vpop.f32.mrf.mxu1  ;;  %4114 = vmatmul.mubr.msk.bf16.gmra.mxu1 %vm679_vm2, %v4943_v16  ;;  %v1060_v4 = vadd.f32 %v4016_v42, %v975_v58  ;;  %v1028_v42 = vadd.f32 %v4008_v47, %v975_v58 }
 0x26c   : > { %v5211_v40 = vsel %vm6284_vm15, %v1229_v34, -1e+30  ;;  %4117 = vmatprep.mubr.msk.bf16.mxu1 %vm679_vm2, %v4947_v17  ;;  %v1051_v16 = vpop.f32.mrf.mxu0  ;;  %vm1593_vm15 = vcmask 7168  }
 0x26d   : > { %1317 = vmax.xlane.f32.xlu0 %v5206_v36  ;;  %v1052_v41 = vadd.f32 %v1051_v16, %v975_v58  ;;  %v1020_v16 = vadd.f32 %v1019_v49, %v975_v58 }
 0x26e   : > { %v4019_v59 = vpop.f32.mrf.mxu0 }
 0x26f   : > { %1315 = vmax.xlane.f32.xlu1 %v5211_v40  ;;  %v1073_v61 = vadd.f32 %v4019_v59, %v975_v58  ;;  %v1734_v23 = vpack.c.bf16 %v1052_v41, %v1049_v29  ;;  %v1033_v59 = vadd.f32 %v1032_v52, %v975_v58  ;;  %v1730_v8 = vpack.c.bf16 %v1020_v16, %v1017_v39  ;;  %v5235_v52 = vld [vmem:[#allocation2 + $0x10] sm:$0xff]  ;;  %v5276_v41 = vld [vmem:[#allocation2 + $0x38] sm:$0xff]  ;;  %v5300_v16 = vld [vmem:[#allocation2 + $0x40] sm:$0xff] }
 0x270   : > { %v1064_v17 = vpop.f32.mrf.mxu0  ;;  %6337 = vst [vmem:[#allocation16_spill] sm:$0xff] %v5276_v41  ;;  %6341 = vst [vmem:[#allocation20_spill] sm:$0xff] %v5300_v16  ;;  %v5338_v29 = vld [vmem:[#allocation2 + $0x60] sm:$0xff] }
 0x271   : > { %v1065_v54 = vadd.f32 %v1064_v17, %v975_v58  ;;  %v1733_v17 = vpack.c.bf16 %v1044_v11, %v1041_v27  ;;  %6348 = vst [vmem:[#allocation27_spill] sm:$0xff] %v5338_v29 }
 0x272   : > { %v4020_v45 = vpop.f32.mrf.mxu0 }
 0x273   : > { %4118 = vmatmul.mubr.msk.bf16.gmra.mxu1 %vm679_vm2, %v4958_v20  ;;  %v1076_v0 = vadd.f32 %v4020_v45, %v975_v58  ;;  %v1057_v20 = vadd.f32 %v4015_v55, %v975_v58  ;;  %v1036_v45 = vadd.f32 %v1035_v10, %v975_v58  ;;  %v1025_v55 = vadd.f32 %v4007_v46, %v975_v58 }
 0x274   : > { %v1067_v2 = vpop.f32.mrf.mxu0 }
 0x275   : > { %v1737_v6 = vpack.c.bf16 %v1076_v0, %v1073_v61  ;;  %v1068_v15 = vadd.f32 %v1067_v2, %v975_v58  ;;  %v1735_v34 = vpack.c.bf16 %v1060_v4, %v1057_v20  ;;  %v1732_v61 = vpack.c.bf16 %v1036_v45, %v1033_v59  ;;  %v5252_v0 = vld [vmem:[#allocation2 + $0x8] sm:$0xff]  ;;  %v5282_v59 = vld [vmem:[#allocation2 + $0x30] sm:$0xff]  ;;  %v5348_v2 = vld [vmem:[#allocation2 + $0x78] sm:$0xff] }
 0x276   : > { %6338 = vst [vmem:[#allocation17_spill] sm:$0xff] %v5282_v59  ;;  %6350 = vst [vmem:[#allocation29_spill] sm:$0xff] %v5348_v2 }
 0x277   : > { %v1736_v7 = vpack.c.bf16 %v1068_v15, %v1065_v54  ;;  %4053 = vmatprep.subr.bf16.mxu0 %v1737_v6  ;;  %v1731_v54 = vpack.c.bf16 %v1028_v42, %v1025_v55  ;;  %v5291_v42 = vld [vmem:[#allocation2 + $0x28] sm:$0xff] }
 0x278   : > { %4054 = vmatpush3.bf16.msra.mxu0 %v1737_v6 }
 0x279   : > { %4055 = vmatprep.subr.bf16.mxu0 %v1736_v7 }
 0x27c   : > { %4056 = vmatpush3.bf16.msra.mxu0 %v1736_v7  ;;  %v5270_v7 = vld [vmem:[#allocation2 + $0x20] sm:$0xff] }
 0x27d   : > { %4057 = vmatprep.subr.bf16.mxu0 %v1735_v34 }
 0x280   : > { %4058 = vmatpush3.bf16.msra.mxu0 %v1735_v34 }
 0x281   : > { %4059 = vmatprep.subr.bf16.mxu0 %v1734_v23 }
 0x284   : > { %4060 = vmatpush3.bf16.msra.mxu0 %v1734_v23  ;;  %v5237_v23 = vld [vmem:[#allocation2] sm:$0xff] }
 0x285   : > { %4061 = vmatprep.subr.bf16.mxu0 %v1733_v17 }
 0x288   : > { %4062 = vmatpush3.bf16.msra.mxu0 %v1733_v17 }
 0x289   : > { %4063 = vmatprep.subr.bf16.mxu0 %v1732_v61 }
 0x28c   : > { %4064 = vmatpush3.bf16.msra.mxu0 %v1732_v61 }
 0x28d   : > { %4065 = vmatprep.subr.bf16.mxu0 %v1731_v54 }
 0x290   : > { %4066 = vmatpush3.bf16.msra.mxu0 %v1731_v54 }
 0x291   : > { %4067 = vmatprep.subr.bf16.mxu0 %v1730_v8 }
 0x294   : > { %4068 = vmatpush3.bf16.msra.mxu0 %v1730_v8 }
 0x2d8   : > { %v1294_v9 = vpop.xlane.xlu1 %1293 }
 0x2d9   : > { %v5240_v46 = vmax.f32 %v5235_v52, %v1294_v9 }
 0x2da   : > { %v1290_v47 = vpop.xlane.xlu0 %1289 }
 0x2db   : > { %1869 = vst.msk [vmem:[#allocation2 + $0x10] sm:$0xff] %vm1593_vm15, %v5240_v46  ;;  %v5249_v10 = vmax.f32 %v5237_v23, %v1290_v47  ;;  %1397 = vperm.xlu1 %4318, %v5240_v46  }
 0x2dc   : > { %v1296_v58 = vpop.xlane.xlu1 %1295 }
 0x2dd   : > { %1867 = vst.msk [vmem:[#allocation2] sm:$0xff] %vm1593_vm15, %v5249_v10  ;;  %v5259_v20 = vmax.f32 %v5242_v30, %v1296_v58  ;;  %1387 = vperm.xlu0 %4317, %v5249_v10   ;;  %v5310_v58 = vld [vmem:[#allocation2 + $0x58] sm:$0xff] }
 0x2de   : > { %v1292_v4 = vpop.xlane.xlu0 %1291  ;;  %6342 = vst [vmem:[#allocation21_spill] sm:$0xff] %v5310_v58 }
 0x2df   : > { %1870 = vst.msk [vmem:[#allocation2 + $0x18] sm:$0xff] %vm1593_vm15, %v5259_v20  ;;  %v5267_v15 = vmax.f32 %v5252_v0, %v1292_v4  ;;  %1402 = vperm.xlu1 %4318, %v5259_v20   ;;  %v5329_v4 = vld [vmem:[#allocation2 + $0x48] sm:$0xff] }
 0x2e0   : > { %6346 = vst [vmem:[#allocation25_spill] sm:$0xff] %v5329_v4 }
 0x2e1   : > { %1868 = vst.msk [vmem:[#allocation2 + $0x8] sm:$0xff] %vm1593_vm15, %v5267_v15 }
 0x2e2   : > { %v1298_v34 = vpop.xlane.xlu0 %1297 }
 0x2e3   : > { %v5279_v27 = vmax.f32 %v5270_v7, %v1298_v34  ;;  %1392 = vperm.xlu1 %4318, %v5267_v15  }
 0x2e4   : > { %v1304_v11 = vpop.xlane.xlu1 %1303 }
 0x2e5   : > { %1871 = vst.msk [vmem:[#allocation2 + $0x20] sm:$0xff] %vm1593_vm15, %v5279_v27  ;;  %v5289_v45 = vmax.f32 %v5276_v41, %v1304_v11 }
 0x2e6   : > { %v1302_v55 = vpop.xlane.xlu0 %1301 }
 0x2e7   : > { %6339 = vst [vmem:[#allocation18_spill] sm:$0xff] %v5289_v45  ;;  %1874 = vst.msk [vmem:[#allocation2 + $0x38] sm:$0xff] %vm1593_vm15, %v5289_v45  ;;  %v5298_v39 = vmax.f32 %v5282_v59, %v1302_v55  ;;  %v5319_v55 = vld [vmem:[#allocation2 + $0x50] sm:$0xff] }
 0x2e8   : > { %v1300_v54 = vpop.xlane.xlu1 %1299  ;;  %6344 = vst [vmem:[#allocation23_spill] sm:$0xff] %v5319_v55 }
 0x2e9   : > { %6340 = vst [vmem:[#allocation19_spill] sm:$0xff] %v5298_v39  ;;  %1873 = vst.msk [vmem:[#allocation2 + $0x30] sm:$0xff] %vm1593_vm15, %v5298_v39  ;;  %v5307_v9 = vmax.f32 %v5291_v42, %v1300_v54  ;;  %1417 = vperm.xlu1 %4318, %v5298_v39  }
 0x2ea   : > { %v1306_v47 = vpop.xlane.xlu0 %1305 }
 0x2eb   : > { %1872 = vst.msk [vmem:[#allocation2 + $0x28] sm:$0xff] %vm1593_vm15, %v5307_v9  ;;  %v5317_v34 = vmax.f32 %v5300_v16, %v1306_v47 }
 0x2ec   : > { %v1312_v11 = vpop.xlane.xlu1 %1311 }
 0x2ed   : > { %6343 = vst [vmem:[#allocation22_spill] sm:$0xff] %v5317_v34  ;;  %1875 = vst.msk [vmem:[#allocation2 + $0x40] sm:$0xff] %vm1593_vm15, %v5317_v34  ;;  %v5326_v8 = vmax.f32 %v5310_v58, %v1312_v11  ;;  %1407 = vperm.xlu1 %4318, %v5279_v27   ;;  %v5368_v58 = vld [vmem:[#allocation2 + $0x68] sm:$0xff] }
 0x2ee   : > { %v1310_v61 = vpop.xlane.xlu0 %1309  ;;  %6354 = vst [vmem:[#allocation33_spill] sm:$0xff] %v5368_v58 }
 0x2ef   : > { %6345 = vst [vmem:[#allocation24_spill] sm:$0xff] %v5326_v8  ;;  %1878 = vst.msk [vmem:[#allocation2 + $0x58] sm:$0xff] %vm1593_vm15, %v5326_v8  ;;  %v5336_v17 = vmax.f32 %v5319_v55, %v1310_v61  ;;  %v5358_v55 = vld [vmem:[#allocation2 + $0x70] sm:$0xff] }
 0x2f0   : > { %v1308_v54 = vpop.xlane.xlu1 %1307  ;;  %6352 = vst [vmem:[#allocation31_spill] sm:$0xff] %v5358_v55 }
 0x2f1   : > { %6347 = vst [vmem:[#allocation26_spill] sm:$0xff] %v5336_v17  ;;  %1877 = vst.msk [vmem:[#allocation2 + $0x50] sm:$0xff] %vm1593_vm15, %v5336_v17  ;;  %v5345_v6 = vmax.f32 %v5329_v4, %v1308_v54  ;;  %1412 = vperm.xlu1 %4318, %v5307_v9  }
 0x2f2   : > { %v1314_v47 = vpop.xlane.xlu0 %1313 }
 0x2f3   : > { %6349 = vst [vmem:[#allocation28_spill] sm:$0xff] %v5345_v6  ;;  %1876 = vst.msk [vmem:[#allocation2 + $0x48] sm:$0xff] %vm1593_vm15, %v5345_v6  ;;  %v5355_v49 = vmax.f32 %v5338_v29, %v1314_v47  ;;  %1432 = vperm.xlu0 %4317, %v5345_v6  }
 0x2f4   : > { %v1320_v11 = vpop.xlane.xlu1 %1319 }
 0x2f5   : > { %6351 = vst [vmem:[#allocation30_spill] sm:$0xff] %v5355_v49  ;;  %1879 = vst.msk [vmem:[#allocation2 + $0x60] sm:$0xff] %vm1593_vm15, %v5355_v49  ;;  %v5365_v16 = vmax.f32 %v5348_v2, %v1320_v11  ;;  %1422 = vperm.xlu1 %4318, %v5289_v45  }
 0x2f6   : > { %v1318_v61 = vpop.xlane.xlu0 %1317 }
 0x2f7   : > { %6353 = vst [vmem:[#allocation32_spill] sm:$0xff] %v5365_v16  ;;  %1882 = vst.msk [vmem:[#allocation2 + $0x78] sm:$0xff] %vm1593_vm15, %v5365_v16  ;;  %v5375_v39 = vmax.f32 %v5358_v55, %v1318_v61  ;;  %1442 = vperm.xlu0 %4317, %v5326_v8   ;;  %v5396_v61 = vld [vmem:[%s6272_s3 + $0x8] sm:$0xff]  }
 0x2f8   : > { %v1316_v54 = vpop.xlane.xlu1 %1315  ;;  %4085 = vmatprep.subr.bf16.mxu0 %v5396_v61 }
 0x2f9   : > { %6355 = vst [vmem:[#allocation34_spill] sm:$0xff] %v5375_v39  ;;  %1881 = vst.msk [vmem:[#allocation2 + $0x70] sm:$0xff] %vm1593_vm15, %v5375_v39  ;;  %v5383_v29 = vmax.f32 %v5368_v58, %v1316_v54  ;;  %1427 = vperm.xlu1 %4318, %v5317_v34   ;;  %v5402_v54 = vsub.s32 1, %v4970_v25 }
 0x2fb   : > { %6356 = vst [vmem:[#allocation35_spill] sm:$0xff] %v5383_v29  ;;  %1880 = vst.msk [vmem:[#allocation2 + $0x68] sm:$0xff] %vm1593_vm15, %v5383_v29  ;;  %1452 = vperm.xlu0 %4317, %v5383_v29   ;;  %v5406_v47 = vrot.slane %v4981_v28, %v5402_v54 }
 0x2fd   : > { %1437 = vperm.xlu1 %4318, %v5336_v17  }
 0x2ff   : > { %1462 = vperm.xlu0 %4317, %v5365_v16  }
 0x301   : > { %1447 = vperm.xlu1 %4318, %v5355_v49  }
 0x305   : > { %1457 = vperm.xlu1 %4318, %v5375_v39  }
 0x31b   : > { %v4107_v11 = vpop.f32.mrf.mxu1 }
 0x31c   : > { %v2043_v2 = vadd.f32 %v4107_v11, %v5406_v47 }
 0x31d   : > { %v2034_v16 = vpop.f32.mrf.mxu1 }
 0x31e   : > { %v2035_v17 = vadd.f32 %v2034_v16, %v5406_v47 }
 0x31f   : > { %v4108_v55 = vpop.f32.mrf.mxu1 }
 0x320   : > { %v2046_v49 = vadd.f32 %v4108_v55, %v5406_v47 }
 0x321   : > { %v2037_v29 = vpop.f32.mrf.mxu1 }
 0x322   : > { %v5411_v58 = vpack.c.bf16 %v2046_v49, %v2043_v2  ;;  %v2038_v39 = vadd.f32 %v2037_v29, %v5406_v47 }
 0x323   : > { %v4111_v25 = vpop.f32.mrf.mxu1 }
 0x324   : > { %v5414_v34 = vpack.c.bf16 %v2038_v39, %v2035_v17 }
 0x325   : > { %v5416_v8 = vpop.f32.mrf.mxu1 }
 0x327   : > { %v4112_v28 = vpop.f32.mrf.mxu1 }
 0x329   : > { %v5418_v59 = vpop.f32.mrf.mxu1 }
 0x32b   : > { %v4115_v6 = vpop.f32.mrf.mxu1 }
 0x32c   : > { %v2075_v56 = vadd.f32 %v4115_v6, %v5406_v47 }
 0x32d   : > { %v2066_v11 = vpop.f32.mrf.mxu1 }
 0x32f   : > { %v4116_v4 = vpop.f32.mrf.mxu1 }
 0x330   : > { %v2078_v50 = vadd.f32 %v4116_v4, %v5406_v47 }
 0x331   : > { %v2069_v45 = vpop.f32.mrf.mxu1 }
 0x333   : > { %v4119_v16 = vpop.f32.mrf.mxu1 }
 0x334   : > { %v2091_v55 = vadd.f32 %v4119_v16, %v5406_v47 }
 0x335   : > { %v2082_v41 = vpop.f32.mrf.mxu1 }
 0x336   : > { %v2083_v2 = vadd.f32 %v2082_v41, %v5406_v47 }
 0x337   : > { %v4120_v49 = vpop.f32.mrf.mxu1 }
 0x338   : > { %v2094_v29 = vadd.f32 %v4120_v49, %v5406_v47 }
 0x339   : > { %v2085_v17 = vpop.f32.mrf.mxu1 }
 0x33a   : > { %v2219_v39 = vpack.c.bf16 %v2094_v29, %v2091_v55  ;;  %v2086_v5 = vadd.f32 %v2085_v17, %v5406_v47  ;;  %v2217_v17 = vpack.c.bf16 %v2078_v50, %v2075_v56 }
 0x33c   : > { %4247 = vmatprep.subr.msk.bf16.mxu1 %vm1095_vm3, %v2219_v39  ;;  %v2266_v1 = vsel %vm1095_vm3, %v2219_v39, 0  ;;  %v2218_v51 = vpack.c.bf16 %v2086_v5, %v2083_v2 }
 0x33d   : > { %4140 = vmatpush3.bf16.xpose.msra.mxu1 %v2266_v1  ;;  %v2067_v1 = vadd.f32 %v2066_v11, %v5406_v47 }
 0x33e   : > { %4248 = vmatprep.subr.msk.bf16.mxu1 %vm1095_vm3, %v2218_v51  ;;  %v2263_v2 = vsel %vm1095_vm3, %v2218_v51, 0  ;;  %v2062_v51 = vadd.f32 %v4112_v28, %v5406_v47 }
 0x345   : > { %4142 = vmatpush3.bf16.xpose.msra.mxu1 %v2263_v2 }
 0x346   : > { %4249 = vmatprep.subr.msk.bf16.mxu1 %vm1095_vm3, %v2217_v17 }
 0x356   : > { %v1398_v18 = vpop.permute.xlu1 %1397 }
 0x357   : > { %v1467_v16 = vsub.f32 %v5096_v22, %v1398_v18  ;;  %v2070_v18 = vadd.f32 %v2069_v45, %v5406_v47 }
 0x358   : > { %v1388_v41 = vpop.permute.xlu0 %1387 }
 0x359   : > { %v1485_v49 = vmul.f32 1.442695, %v1467_v16  ;;  %v1465_v55 = vsub.f32 %v5102_v26, %v1388_v41  ;;  %v2216_v50 = vpack.c.bf16 %v2070_v18, %v2067_v1 }
 0x35a   : > { %v1403_v29 = vpop.permute.xlu1 %1402 }
 0x35b   : > { %4341 = vpow2.f32 %v1485_v49  ;;  %v1481_v44 = vmul.f32 1.442695, %v1465_v55  ;;  %v1468_v5 = vsub.f32 %v5110_v33, %v1403_v29  ;;  %v2260_v33 = vsel %vm1095_vm3, %v2217_v17, 0 }
 0x35c   : > { %4144 = vmatpush3.bf16.xpose.msra.mxu1 %v2260_v33  ;;  %v2257_v49 = vsel %vm1095_vm3, %v2216_v50, 0 }
 0x35d   : > { %4343 = vpow2.f32 %v1481_v44  ;;  %v1487_v6 = vmul.f32 1.442695, %v1468_v5  ;;  %v2059_v44 = vadd.f32 %v4111_v25, %v5406_v47  ;;  %4250 = vmatprep.subr.msk.bf16.mxu1 %vm1095_vm3, %v2216_v50 }
 0x35e   : > { %v1393_v4 = vpop.permute.xlu1 %1392 }
 0x35f   : > { %v1466_v22 = vsub.f32 %v5117_v38, %v1393_v4  ;;  %4345 = vpow2.f32 %v1487_v6  ;;  %v2215_v41 = vpack.c.bf16 %v2062_v51, %v2059_v44 }
 0x361   : > { %v1483_v26 = vmul.f32 1.442695, %v1466_v22  ;;  %v2051_v22 = vadd.f32 %v5416_v8, %v5406_v47 }
 0x363   : > { %4347 = vpow2.f32 %v1483_v26 }
 0x364   : > { %v1418_v56 = vpop.permute.xlu1 %1417  ;;  %4146 = vmatpush3.bf16.xpose.msra.mxu1 %v2257_v49 }
 0x365   : > { %v1471_v55 = vsub.f32 %v5145_v57, %v1418_v56  ;;  %4251 = vmatprep.subr.msk.bf16.mxu1 %vm1095_vm3, %v2215_v41  ;;  %v2054_v57 = vadd.f32 %v5418_v59, %v5406_v47 }
 0x367   : > { %v1493_v2 = vmul.f32 1.442695, %v1471_v55  ;;  %v2214_v44 = vpack.c.bf16 %v2054_v57, %v2051_v22 }
 0x368   : > { %v4342_v38 = vpop.eup %4341  ;;  %v1408_v11 = vpop.permute.xlu1 %1407 }
 0x369   : > { %v1469_v45 = vsub.f32 %v5129_v48, %v1408_v11  ;;  %1549 = vadd.xlane.f32.xlu0 %v4342_v38 }
 0x36a   : > { %v4344_v39 = vpop.eup %4343 }
 0x36b   : > { %v1489_v16 = vmul.f32 1.442695, %v1469_v45  ;;  %1545 = vadd.xlane.f32.xlu1 %v4344_v39 }
 0x36c   : > { %v1413_v29 = vpop.permute.xlu1 %1412  ;;  %v4346_v28 = vpop.eup %4345 }
 0x36d   : > { %4349 = vpow2.f32 %v1489_v16  ;;  %v1470_v25 = vsub.f32 %v5154_v62, %v1413_v29  ;;  %v1723_v26 = vpack.c.bf16 %v4346_v28, %v4342_v38 }
 0x36e   : > { %v1433_v17 = vpop.permute.xlu0 %1432 }
 0x36f   : > { %v1491_v5 = vmul.f32 1.442695, %v1470_v25  ;;  %1551 = vadd.xlane.f32.xlu1 %v4346_v28  ;;  %v1474_v6 = vsub.f32 %v5186_v19, %v1433_v17 }
 0x370   : > { %v4348_v48 = vpop.eup %4347  ;;  %v1423_v4 = vpop.permute.xlu1 %1422 }
 0x371   : > { %4351 = vpow2.f32 %v1491_v5  ;;  %v1472_v62 = vsub.f32 %v5137_v53, %v1423_v4  ;;  %v1722_v1 = vpack.c.bf16 %v4348_v48, %v4344_v39  ;;  %v1499_v33 = vmul.f32 1.442695, %v1474_v6 }
 0x372   : > { %v1443_v18 = vpop.permute.xlu0 %1442  ;;  %4353 = vpow2.f32 %v1493_v2  ;;  %v2254_v53 = vsel %vm1095_vm3, %v2215_v41, 0  ;;  %v2248_v4 = vsel %vm1095_vm3, %v5411_v58, 0 }
 0x373   : > { %v1495_v50 = vmul.f32 1.442695, %v1472_v62  ;;  %1547 = vadd.xlane.f32.xlu1 %v4348_v48  ;;  %4069 = vmatprep.mubr.bf16.mxu0 %v1722_v1  ;;  %v1476_v19 = vsub.f32 %v5170_v3, %v1443_v18 }
 0x374   : > { %4070 = vmatmul.mubr.bf16.vlgmr.msra.gmra.mxu0 %v1723_v26  ;;  %v1428_v56 = vpop.permute.xlu1 %1427  ;;  %4148 = vmatpush3.bf16.xpose.msra.mxu1 %v2254_v53  ;;  %v4474_v53 = vld [vmem:[%s4731_s29 + $0x28] sm:$0xff]  }
 0x375   : > { %4355 = vpow2.f32 %v1495_v50  ;;  %v1473_v8 = vsub.f32 %v5162_v63, %v1428_v56  ;;  %4086 = vmatpush3.bf16.msra.mxu0 %v5396_v61  ;;  %v1503_v51 = vmul.f32 1.442695, %v1476_v19  ;;  %4252 = vmatprep.subr.msk.bf16.mxu1 %vm1095_vm3, %v2214_v44  ;;  %v4469_v19 = vld [vmem:[%s4731_s29] sm:$0xff]   ;;  %v4470_v56 = vld [vmem:[%s4731_s29 + $0x8] sm:$0xff]  }
 0x376   : > { %v1453_v59 = vpop.permute.xlu0 %1452  ;;  %4357 = vpow2.f32 %v1499_v33 }
 0x377   : > { %v1497_v47 = vmul.f32 1.442695, %v1473_v8  ;;  %v1478_v38 = vsub.f32 %v5211_v40, %v1453_v59  ;;  %v2251_v40 = vsel %vm1095_vm3, %v2214_v44, 0  ;;  %v4471_v44 = vld [vmem:[%s4731_s29 + $0x10] sm:$0xff]   ;;  %v4472_v8 = vld [vmem:[%s4731_s29 + $0x18] sm:$0xff]   ;;  %v4473_v59 = vld [vmem:[%s4731_s29 + $0x20] sm:$0xff]  }
 0x378   : > { %v1438_v11 = vpop.permute.xlu1 %1437 }
 0x379   : > { %4359 = vpow2.f32 %v1497_v47  ;;  %v1475_v3 = vsub.f32 %v5178_v13, %v1438_v11  ;;  %v1507_v61 = vmul.f32 1.442695, %v1478_v38  ;;  %v4475_v47 = vld [vmem:[%s4731_s29 + $0x30] sm:$0xff]   ;;  %v4477_v38 = vld [vmem:[%s4741_s17] sm:$0xff]   ;;  %v6357_v11 = vsub.f32 %v5235_v52, %v5240_v46 }
 0x37a   : > { %v4350_v45 = vpop.eup %4349  ;;  %v1463_v39 = vpop.permute.xlu0 %1462  ;;  %4361 = vpow2.f32 %v1503_v51  ;;  %v4476_v51 = vld [vmem:[%s4731_s29 + $0x38] sm:$0xff]   ;;  %v1515_v52 = vld [vmem:[#allocation3 + $0x10] sm:$0xff]  ;;  %v6361_v46 = vsub.f32 %v5270_v7, %v5279_v27 }
 0x37b   : > { %v1501_v63 = vmul.f32 1.442695, %v1475_v3  ;;  %1553 = vadd.xlane.f32.xlu0 %v4350_v45  ;;  %v1480_v16 = vsub.f32 %v5200_v32, %v1463_v39  ;;  %v1357_v3 = vmul.f32 1.442695, %v6357_v11  ;;  %v4480_v11 = vld [vmem:[%s4741_s17 + $0x18] sm:$0xff]  }
 0x37c   : > { %v1448_v41 = vpop.permute.xlu1 %1447  ;;  %4150 = vmatpush3.bf16.xpose.msra.mxu1 %v2251_v40 }
 0x37d   : > { %4363 = vpow2.f32 %v1501_v63  ;;  %v1477_v49 = vsub.f32 %v5194_v24, %v1448_v41  ;;  %v1511_v13 = vmul.f32 1.442695, %v1480_v16  ;;  %4253 = vmatprep.subr.msk.bf16.mxu1 %vm1095_vm3, %v5411_v58  ;;  %v2245_v58 = vsel %vm1095_vm3, %v5414_v34, 0 }
 0x37e   : > { %v4352_v55 = vpop.eup %4351  ;;  %4365 = vpow2.f32 %v1507_v61  ;;  %v6359_v63 = vsub.f32 %v5242_v30, %v5259_v20  ;;  %v6360_v16 = vsub.f32 %v5252_v0, %v5267_v15  ;;  %v6362_v20 = vsub.f32 %v5291_v42, %v5307_v9  ;;  %v1514_v42 = vld [vmem:[#allocation3 + $0x8] sm:$0xff] }
 0x37f   : > { %v1505_v29 = vmul.f32 1.442695, %v1477_v49  ;;  %1555 = vadd.xlane.f32.xlu1 %v4352_v55  ;;  %v1724_v25 = vpack.c.bf16 %v4352_v55, %v4350_v45  ;;  %v5464_v17 = vpop.eup %4353  ;;  %v6358_v45 = vsub.f32 %v5237_v23, %v5249_v10  ;;  %v1361_v23 = vmul.f32 1.442695, %v6361_v46  ;;  %v1513_v55 = vld [vmem:[#allocation3] sm:$0xff] }
 0x380   : > { %v1458_v28 = vpop.permute.xlu1 %1457  ;;  %v1359_v61 = vmul.f32 1.442695, %v6359_v63  ;;  %v1355_v41 = vmul.f32 1.442695, %v6360_v16  ;;  %v1363_v0 = vmul.f32 1.442695, %v6362_v20 }
 0x381   : > { %4367 = vpow2.f32 %v1505_v29  ;;  %v1479_v32 = vsub.f32 %v5206_v36, %v1458_v28  ;;  %4073 = vmatprep.mubr.bf16.mxu0 %v1724_v25  ;;  %v1353_v39 = vmul.f32 1.442695, %v6358_v45  ;;  %v1516_v28 = vld [vmem:[#allocation3 + $0x18] sm:$0xff]  ;;  %v4482_v45 = vld [vmem:[%s4741_s17 + $0x28] sm:$0xff]  }
 0x382   : > { %v5467_v24 = vpop.eup %4355  ;;  %4369 = vpow2.f32 %v1511_v13  ;;  %v4484_v63 = vld [vmem:[%s4741_s17 + $0x38] sm:$0xff]  }
 0x383   : > { %v1509_v5 = vmul.f32 1.442695, %v1479_v32  ;;  %v1725_v48 = vpack.c.bf16 %v5467_v24, %v5464_v17  ;;  %v5471_v2 = vpop.eup %4357 }
 0x384   : > { %4152 = vmatpush3.bf16.xpose.msra.mxu1 %v2248_v4 }
 0x385   : > { %4371 = vpow2.f32 %v1509_v5  ;;  %4074 = vmatmul.mubr.bf16.gmra.mxu0 %v1725_v48  ;;  %4254 = vmatprep.subr.msk.bf16.mxu1 %vm1095_vm3, %v5414_v34 }
 0x386   : > { %v5473_v6 = vpop.eup %4359  ;;  %4373 = vpow2.f32 %v1357_v3  ;;  %v4481_v3 = vld [vmem:[%s4741_s17 + $0x20] sm:$0xff]  }
 0x387   : > { %v1726_v36 = vpack.c.bf16 %v5471_v2, %v5473_v6  ;;  %v5481_v22 = vpop.eup %4361  ;;  %4375 = vpow2.f32 %v1353_v39  ;;  %v4483_v39 = vld [vmem:[%s4741_s17 + $0x30] sm:$0xff]  }
 0x388   : > { %4377 = vpow2.f32 %v1359_v61 }
 0x389   : > { %4077 = vmatprep.mubr.bf16.mxu0 %v1726_v36  ;;  %4379 = vpow2.f32 %v1355_v41 }
 0x38a   : > { %v5483_v57 = vpop.eup %4363  ;;  %4381 = vpow2.f32 %v1361_v23 }
 0x38b   : > { %v1727_v62 = vpack.c.bf16 %v5481_v22, %v5483_v57  ;;  %v5489_v1 = vpop.eup %4365  ;;  %4383 = vpow2.f32 %v1363_v0 }
 0x38c   : > { %4154 = vmatpush3.bf16.xpose.msra.mxu1 %v2245_v58  ;;  %v1517_v58 = vld [vmem:[#allocation3 + $0x20] sm:$0xff] }
 0x38d   : > { %4078 = vmatmul.mubr.bf16.gmra.mxu0 %v1727_v62 }
 0x38e   : > { %v5491_v18 = vpop.eup %4367 }
 0x38f   : > { %v1728_v26 = vpack.c.bf16 %v5489_v1, %v5491_v18  ;;  %v5495_v50 = vpop.eup %4369 }
 0x391   : > { %4081 = vmatprep.mubr.bf16.mxu0 %v1728_v26  ;;  %v4340_v26 = vld [vmem:[%s6274_s5 + $0x8] sm:$0xff]  }
 0x392   : > { %v5497_v33 = vpop.eup %4371  ;;  %4121 = vmatprep.subr.bf16.mxu0 %v4340_v26 }
 0x393   : > { %v1729_v34 = vpack.c.bf16 %v5495_v50, %v5497_v33  ;;  %v5531_v49 = vpop.eup %4373 }
 0x394   : > { %v5536_v10 = vpop.eup %4375  ;;  %v1531_v40 = vmul.f32 %v5531_v49, %v1515_v52 }
 0x395   : > { %4082 = vmatmul.mubr.bf16.gmra.mxu0 %v1729_v34  ;;  %v1529_v29 = vmul.f32 %v5536_v10, %v1513_v55  ;;  %v5543_v25 = vpop.eup %4377 }
 0x396   : > { %4087 = vmatprep.mubr.msk.bf16.mxu0 %vm679_vm2, %v4469_v19  ;;  %v1532_v27 = vmul.f32 %v5543_v25, %v1516_v28  ;;  %v5548_v32 = vpop.eup %4379 }
 0x397   : > { %v1530_v48 = vmul.f32 %v5548_v32, %v1514_v42  ;;  %v5553_v62 = vpop.eup %4381  ;;  %v4485_v42 = vld [vmem:[%s6275_s6] sm:$0x3] }
 0x398   : > { %v1533_v34 = vmul.f32 %v5553_v62, %v1517_v58  ;;  %v5559_v19 = vpop.eup %4383 }
 0x39d   : > { %4088 = vmatmul.mubr.msk.bf16.vlgmr.msra.gmra.mxu0 %vm679_vm2, %v4470_v56 }
 0x39e   : > { %4091 = vmatprep.mubr.msk.bf16.mxu0 %vm679_vm2, %v4471_v44  ;;  %v1518_v44 = vld [vmem:[#allocation3 + $0x28] sm:$0xff]  ;;  %4122 = vmatpush3.bf16.msra.mxu0 %v4340_v26 }
 0x3a5   : > { %4092 = vmatmul.mubr.msk.bf16.gmra.mxu0 %vm679_vm2, %v4472_v8 }
 0x3a6   : > { %4095 = vmatprep.mubr.msk.bf16.mxu0 %vm679_vm2, %v4473_v59  ;;  %v1534_v59 = vmul.f32 %v5559_v19, %v1518_v44 }
 0x3ad   : > { %4096 = vmatmul.mubr.msk.bf16.gmra.mxu0 %vm679_vm2, %v4474_v53  ;;  %v4478_v53 = vld [vmem:[%s4741_s17 + $0x8] sm:$0xff]  }
 0x3ae   : > { %4099 = vmatprep.mubr.msk.bf16.mxu0 %vm679_vm2, %v4475_v47 }
 0x3b5   : > { %4100 = vmatmul.mubr.msk.bf16.gmra.mxu0 %vm679_vm2, %v4476_v51  ;;  %v4479_v51 = vld [vmem:[%s4741_s17 + $0x10] sm:$0xff]  }
 0x3b6   : > { %4123 = vmatprep.mubr.msk.bf16.mxu0 %vm679_vm2, %v4477_v38 }
 0x3bd   : > { %4124 = vmatmul.mubr.msk.bf16.vlgmr.msra.gmra.mxu0 %vm679_vm2, %v4478_v53 }
 0x3be   : > { %4127 = vmatprep.mubr.msk.bf16.mxu0 %vm679_vm2, %v4479_v51 }
 0x3c5   : > { %4128 = vmatmul.mubr.msk.bf16.gmra.mxu0 %vm679_vm2, %v4480_v11 }
 0x3c6   : > { %4131 = vmatprep.mubr.msk.bf16.mxu0 %vm679_vm2, %v4481_v3 }
 0x3cd   : > { %4132 = vmatmul.mubr.msk.bf16.gmra.mxu0 %vm679_vm2, %v4482_v45 }
 0x3ce   : > { %4135 = vmatprep.mubr.msk.bf16.mxu0 %vm679_vm2, %v4483_v39 }
 0x3d5   : > { %4136 = vmatmul.mubr.msk.bf16.gmra.mxu0 %vm679_vm2, %v4484_v63 }
 0x3f2   : > { %v1550_v30 = vpop.xlane.xlu0 %1549 }
 0x3f3   : > { %v1579_v15 = vadd.f32 %v1550_v30, %v1531_v40 }
 0x3f4   : > { %v1546_v13 = vpop.xlane.xlu1 %1545 }
 0x3f5   : > { %1596 = vst.msk [vmem:[#allocation3 + $0x10] sm:$0xff] %vm1593_vm15, %v1579_v15  ;;  %v1577_v7 = vadd.f32 %v1546_v13, %v1529_v29 }
 0x3f7   : > { %1594 = vst.msk [vmem:[#allocation3] sm:$0xff] %vm1593_vm15, %v1577_v7 }
 0x3f8   : > { %v1552_v5 = vpop.xlane.xlu1 %1551 }
 0x3f9   : > { %v1580_v9 = vadd.f32 %v1552_v5, %v1532_v27 }
 0x3fb   : > { %1597 = vst.msk [vmem:[#allocation3 + $0x18] sm:$0xff] %vm1593_vm15, %v1580_v9  ;;  %v1886_v9 = vrot.slane %v4485_v42, %v5402_v54 }
 0x3fc   : > { %v1548_v4 = vpop.xlane.xlu1 %1547 }
 0x3fd   : > { %v1578_v36 = vadd.f32 %v1548_v4, %v1530_v48 }
 0x3ff   : > { %1595 = vst.msk [vmem:[#allocation3 + $0x8] sm:$0xff] %vm1593_vm15, %v1578_v36 }
 0x404   : > { %v1554_v56 = vpop.xlane.xlu0 %1553 }
 0x405   : > { %v1581_v8 = vadd.f32 %v1554_v56, %v1533_v34 }
 0x407   : > { %1598 = vst.msk [vmem:[#allocation3 + $0x20] sm:$0xff] %vm1593_vm15, %v1581_v8 }
 0x408   : > { %v1556_v47 = vpop.xlane.xlu1 %1555 }
 0x409   : > { %v1582_v38 = vadd.f32 %v1556_v47, %v1534_v59 }
 0x40b   : > { %1599 = vst.msk [vmem:[#allocation3 + $0x28] sm:$0xff] %vm1593_vm15, %v1582_v38 }
 0x434   : > { %v5578_v61 = vpop.f32.mrf.mxu0 }
 0x435   : > { %6363 = vst [vmem:[#allocation36_spill] sm:$0xff] %v5578_v61  ;;  %v1522_v61 = vld [vmem:[#allocation3 + $0x48] sm:$0xff] }
 0x436   : > { %v5580_v16 = vpop.f32.mrf.mxu0 }
 0x437   : > { %6364 = vst [vmem:[#allocation37_spill] sm:$0xff] %v5580_v16  ;;  %v6428_v16 = vld [vmem:[#allocation34_spill] sm:$0xff] }
 0x438   : > { %v5582_v41 = vpop.f32.mrf.mxu0 }
 0x439   : > { %6365 = vst [vmem:[#allocation38_spill] sm:$0xff] %v5582_v41 }
 0x43a   : > { %v5584_v52 = vpop.f32.mrf.mxu0 }
 0x43b   : > { %6366 = vst [vmem:[#allocation39_spill] sm:$0xff] %v5584_v52  ;;  %v6427_v52 = vld [vmem:[#allocation31_spill] sm:$0xff] }
 0x445   : > { %v5586_v46 = vpop.f32.mrf.mxu0 }
 0x446   : > { %6367 = vst [vmem:[#allocation40_spill] sm:$0xff] %v5586_v46  ;;  %v6420_v46 = vld [vmem:[#allocation26_spill] sm:$0xff] }
 0x447   : > { %v5588_v23 = vpop.f32.mrf.mxu0 }
 0x448   : > { %6368 = vst [vmem:[#allocation41_spill] sm:$0xff] %v5588_v23  ;;  %v6425_v23 = vld [vmem:[#allocation30_spill] sm:$0xff] }
 0x449   : > { %v5590_v55 = vpop.f32.mrf.mxu0 }
 0x44a   : > { %6369 = vst [vmem:[#allocation42_spill] sm:$0xff] %v5590_v55  ;;  %v6419_v55 = vld [vmem:[#allocation23_spill] sm:$0xff] }
 0x44b   : > { %v5592_v40 = vpop.f32.mrf.mxu0 }
 0x44c   : > { %6370 = vst [vmem:[#allocation43_spill] sm:$0xff] %v5592_v40 }
 0x44d   : > { %v5594_v30 = vpop.f32.mrf.mxu0 }
 0x44e   : > { %6371 = vst [vmem:[#allocation44_spill] sm:$0xff] %v5594_v30 }
 0x44f   : > { %v5596_v20 = vpop.f32.mrf.mxu0 }
 0x450   : > { %6372 = vst [vmem:[#allocation45_spill] sm:$0xff] %v5596_v20 }
 0x451   : > { %v5598_v0 = vpop.f32.mrf.mxu0 }
 0x452   : > { %6373 = vst [vmem:[#allocation46_spill] sm:$0xff] %v5598_v0 }
 0x453   : > { %v5600_v15 = vpop.f32.mrf.mxu0 }
 0x454   : > { %6374 = vst [vmem:[#allocation47_spill] sm:$0xff] %v5600_v15 }
 0x455   : > { %v5602_v29 = vpop.f32.mrf.mxu0 }
 0x456   : > { %6375 = vst [vmem:[#allocation48_spill] sm:$0xff] %v5602_v29 }
 0x457   : > { %v5604_v13 = vpop.f32.mrf.mxu0 }
 0x458   : > { %6376 = vst [vmem:[#allocation49_spill] sm:$0xff] %v5604_v13 }
 0x459   : > { %v5606_v28 = vpop.f32.mrf.mxu0 }
 0x45a   : > { %6377 = vst [vmem:[#allocation50_spill] sm:$0xff] %v5606_v28 }
 0x45b   : > { %v5608_v7 = vpop.f32.mrf.mxu0 }
 0x45c   : > { %6378 = vst [vmem:[#allocation51_spill] sm:$0xff] %v5608_v7 }
 0x45d   : > { %v4089_v27 = vpop.f32.mrf.mxu0 }
 0x45e   : > { %v1936_v34 = vadd.f32 %v4089_v27, %v1886_v9 }
 0x45f   : > { %v1927_v5 = vpop.f32.mrf.mxu0 }
 0x460   : > { %v1928_v58 = vadd.f32 %v1927_v5, %v1886_v9 }
 0x461   : > { %v4090_v48 = vpop.f32.mrf.mxu0 }
 0x462   : > { %v1939_v4 = vadd.f32 %v4090_v48, %v1886_v9 }
 0x463   : > { %v1930_v36 = vpop.f32.mrf.mxu0 }
 0x464   : > { %v1931_v26 = vadd.f32 %v1930_v36, %v1886_v9  ;;  %v2205_v8 = vpack.c.bf16 %v1939_v4, %v1936_v34 }
 0x465   : > { %v4093_v56 = vpop.f32.mrf.mxu0 }
 0x466   : > { %v2204_v44 = vpack.c.bf16 %v1931_v26, %v1928_v58  ;;  %v1952_v3 = vadd.f32 %v4093_v56, %v1886_v9 }
 0x467   : > { %v1943_v59 = vpop.f32.mrf.mxu0 }
 0x468   : > { %4155 = vmatprep.mubr.msk.bf16.mxu1 %vm1095_vm3, %v2204_v44  ;;  %v1944_v38 = vadd.f32 %v1943_v59, %v1886_v9 }
 0x469   : > { %v4094_v53 = vpop.f32.mrf.mxu0  ;;  %4156 = vmatmul.mubr.msk.bf16.vlgmr.msra.gmra.mxu1 %vm1095_vm3, %v2205_v8 }
 0x46a   : > { %v1955_v47 = vadd.f32 %v4094_v53, %v1886_v9 }
 0x46b   : > { %v1946_v51 = vpop.f32.mrf.mxu0 }
 0x46c   : > { %v1947_v11 = vadd.f32 %v1946_v51, %v1886_v9  ;;  %v2207_v63 = vpack.c.bf16 %v1955_v47, %v1952_v3 }
 0x46d   : > { %v4097_v45 = vpop.f32.mrf.mxu0 }
 0x46e   : > { %v2206_v39 = vpack.c.bf16 %v1947_v11, %v1944_v38  ;;  %v1968_v58 = vadd.f32 %v4097_v45, %v1886_v9 }
 0x46f   : > { %v1959_v5 = vpop.f32.mrf.mxu0 }
 0x470   : > { %4159 = vmatprep.mubr.msk.bf16.mxu1 %vm1095_vm3, %v2206_v39  ;;  %v1960_v4 = vadd.f32 %v1959_v5, %v1886_v9 }
 0x471   : > { %v4098_v27 = vpop.f32.mrf.mxu0  ;;  %4160 = vmatmul.mubr.msk.bf16.gmra.mxu1 %vm1095_vm3, %v2207_v63 }
 0x472   : > { %v1971_v42 = vadd.f32 %v4098_v27, %v1886_v9 }
 0x473   : > { %v1962_v48 = vpop.f32.mrf.mxu0 }
 0x474   : > { %v1963_v36 = vadd.f32 %v1962_v48, %v1886_v9  ;;  %v2209_v44 = vpack.c.bf16 %v1971_v42, %v1968_v58 }
 0x475   : > { %v4101_v26 = vpop.f32.mrf.mxu0 }
 0x476   : > { %v2208_v34 = vpack.c.bf16 %v1963_v36, %v1960_v4  ;;  %v1984_v38 = vadd.f32 %v4101_v26, %v1886_v9 }
 0x477   : > { %v1975_v8 = vpop.f32.mrf.mxu0 }
 0x478   : > { %4163 = vmatprep.mubr.msk.bf16.mxu1 %vm1095_vm3, %v2208_v34  ;;  %v1976_v47 = vadd.f32 %v1975_v8, %v1886_v9 }
 0x479   : > { %v4102_v56 = vpop.f32.mrf.mxu0  ;;  %4164 = vmatmul.mubr.msk.bf16.gmra.mxu1 %vm1095_vm3, %v2209_v44 }
 0x47a   : > { %v1987_v59 = vadd.f32 %v4102_v56, %v1886_v9 }
 0x47b   : > { %v1978_v53 = vpop.f32.mrf.mxu0 }
 0x47c   : > { %v1979_v51 = vadd.f32 %v1978_v53, %v1886_v9  ;;  %v2211_v3 = vpack.c.bf16 %v1987_v59, %v1984_v38 }
 0x47e   : > { %v2210_v11 = vpack.c.bf16 %v1979_v51, %v1976_v47 }
 0x480   : > { %4167 = vmatprep.mubr.msk.bf16.mxu1 %vm1095_vm3, %v2210_v11 }
 0x481   : > { %4168 = vmatmul.mubr.msk.bf16.gmra.mxu1 %vm1095_vm3, %v2211_v3  ;;  %v6390_v3 = vld [vmem:[#allocation11_spill] sm:$0xff] }
 0x529   : > { %v4157_v45 = vpop.f32.mrf.mxu1 }
 0x52a   : > { %v5624_v39 = vsel %vm1243_vm4, %v4157_v45, -1e+30  ;;  %vm6386_vm4 = vcmp.gt.f32.partialorder %v6385_v60, 0.0 }
 0x52b   : > { %2402 = vmax.xlane.f32.xlu1 %v5624_v39  ;;  %v2302_v63 = vpop.f32.mrf.mxu1 }
 0x52c   : > { %v5629_v5 = vsel %vm1241_vm5, %v2302_v63, -1e+30  ;;  %vm6391_vm5 = vcmp.gt.f32.partialorder %v6390_v3, 0.0 }
 0x52d   : > { %2398 = vmax.xlane.f32.xlu0 %v5629_v5  ;;  %v4158_v9 = vpop.f32.mrf.mxu1 }
 0x52e   : > { %v5634_v42 = vsel %vm1244_vm6, %v4158_v9, -1e+30 }
 0x52f   : > { %v2305_v27 = vpop.f32.mrf.mxu1 }
 0x530   : > { %v5644_v4 = vsel %vm1242_vm7, %v2305_v27, -1e+30 }
 0x531   : > { %2404 = vmax.xlane.f32.xlu0 %v5634_v42  ;;  %v4161_v12 = vpop.f32.mrf.mxu1 }
 0x532   : > { %v5639_v48 = vsel %vm1247_vm10, %v4161_v12, -1e+30 }
 0x533   : > { %2410 = vmax.xlane.f32.xlu1 %v5639_v48  ;;  %v2318_v14 = vpop.f32.mrf.mxu1 }
 0x534   : > { %v5649_v37 = vsel %vm1245_vm8, %v2318_v14, -1e+30 }
 0x535   : > { %2400 = vmax.xlane.f32.xlu0 %v5644_v4  ;;  %v4162_v36 = vpop.f32.mrf.mxu1 }
 0x536   : > { %v5654_v43 = vsel %vm1248_vm9, %v4162_v36, -1e+30 }
 0x537   : > { %2406 = vmax.xlane.f32.xlu1 %v5649_v37  ;;  %v2321_v58 = vpop.f32.mrf.mxu1  ;;  %6379 = vst [vmem:[#allocation52_spill] sm:$0xff] %v5654_v43 }
 0x538   : > { %v5664_v44 = vsel %vm1246_vm11, %v2321_v58, -1e+30  ;;  %v6397_v58 = vld [vmem:[#allocation15_spill] sm:$0xff] }
 0x539   : > { %2412 = vmax.xlane.f32.xlu0 %v5654_v43  ;;  %v4165_v26 = vpop.f32.mrf.mxu1  ;;  %6382 = vst [vmem:[#allocation8_spill] sm:$0xff] %v5664_v44  ;;  %vm6398_vm6 = vcmp.gt.f32.partialorder %v6397_v58, 0.0 }
 0x53a   : > { %v5659_v21 = vsel %vm1251_vm14, %v4165_v26, -1e+30 }
 0x53b   : > { %6380 = vst [vmem:[#allocation53_spill] sm:$0xff] %v5659_v21  ;;  %2418 = vmax.xlane.f32.xlu1 %v5659_v21  ;;  %v2334_v34 = vpop.f32.mrf.mxu1 }
 0x53c   : > { %v5669_v56 = vsel %vm1249_vm12, %v2334_v34, -1e+30  ;;  %v4125_v34 = vpop.f32.mrf.mxu0 }
 0x53d   : > { %2408 = vmax.xlane.f32.xlu0 %v5664_v44  ;;  %v4166_v8 = vpop.f32.mrf.mxu1  ;;  %6384 = vst [vmem:[#allocation9_spill] sm:$0xff] %v5669_v56 }
 0x53e   : > { %v5674_v53 = vsel %vm6386_vm4, %v4166_v8, -1e+30 }
 0x53f   : > { %2414 = vmax.xlane.f32.xlu1 %v5669_v56  ;;  %v2337_v59 = vpop.f32.mrf.mxu1  ;;  %6387 = vst [vmem:[#allocation10_spill] sm:$0xff] %v5674_v53 }
 0x540   : > { %v5684_v45 = vsel %vm6391_vm5, %v2337_v59, -1e+30 }
 0x541   : > { %2420 = vmax.xlane.f32.xlu0 %v5674_v53  ;;  %v4169_v47 = vpop.f32.mrf.mxu1  ;;  %6392 = vst [vmem:[#allocation11_spill] sm:$0xff] %v5684_v45  ;;  %v1519_v53 = vld [vmem:[#allocation3 + $0x30] sm:$0xff] }
 0x542   : > { %v5679_v38 = vsel %vm1255_vm13, %v4169_v47, -1e+30 }
 0x543   : > { %6389 = vst [vmem:[#allocation14_spill] sm:$0xff] %v5679_v38  ;;  %2426 = vmax.xlane.f32.xlu1 %v5679_v38  ;;  %v2350_v11 = vpop.f32.mrf.mxu1 }
 0x544   : > { %v5689_v27 = vsel %vm1253_vm0, %v2350_v11, -1e+30 }
 0x545   : > { %2416 = vmax.xlane.f32.xlu0 %v5684_v45  ;;  %v4170_v63 = vpop.f32.mrf.mxu1  ;;  %6394 = vst [vmem:[#allocation12_spill] sm:$0xff] %v5689_v27 }
 0x546   : > { %v5694_v14 = vsel %vm1256_vm1, %v4170_v63, -1e+30 }
 0x547   : > { %2422 = vmax.xlane.f32.xlu1 %v5689_v27  ;;  %6396 = vst [vmem:[#allocation13_spill] sm:$0xff] %v5694_v14  ;;  %v2353_v36 = vpop.f32.mrf.mxu1 }
 0x548   : > { %v5700_v26 = vsel %vm6398_vm6, %v2353_v36, -1e+30 }
 0x549   : > { %2428 = vmax.xlane.f32.xlu0 %v5694_v14  ;;  %6399 = vst [vmem:[#allocation15_spill] sm:$0xff] %v5700_v26  ;;  %v6429_v14 = vsub.f32 %v6427_v52, %v6428_v16 }
 0x54b   : > { %1559 = vadd.xlane.f32.xlu1 %v5467_v24  ;;  %v2141_v24 = vpop.f32.mrf.mxu0 }
 0x54d   : > { %2424 = vmax.xlane.f32.xlu0 %v5700_v26  ;;  %v4126_v31 = vpop.f32.mrf.mxu0  ;;  %v1381_v26 = vmul.f32 1.442695, %v6429_v14 }
 0x54f   : > { %1563 = vadd.xlane.f32.xlu1 %v5471_v2  ;;  %v2144_v8 = vpop.f32.mrf.mxu0 }
 0x551   : > { %1557 = vadd.xlane.f32.xlu0 %v5464_v17  ;;  %v4129_v35 = vpop.f32.mrf.mxu0 }
 0x553   : > { %1567 = vadd.xlane.f32.xlu1 %v5481_v22  ;;  %v2157_v2 = vpop.f32.mrf.mxu0 }
 0x555   : > { %1561 = vadd.xlane.f32.xlu0 %v5473_v6  ;;  %v4130_v59 = vpop.f32.mrf.mxu0 }
 0x557   : > { %1571 = vadd.xlane.f32.xlu1 %v5489_v1  ;;  %v2160_v17 = vpop.f32.mrf.mxu0 }
 0x559   : > { %1565 = vadd.xlane.f32.xlu0 %v5483_v57  ;;  %v4133_v60 = vpop.f32.mrf.mxu0  ;;  %v4486_v57 = vld [vmem:[%s6275_s6 + $0x4] sm:$0x3] }
 0x55a   : > { %v2100_v1 = vrot.slane %v4486_v57, %v5402_v54 }
 0x55b   : > { %v2173_v22 = vpop.f32.mrf.mxu0 }
 0x55c   : > { %v2182_v12 = vadd.f32 %v4133_v60, %v2100_v1  ;;  %v2174_v7 = vadd.f32 %v2173_v22, %v2100_v1  ;;  %v2166_v54 = vadd.f32 %v4129_v35, %v2100_v1  ;;  %v2169_v57 = vadd.f32 %v4130_v59, %v2100_v1  ;;  %v5736_v59 = vld [vmem:[#allocation2 + $0xb0] sm:$0xff] }
 0x55d   : > { %1569 = vadd.xlane.f32.xlu0 %v5491_v18  ;;  %v4134_v47 = vpop.f32.mrf.mxu0  ;;  %v2150_v60 = vadd.f32 %v4125_v34, %v2100_v1  ;;  %v2142_v22 = vadd.f32 %v2141_v24, %v2100_v1  ;;  %v6410_v24 = vld [vmem:[#allocation24_spill] sm:$0xff] }
 0x55e   : > { %v2185_v36 = vadd.f32 %v4134_v47, %v2100_v1  ;;  %v2153_v47 = vadd.f32 %v4126_v31, %v2100_v1 }
 0x55f   : > { %v2176_v6 = vpop.f32.mrf.mxu0 }
 0x560   : > { %v2845_v20 = vpack.c.bf16 %v2185_v36, %v2182_v12  ;;  %v2177_v13 = vadd.f32 %v2176_v6, %v2100_v1  ;;  %v2145_v6 = vadd.f32 %v2144_v8, %v2100_v1  ;;  %v5729_v8 = vld [vmem:[#allocation2 + $0x98] sm:$0xff]  ;;  %v5751_v36 = vld [vmem:[#allocation2 + $0xa0] sm:$0xff] }
 0x561   : > { %1573 = vadd.xlane.f32.xlu0 %v5497_v33  ;;  %v4137_v18 = vpop.f32.mrf.mxu0 }
 0x562   : > { %v2198_v11 = vadd.f32 %v4137_v18, %v2100_v1  ;;  %v2844_v0 = vpack.c.bf16 %v2177_v13, %v2174_v7  ;;  %v2158_v18 = vadd.f32 %v2157_v2, %v2100_v1  ;;  %v5717_v7 = vld [vmem:[#allocation2 + $0x80] sm:$0xff] }
 0x563   : > { %v2189_v51 = vpop.f32.mrf.mxu0 }
 0x564   : > { %v2190_v33 = vadd.f32 %v2189_v51, %v2100_v1  ;;  %v2843_v51 = vpack.c.bf16 %v2169_v57, %v2166_v54  ;;  %v6401_v54 = vld [vmem:[#allocation18_spill] sm:$0xff] }
 0x565   : > { %v4138_v3 = vpop.f32.mrf.mxu0 }
 0x566   : > { %v2201_v63 = vadd.f32 %v4138_v3, %v2100_v1  ;;  %v2161_v3 = vadd.f32 %v2160_v17, %v2100_v1 }
 0x567   : > { %v2192_v9 = vpop.f32.mrf.mxu0 }
 0x568   : > { %v2847_v58 = vpack.c.bf16 %v2201_v63, %v2198_v11  ;;  %v2193_v28 = vadd.f32 %v2192_v9, %v2100_v1  ;;  %v2841_v11 = vpack.c.bf16 %v2153_v47, %v2150_v60  ;;  %v5763_v47 = vld [vmem:[#allocation2 + $0xb8] sm:$0xff] }
 0x56a   : > { %v2846_v29 = vpack.c.bf16 %v2193_v28, %v2190_v33  ;;  %4171 = vmatprep.subr.bf16.mxu0 %v2847_v58  ;;  %v2842_v28 = vpack.c.bf16 %v2161_v3, %v2158_v18  ;;  %v5741_v33 = vld [vmem:[#allocation2 + $0x88] sm:$0xff] }
 0x56b   : > { %4172 = vmatpush3.bf16.msra.mxu0 %v2847_v58  ;;  %v6400_v58 = vld [vmem:[#allocation16_spill] sm:$0xff] }
 0x56c   : > { %4173 = vmatprep.subr.bf16.mxu0 %v2846_v29  ;;  %v6402_v57 = vsub.f32 %v6400_v58, %v6401_v54  ;;  %v5786_v54 = vld [vmem:[#allocation2 + $0xa8] sm:$0xff] }
 0x56e   : > { %v1367_v18 = vmul.f32 1.442695, %v6402_v57  ;;  %v6406_v57 = vld [vmem:[#allocation17_spill] sm:$0xff] }
 0x56f   : > { %4174 = vmatpush3.bf16.msra.mxu0 %v2846_v29  ;;  %v2840_v29 = vpack.c.bf16 %v2145_v6, %v2142_v22  ;;  %v5774_v6 = vld [vmem:[#allocation2 + $0xd0] sm:$0xff] }
 0x570   : > { %4175 = vmatprep.subr.bf16.mxu0 %v2845_v20  ;;  %4385 = vpow2.f32 %v1367_v18 }
 0x573   : > { %4176 = vmatpush3.bf16.msra.mxu0 %v2845_v20  ;;  %v5715_v20 = vld [vmem:[#allocation2 + $0x90] sm:$0xff] }
 0x574   : > { %4177 = vmatprep.subr.bf16.mxu0 %v2844_v0 }
 0x577   : > { %4178 = vmatpush3.bf16.msra.mxu0 %v2844_v0 }
 0x578   : > { %4179 = vmatprep.subr.bf16.mxu0 %v2843_v51 }
 0x57b   : > { %4180 = vmatpush3.bf16.msra.mxu0 %v2843_v51  ;;  %v6409_v51 = vld [vmem:[#allocation21_spill] sm:$0xff] }
 0x57c   : > { %4181 = vmatprep.subr.bf16.mxu0 %v2842_v28 }
 0x57f   : > { %4182 = vmatpush3.bf16.msra.mxu0 %v2842_v28  ;;  %v6413_v28 = vld [vmem:[#allocation22_spill] sm:$0xff] }
 0x580   : > { %4183 = vmatprep.subr.bf16.mxu0 %v2841_v11 }
 0x583   : > { %4184 = vmatpush3.bf16.msra.mxu0 %v2841_v11 }
 0x584   : > { %4185 = vmatprep.subr.bf16.mxu0 %v2840_v29 }
 0x587   : > { %4186 = vmatpush3.bf16.msra.mxu0 %v2840_v29  ;;  %v6403_v29 = vld [vmem:[#allocation25_spill] sm:$0xff] }
 0x5b4   : > { %v2403_v13 = vpop.xlane.xlu1 %2402 }
 0x5b5   : > { %v5720_v0 = vmax.f32 %v5715_v20, %v2403_v13  ;;  %v6404_v13 = vld [vmem:[#allocation28_spill] sm:$0xff] }
 0x5b6   : > { %v2399_v34 = vpop.xlane.xlu0 %2398 }
 0x5b7   : > { %2979 = vst.msk [vmem:[#allocation2 + $0x90] sm:$0xff] %vm1593_vm15, %v5720_v0  ;;  %v5727_v31 = vmax.f32 %v5717_v7, %v2399_v34  ;;  %v6405_v34 = vsub.f32 %v6403_v29, %v6404_v13  ;;  %v6412_v29 = vld [vmem:[#allocation20_spill] sm:$0xff] }
 0x5b8   : > { %v6414_v30 = vsub.f32 %v6412_v29, %v6413_v28  ;;  %v6417_v28 = vld [vmem:[#allocation35_spill] sm:$0xff] }
 0x5b9   : > { %2977 = vst.msk [vmem:[#allocation2 + $0x80] sm:$0xff] %vm1593_vm15, %v5727_v31  ;;  %2496 = vperm.xlu1 %4318, %v5727_v31  }
 0x5ba   : > { %v2405_v2 = vpop.xlane.xlu0 %2404  ;;  %v1369_v15 = vmul.f32 1.442695, %v6414_v30 }
 0x5bb   : > { %v5739_v17 = vmax.f32 %v5729_v8, %v2405_v2  ;;  %v1371_v2 = vmul.f32 1.442695, %v6405_v34  ;;  %v5799_v34 = vld [vmem:[#allocation2 + $0xc0] sm:$0xff] }
 0x5bc   : > { %v2411_v1 = vpop.xlane.xlu1 %2410 }
 0x5bd   : > { %2980 = vst.msk [vmem:[#allocation2 + $0x98] sm:$0xff] %vm1593_vm15, %v5739_v17  ;;  %v5748_v9 = vmax.f32 %v5736_v59, %v2411_v1  ;;  %2506 = vperm.xlu1 %4318, %v5720_v0   ;;  %v6411_v1 = vsub.f32 %v6409_v51, %v6410_v24  ;;  %4387 = vpow2.f32 %v1371_v2 }
 0x5be   : > { %v2401_v12 = vpop.xlane.xlu0 %2400 }
 0x5bf   : > { %2983 = vst.msk [vmem:[#allocation2 + $0xb0] sm:$0xff] %vm1593_vm15, %v5748_v9  ;;  %v5761_v3 = vmax.f32 %v5741_v33, %v2401_v12  ;;  %v1375_v35 = vmul.f32 1.442695, %v6411_v1  ;;  %v5825_v1 = vld [vmem:[#allocation2 + $0xf0] sm:$0xff] }
 0x5c0   : > { %v2407_v60 = vpop.xlane.xlu1 %2406  ;;  %6415 = vst [vmem:[#allocation16_spill] sm:$0xff] %v5825_v1 }
 0x5c1   : > { %2978 = vst.msk [vmem:[#allocation2 + $0x88] sm:$0xff] %vm1593_vm15, %v5761_v3  ;;  %v5770_v22 = vmax.f32 %v5751_v36, %v2407_v60  ;;  %2501 = vperm.xlu0 %4317, %v5761_v3   ;;  %2511 = vperm.xlu1 %4318, %v5739_v17   ;;  %v6407_v60 = vld [vmem:[#allocation19_spill] sm:$0xff] }
 0x5c2   : > { %v2413_v11 = vpop.xlane.xlu0 %2412  ;;  %v6408_v63 = vsub.f32 %v6406_v57, %v6407_v60  ;;  %v5811_v60 = vld [vmem:[#allocation2 + $0xd8] sm:$0xff] }
 0x5c3   : > { %2981 = vst.msk [vmem:[#allocation2 + $0xa0] sm:$0xff] %vm1593_vm15, %v5770_v22  ;;  %v5784_v12 = vmax.f32 %v5763_v47, %v2413_v11 }
 0x5c4   : > { %v2419_v58 = vpop.xlane.xlu1 %2418  ;;  %v1365_v18 = vmul.f32 1.442695, %v6408_v63  ;;  %v5837_v63 = vld [vmem:[#allocation2 + $0xc8] sm:$0xff] }
 0x5c5   : > { %2984 = vst.msk [vmem:[#allocation2 + $0xb8] sm:$0xff] %vm1593_vm15, %v5784_v12  ;;  %v5796_v13 = vmax.f32 %v5774_v6, %v2419_v58  ;;  %2516 = vperm.xlu0 %4317, %v5770_v22  }
 0x5c6   : > { %v2409_v11 = vpop.xlane.xlu0 %2408  ;;  %4389 = vpow2.f32 %v1365_v18  ;;  %v6416_v18 = vld [vmem:[#allocation33_spill] sm:$0xff] }
 0x5c7   : > { %2987 = vst.msk [vmem:[#allocation2 + $0xd0] sm:$0xff] %vm1593_vm15, %v5796_v13  ;;  %v5809_v57 = vmax.f32 %v5786_v54, %v2409_v11  ;;  %4391 = vpow2.f32 %v1375_v35  ;;  %v6418_v30 = vsub.f32 %v6416_v18, %v6417_v28  ;;  %v6421_v35 = vsub.f32 %v6419_v55, %v6420_v46  ;;  %v1520_v18 = vld [vmem:[#allocation3 + $0x38] sm:$0xff]  ;;  %v5886_v46 = vld [vmem:[#allocation2 + $0xe8] sm:$0xff] }
 0x5c8   : > { %v2415_v58 = vpop.xlane.xlu1 %2414  ;;  %4393 = vpow2.f32 %v1369_v15  ;;  %v5860_v15 = vpop.eup %4385  ;;  %v6424_v11 = vld [vmem:[#allocation27_spill] sm:$0xff] }
 0x5c9   : > { %2982 = vst.msk [vmem:[#allocation2 + $0xa8] sm:$0xff] %vm1593_vm15, %v5809_v57  ;;  %v5821_v51 = vmax.f32 %v5799_v34, %v2415_v58  ;;  %2521 = vperm.xlu1 %4318, %v5809_v57   ;;  %2526 = vperm.xlu0 %4317, %v5748_v9   ;;  %v1379_v29 = vmul.f32 1.442695, %v6418_v30  ;;  %v1373_v40 = vmul.f32 1.442695, %v6421_v35  ;;  %v5851_v30 = vld [vmem:[#allocation2 + $0xe0] sm:$0xff]  ;;  %v6426_v41 = vsub.f32 %v6424_v11, %v6425_v23 }
 0x5ca   : > { %v2421_v2 = vpop.xlane.xlu0 %2420  ;;  %v5862_v35 = vld [vmem:[#allocation2 + $0xf8] sm:$0xff]  ;;  %v1536_v23 = vmul.f32 %v5860_v15, %v1520_v18  ;;  %v5884_v11 = vpop.eup %4387 }
 0x5cb   : > { %2985 = vst.msk [vmem:[#allocation2 + $0xc0] sm:$0xff] %vm1593_vm15, %v5821_v51  ;;  %v5835_v58 = vmax.f32 %v5811_v60, %v2421_v2  ;;  %4395 = vpow2.f32 %v1379_v29  ;;  %6423 = vst [vmem:[#allocation25_spill] sm:$0xff] %v5862_v35  ;;  %v1377_v29 = vmul.f32 1.442695, %v6426_v41  ;;  %v1538_v16 = vmul.f32 %v5884_v11, %v1522_v61  ;;  %v1521_v61 = vld [vmem:[#allocation3 + $0x40] sm:$0xff] }
 0x5cc   : > { %v2427_v24 = vpop.xlane.xlu1 %2426  ;;  %4397 = vpow2.f32 %v1373_v40  ;;  %v1524_v40 = vld [vmem:[#allocation3 + $0x58] sm:$0xff] }
 0x5cd   : > { %2988 = vst.msk [vmem:[#allocation2 + $0xd8] sm:$0xff] %vm1593_vm15, %v5835_v58  ;;  %v5847_v28 = vmax.f32 %v5825_v1, %v2427_v24  ;;  %2531 = vperm.xlu1 %4318, %v5784_v12   ;;  %2536 = vperm.xlu0 %4317, %v5821_v51   ;;  %4399 = vpow2.f32 %v1377_v29 }
 0x5ce   : > { %v2417_v2 = vpop.xlane.xlu0 %2416  ;;  %4401 = vpow2.f32 %v1381_v26 }
 0x5cf   : > { %6422 = vst [vmem:[#allocation18_spill] sm:$0xff] %v5847_v28  ;;  %2991 = vst.msk [vmem:[#allocation2 + $0xf0] sm:$0xff] %vm1593_vm15, %v5847_v28  ;;  %v5858_v55 = vmax.f32 %v5837_v63, %v2417_v2 }
 0x5d0   : > { %v2423_v24 = vpop.xlane.xlu1 %2422 }
 0x5d1   : > { %2986 = vst.msk [vmem:[#allocation2 + $0xc8] sm:$0xff] %vm1593_vm15, %v5858_v55  ;;  %v5872_v2 = vmax.f32 %v5851_v30, %v2423_v24  ;;  %2541 = vperm.xlu1 %4318, %v5858_v55   ;;  %2546 = vperm.xlu0 %4317, %v5796_v13  }
 0x5d2   : > { %v2429_v1 = vpop.xlane.xlu0 %2428 }
 0x5d3   : > { %2989 = vst.msk [vmem:[#allocation2 + $0xe0] sm:$0xff] %vm1593_vm15, %v5872_v2  ;;  %v5881_v41 = vmax.f32 %v5862_v35, %v2429_v1  ;;  %v4390_v18 = vpop.eup %4389 }
 0x5d4   : > { %v1560_v24 = vpop.xlane.xlu1 %1559  ;;  %v5902_v52 = vpop.eup %4391 }
 0x5d5   : > { %2992 = vst.msk [vmem:[#allocation2 + $0xf8] sm:$0xff] %vm1593_vm15, %v5881_v41  ;;  %v1584_v1 = vadd.f32 %v1560_v24, %v1536_v23  ;;  %2551 = vperm.xlu1 %4318, %v5835_v58   ;;  %2556 = vperm.xlu0 %4317, %v5872_v2   ;;  %v1540_v26 = vmul.f32 %v5902_v52, %v1524_v40  ;;  %v1526_v23 = vld [vmem:[#allocation3 + $0x68] sm:$0xff] }
 0x5d6   : > { %v2425_v38 = vpop.xlane.xlu0 %2424 }
 0x5d7   : > { %1601 = vst.msk [vmem:[#allocation3 + $0x38] sm:$0xff] %vm1593_vm15, %v1584_v1  ;;  %v5899_v29 = vmax.f32 %v5886_v46, %v2425_v38  ;;  %v1535_v38 = vmul.f32 %v4390_v18, %v1519_v53  ;;  %v4394_v1 = vpop.eup %4393  ;;  %v1523_v53 = vld [vmem:[#allocation3 + $0x50] sm:$0xff] }
 0x5d8   : > { %v1564_v14 = vpop.xlane.xlu1 %1563  ;;  %v4396_v45 = vpop.eup %4395 }
 0x5d9   : > { %2990 = vst.msk [vmem:[#allocation2 + $0xe8] sm:$0xff] %vm1593_vm15, %v5899_v29  ;;  %v1586_v24 = vadd.f32 %v1564_v14, %v1538_v16  ;;  %2561 = vperm.xlu1 %4318, %v5899_v29   ;;  %2566 = vperm.xlu0 %4317, %v5847_v28   ;;  %v1537_v16 = vmul.f32 %v4394_v1, %v1521_v61  ;;  %v4398_v14 = vpop.eup %4397 }
 0x5da   : > { %v1558_v35 = vpop.xlane.xlu0 %1557  ;;  %v1542_v44 = vmul.f32 %v4396_v45, %v1526_v23  ;;  %v1539_v40 = vmul.f32 %v4398_v14, %v1523_v53 }
 0x5db   : > { %1603 = vst.msk [vmem:[#allocation3 + $0x48] sm:$0xff] %vm1593_vm15, %v1586_v24  ;;  %v1583_v27 = vadd.f32 %v1558_v35, %v1535_v38  ;;  %v4400_v38 = vpop.eup %4399 }
 0x5dc   : > { %v1568_v21 = vpop.xlane.xlu1 %1567 }
 0x5dd   : > { %1600 = vst.msk [vmem:[#allocation3 + $0x30] sm:$0xff] %vm1593_vm15, %v1583_v27  ;;  %v1588_v43 = vadd.f32 %v1568_v21, %v1540_v26  ;;  %2571 = vperm.xlu1 %4318, %v5881_v41   ;;  %v1525_v21 = vld [vmem:[#allocation3 + $0x60] sm:$0xff]  ;;  %v1527_v26 = vld [vmem:[#allocation3 + $0x70] sm:$0xff] }
 0x5de   : > { %v1562_v28 = vpop.xlane.xlu0 %1561 }
 0x5df   : > { %1605 = vst.msk [vmem:[#allocation3 + $0x58] sm:$0xff] %vm1593_vm15, %v1588_v43  ;;  %v1585_v56 = vadd.f32 %v1562_v28, %v1537_v16  ;;  %v1541_v43 = vmul.f32 %v4400_v38, %v1525_v21  ;;  %v4402_v28 = vpop.eup %4401 }
 0x5e0   : > { %v1572_v24 = vpop.xlane.xlu1 %1571 }
 0x5e1   : > { %1602 = vst.msk [vmem:[#allocation3 + $0x40] sm:$0xff] %vm1593_vm15, %v1585_v56  ;;  %v1590_v35 = vadd.f32 %v1572_v24, %v1542_v44  ;;  %1628 = vperm.xlu1 %4318, %v5536_v10   ;;  %v1543_v10 = vmul.f32 %v4402_v28, %v1527_v26 }
 0x5e2   : > { %v1566_v27 = vpop.xlane.xlu0 %1565 }
 0x5e3   : > { %1607 = vst.msk [vmem:[#allocation3 + $0x68] sm:$0xff] %vm1593_vm15, %v1590_v35  ;;  %v1587_v61 = vadd.f32 %v1566_v27, %v1539_v40  ;;  %v6433_v35 = vsub.f32 %v5741_v33, %v5761_v3  ;;  %v6437_v33 = vsub.f32 %v5736_v59, %v5748_v9  ;;  %v6441_v9 = vsub.f32 %v5799_v34, %v5821_v51 }
 0x5e4   : > { %v6444_v51 = vsub.f32 %v5811_v60, %v5835_v58  ;;  %v6446_v60 = vsub.f32 %v5886_v46, %v5899_v29 }
 0x5e5   : > { %1604 = vst.msk [vmem:[#allocation3 + $0x50] sm:$0xff] %vm1593_vm15, %v1587_v61  ;;  %1633 = vperm.xlu1 %4318, %v5548_v32   ;;  %v6430_v32 = vld [vmem:[#allocation29_spill] sm:$0xff]  ;;  %v2464_v40 = vmul.f32 1.442695, %v6433_v35  ;;  %v2474_v3 = vmul.f32 1.442695, %v6437_v33 }
 0x5e6   : > { %v1570_v23 = vpop.xlane.xlu0 %1569  ;;  %v2488_v58 = vmul.f32 1.442695, %v6446_v60  ;;  %v6449_v33 = vld [vmem:[#allocation52_spill] sm:$0xff] }
 0x5e7   : > { %v1589_v16 = vadd.f32 %v1570_v23, %v1541_v43  ;;  %v6452_v60 = vld [vmem:[#allocation12_spill] sm:$0xff] }
 0x5e9   : > { %1606 = vst.msk [vmem:[#allocation3 + $0x60] sm:$0xff] %vm1593_vm15, %v1589_v16  ;;  %1638 = vperm.xlu1 %4318, %v5531_v49   ;;  %v6431_v49 = vld [vmem:[#allocation32_spill] sm:$0xff] }
 0x5ea   : > { %v1574_v44 = vpop.xlane.xlu0 %1573  ;;  %v6432_v53 = vsub.f32 %v6430_v32, %v6431_v49 }
 0x5eb   : > { %v1591_v56 = vadd.f32 %v1574_v44, %v1543_v10 }
 0x5ec   : > { %v1383_v24 = vmul.f32 1.442695, %v6432_v53 }
 0x5ed   : > { %1608 = vst.msk [vmem:[#allocation3 + $0x70] sm:$0xff] %vm1593_vm15, %v1591_v56  ;;  %1643 = vperm.xlu1 %4318, %v5543_v25   ;;  %v6434_v25 = vsub.f32 %v5717_v7, %v5727_v31  ;;  %v6438_v7 = vsub.f32 %v5729_v8, %v5739_v17  ;;  %v2478_v8 = vmul.f32 1.442695, %v6441_v9  ;;  %v6451_v9 = vld [vmem:[#allocation11_spill] sm:$0xff] }
 0x5ee   : > { %4403 = vpow2.f32 %v1383_v24 }
 0x5ef   : > { %4405 = vpow2.f32 %v2464_v40  ;;  %v2468_v31 = vmul.f32 1.442695, %v6438_v7 }
 0x5f1   : > { %1648 = vperm.xlu1 %4318, %v5553_v62   ;;  %v2462_v62 = vmul.f32 1.442695, %v6434_v25  ;;  %v6447_v25 = vld [vmem:[#allocation8_spill] sm:$0xff] }
 0x5f3   : > { %4407 = vpow2.f32 %v2462_v62 }
 0x5f5   : > { %1653 = vperm.xlu1 %4318, %v5559_v19  }
 0x5f8   : > { %1575 = vadd.xlane.f32.xlu0 %v5495_v50  ;;  %v6435_v50 = vsub.f32 %v5751_v36, %v5770_v22  ;;  %v6439_v36 = vsub.f32 %v5774_v6, %v5796_v13 }
 0x5f9   : > { %1658 = vperm.xlu1 %4318, %v4390_v18   ;;  %v2484_v18 = vmul.f32 1.442695, %v6444_v51 }
 0x5fa   : > { %v2470_v19 = vmul.f32 1.442695, %v6435_v50  ;;  %v2482_v22 = vmul.f32 1.442695, %v6439_v36 }
 0x5fb   : > { %v5957_v59 = vpop.eup %4403 }
 0x5fc   : > { %4409 = vpow2.f32 %v2470_v19  ;;  %v5962_v17 = vpop.eup %4405 }
 0x5fd   : > { %1663 = vperm.xlu1 %4318, %v5860_v15   ;;  %v6436_v15 = vsub.f32 %v5715_v20, %v5720_v0  ;;  %v6440_v20 = vsub.f32 %v5763_v47, %v5784_v12  ;;  %v6443_v12 = vsub.f32 %v5851_v30, %v5872_v2  ;;  %v6445_v30 = vsub.f32 %v5837_v63, %v5858_v55 }
 0x5ff   : > { %v2476_v0 = vmul.f32 1.442695, %v6440_v20  ;;  %v2486_v13 = vmul.f32 1.442695, %v6443_v12  ;;  %v2480_v2 = vmul.f32 1.442695, %v6445_v30 }
 0x600   : > { %v5969_v47 = vpop.eup %4407  ;;  %v6450_v20 = vld [vmem:[#allocation53_spill] sm:$0xff] }
 0x601   : > { %1673 = vperm.xlu1 %4318, %v5884_v11   ;;  %v2466_v11 = vmul.f32 1.442695, %v6436_v15  ;;  %v6448_v15 = vld [vmem:[#allocation9_spill] sm:$0xff] }
 0x603   : > { %4411 = vpow2.f32 %v2466_v11 }
 0x604   : > { %4413 = vpow2.f32 %v2474_v3 }
 0x605   : > { %1678 = vperm.xlu1 %4318, %v4398_v14   ;;  %4415 = vpow2.f32 %v2468_v31 }
 0x606   : > { %4417 = vpow2.f32 %v2482_v22 }
 0x607   : > { %4419 = vpow2.f32 %v2476_v0 }
 0x608   : > { %4421 = vpow2.f32 %v2478_v8 }
 0x609   : > { %1683 = vperm.xlu1 %4318, %v5902_v52   ;;  %v5974_v34 = vpop.eup %4409 }
 0x60d   : > { %1688 = vperm.xlu1 %4318, %v4400_v38  }
 0x60e   : > { %1668 = vperm.xlu0 %4317, %v4394_v1  }
 0x611   : > { %1693 = vperm.xlu1 %4318, %v4396_v45   ;;  %v6442_v45 = vsub.f32 %v5786_v54, %v5809_v57  ;;  %v5981_v54 = vpop.eup %4411 }
 0x612   : > { %1698 = vperm.xlu0 %4317, %v4402_v28   ;;  %v5983_v57 = vpop.eup %4413 }
 0x613   : > { %v2472_v6 = vmul.f32 1.442695, %v6442_v45  ;;  %v5990_v52 = vpop.eup %4415 }
 0x614   : > { %v5992_v1 = vpop.eup %4417 }
 0x615   : > { %1703 = vperm.xlu1 %4318, %v5957_v59   ;;  %4423 = vpow2.f32 %v2472_v6  ;;  %v5999_v14 = vpop.eup %4419 }
 0x616   : > { %2743 = vperm.xlu0 %4317, %v5962_v17   ;;  %4425 = vpow2.f32 %v2486_v13  ;;  %v6001_v38 = vpop.eup %4421 }
 0x617   : > { %4427 = vpow2.f32 %v2484_v18 }
 0x618   : > { %4429 = vpow2.f32 %v2480_v2 }
 0x619   : > { %2738 = vperm.xlu1 %4318, %v5969_v47   ;;  %4431 = vpow2.f32 %v2488_v58 }
 0x61a   : > { %2758 = vperm.xlu0 %4317, %v5974_v34  }
 0x61d   : > { %2748 = vperm.xlu1 %4318, %v5981_v54  }
 0x61e   : > { %2768 = vperm.xlu0 %4317, %v5983_v57  }
 0x621   : > { %2753 = vperm.xlu1 %4318, %v5990_v52  }
 0x622   : > { %2788 = vperm.xlu0 %4317, %v5992_v1   ;;  %v6005_v63 = vpop.eup %4423 }
 0x623   : > { %v6007_v55 = vpop.eup %4425 }
 0x624   : > { %v6011_v27 = vpop.eup %4427 }
 0x625   : > { %2773 = vperm.xlu1 %4318, %v5999_v14   ;;  %v6014_v46 = vpop.eup %4429 }
 0x626   : > { %2778 = vperm.xlu0 %4317, %v6001_v38   ;;  %v6017_v29 = vpop.eup %4431 }
 0x629   : > { %2763 = vperm.xlu1 %4318, %v6005_v63  }
 0x62a   : > { %2798 = vperm.xlu0 %4317, %v6007_v55  }
 0x62d   : > { %2793 = vperm.xlu1 %4318, %v6011_v27  }
 0x631   : > { %2783 = vperm.xlu1 %4318, %v6014_v46  }
 0x634   : > { %v2497_v21 = vpop.permute.xlu1 %2496 }
 0x635   : > { %2803 = vperm.xlu1 %4318, %v6017_v29   ;;  %v2574_v61 = vsub.f32 %v5629_v5, %v2497_v21  ;;  %v6453_v21 = vld [vmem:[#allocation10_spill] sm:$0xff] }
 0x637   : > { %v2590_v26 = vmul.f32 1.442695, %v2574_v61 }
 0x638   : > { %v2507_v43 = vpop.permute.xlu1 %2506 }
 0x639   : > { %v2576_v28 = vsub.f32 %v5624_v39, %v2507_v43 }
 0x63b   : > { %v2594_v23 = vmul.f32 1.442695, %v2576_v28 }
 0x63c   : > { %v2502_v16 = vpop.permute.xlu0 %2501  ;;  %v2512_v10 = vpop.permute.xlu1 %2511 }
 0x63d   : > { %4433 = vpow2.f32 %v2594_v23  ;;  %v2575_v44 = vsub.f32 %v5644_v4, %v2502_v16  ;;  %v2577_v56 = vsub.f32 %v5634_v42, %v2512_v10  ;;  %v6454_v16 = vld [vmem:[#allocation14_spill] sm:$0xff] }
 0x63e   : > { %4435 = vpow2.f32 %v2590_v26 }
 0x63f   : > { %v2592_v32 = vmul.f32 1.442695, %v2575_v44  ;;  %v2596_v49 = vmul.f32 1.442695, %v2577_v56  ;;  %v6455_v44 = vld [vmem:[#allocation15_spill] sm:$0xff] }
 0x640   : > { %v2517_v53 = vpop.permute.xlu0 %2516 }
 0x641   : > { %4437 = vpow2.f32 %v2592_v32  ;;  %v2578_v24 = vsub.f32 %v5649_v37, %v2517_v53 }
 0x642   : > { %4439 = vpow2.f32 %v2596_v49 }
 0x643   : > { %v2598_v39 = vmul.f32 1.442695, %v2578_v24 }
 0x644   : > { %v2527_v5 = vpop.permute.xlu0 %2526  ;;  %v2522_v35 = vpop.permute.xlu1 %2521 }
 0x645   : > { %v2580_v40 = vsub.f32 %v5639_v48, %v2527_v5  ;;  %v2579_v62 = vsub.f32 %v6447_v25, %v2522_v35  ;;  %4441 = vpow2.f32 %v2598_v39  ;;  %v6456_v39 = vld [vmem:[#allocation13_spill] sm:$0xff] }
 0x647   : > { %v2600_v50 = vmul.f32 1.442695, %v2579_v62  ;;  %v2602_v42 = vmul.f32 1.442695, %v2580_v40  ;;  %v1610_v62 = vld [vmem:[#allocation4] sm:$0xff] }
 0x648   : > { %v2537_v19 = vpop.permute.xlu0 %2536  ;;  %v2532_v4 = vpop.permute.xlu1 %2531 }
 0x649   : > { %v2582_v11 = vsub.f32 %v6448_v15, %v2537_v19  ;;  %v2581_v3 = vsub.f32 %v6449_v33, %v2532_v4  ;;  %4443 = vpow2.f32 %v2600_v50  ;;  %v1611_v33 = vld [vmem:[#allocation4 + $0x8] sm:$0xff] }
 0x64a   : > { %v4434_v7 = vpop.eup %4433  ;;  %4445 = vpow2.f32 %v2602_v42 }
 0x64b   : > { %v2604_v37 = vmul.f32 1.442695, %v2581_v3  ;;  %2659 = vadd.xlane.f32.xlu0 %v4434_v7  ;;  %v4436_v22 = vpop.eup %4435  ;;  %v2606_v48 = vmul.f32 1.442695, %v2582_v11 }
 0x64c   : > { %v2547_v31 = vpop.permute.xlu0 %2546  ;;  %v2542_v36 = vpop.permute.xlu1 %2541 }
 0x64d   : > { %v2584_v0 = vsub.f32 %v6450_v20, %v2547_v31  ;;  %v2583_v8 = vsub.f32 %v6451_v9, %v2542_v36  ;;  %4447 = vpow2.f32 %v2604_v37  ;;  %v1612_v20 = vld [vmem:[#allocation4 + $0x10] sm:$0xff]  ;;  %v6458_v9 = vld [vmem:[#allocation39_spill] sm:$0xff] }
 0x64e   : > { %v4438_v45 = vpop.eup %4437  ;;  %4449 = vpow2.f32 %v2606_v48 }
 0x64f   : > { %v4440_v6 = vpop.eup %4439  ;;  %v2608_v12 = vmul.f32 1.442695, %v2583_v8  ;;  %2655 = vadd.xlane.f32.xlu0 %v4436_v22  ;;  %v2832_v13 = vpack.c.bf16 %v4438_v45, %v4436_v22  ;;  %v2610_v2 = vmul.f32 1.442695, %v2584_v0 }
 0x650   : > { %v2557_v51 = vpop.permute.xlu0 %2556  ;;  %v2552_v18 = vpop.permute.xlu1 %2551  ;;  %v2833_v30 = vpack.c.bf16 %v4440_v6, %v4434_v7  ;;  %v6457_v7 = vld [vmem:[#allocation37_spill] sm:$0xff] }
 0x651   : > { %v2586_v58 = vsub.f32 %v6452_v60, %v2557_v51  ;;  %v2585_v61 = vsub.f32 %v6453_v21, %v2552_v18  ;;  %4187 = vmatprep.mubr.bf16.mxu0 %v2832_v13  ;;  %4451 = vpow2.f32 %v2608_v12  ;;  %v1613_v51 = vld [vmem:[#allocation4 + $0x18] sm:$0xff] }
 0x652   : > { %4188 = vmatmul.mubr.bf16.vlgmr.msra.gmra.mxu0 %v2833_v30  ;;  %4453 = vpow2.f32 %v2610_v2  ;;  %v4442_v32 = vpop.eup %4441  ;;  %v6459_v30 = vld [vmem:[#allocation36_spill] sm:$0xff] }
 0x653   : > { %v2612_v43 = vmul.f32 1.442695, %v2585_v61  ;;  %2661 = vadd.xlane.f32.xlu0 %v4440_v6  ;;  %v2614_v26 = vmul.f32 1.442695, %v2586_v58 }
 0x654   : > { %v2567_v28 = vpop.permute.xlu0 %2566  ;;  %v2562_v23 = vpop.permute.xlu1 %2561 }
 0x655   : > { %v2588_v10 = vsub.f32 %v6454_v16, %v2567_v28  ;;  %v2587_v56 = vsub.f32 %v6455_v44, %v2562_v23  ;;  %4455 = vpow2.f32 %v2612_v43  ;;  %v1614_v28 = vld [vmem:[#allocation4 + $0x20] sm:$0xff]  ;;  %v6460_v23 = vld [vmem:[#allocation38_spill] sm:$0xff] }
 0x656   : > { %v4444_v49 = vpop.eup %4443  ;;  %4457 = vpow2.f32 %v2614_v26 }
 0x657   : > { %v2616_v53 = vmul.f32 1.442695, %v2587_v56  ;;  %v2618_v24 = vmul.f32 1.442695, %v2588_v10  ;;  %v2834_v35 = vpack.c.bf16 %v4444_v49, %v4442_v32  ;;  %v4446_v25 = vpop.eup %4445  ;;  %v1615_v56 = vld [vmem:[#allocation4 + $0x28] sm:$0xff] }
 0x658   : > { %v2572_v5 = vpop.permute.xlu1 %2571 }
 0x659   : > { %v2589_v40 = vsub.f32 %v6456_v39, %v2572_v5  ;;  %2657 = vadd.xlane.f32.xlu1 %v4438_v45  ;;  %4459 = vpow2.f32 %v2616_v53  ;;  %4191 = vmatprep.mubr.bf16.mxu0 %v2834_v35  ;;  %v6462_v53 = vld [vmem:[#allocation25_spill] sm:$0xff] }
 0x65a   : > { %v4448_v50 = vpop.eup %4447  ;;  %4461 = vpow2.f32 %v2618_v24  ;;  %v6463_v24 = vsub.f32 %v6462_v53, %v5881_v41  ;;  %v1617_v41 = vld [vmem:[#allocation4 + $0x38] sm:$0xff] }
 0x65b   : > { %v2620_v19 = vmul.f32 1.442695, %v2589_v40  ;;  %2669 = vadd.xlane.f32.xlu0 %v4448_v50  ;;  %v2835_v42 = vpack.c.bf16 %v4448_v50, %v4446_v25  ;;  %v4450_v11 = vpop.eup %4449  ;;  %v1616_v40 = vld [vmem:[#allocation4 + $0x30] sm:$0xff]  ;;  %v6465_v50 = vld [vmem:[#allocation16_spill] sm:$0xff] }
 0x65c   : > { %v1629_v4 = vpop.permute.xlu1 %1628  ;;  %v2492_v5 = vmul.f32 1.442695, %v6463_v24  ;;  %v1624_v24 = vld [vmem:[#allocation4 + $0x70] sm:$0xff] }
 0x65d   : > { %4463 = vpow2.f32 %v2620_v19  ;;  %v1706_v15 = vmul.f32 %v1629_v4, %v1610_v62  ;;  %2667 = vadd.xlane.f32.xlu1 %v4446_v25  ;;  %4192 = vmatmul.mubr.bf16.gmra.mxu0 %v2835_v42  ;;  %v6464_v25 = vld [vmem:[#allocation43_spill] sm:$0xff]  ;;  %v6466_v19 = vld [vmem:[#allocation18_spill] sm:$0xff] }
 0x65e   : > { %v4452_v3 = vpop.eup %4451  ;;  %v6467_v4 = vsub.f32 %v6465_v50, %v6466_v19  ;;  %4465 = vpow2.f32 %v2492_v5  ;;  %v6474_v5 = vld [vmem:[#allocation45_spill] sm:$0xff]  ;;  %v1625_v50 = vld [vmem:[#allocation4 + $0x78] sm:$0xff] }
 0x65f   : > { %v1835_v37 = vadd.f32 %v6457_v7, %v1706_v15  ;;  %2665 = vadd.xlane.f32.xlu0 %v4444_v49  ;;  %v2836_v36 = vpack.c.bf16 %v4452_v3, %v4450_v11  ;;  %v4454_v48 = vpop.eup %4453  ;;  %v6475_v19 = vld [vmem:[#allocation51_spill] sm:$0xff] }
 0x660   : > { %v1634_v31 = vpop.permute.xlu1 %1633  ;;  %v2490_v42 = vmul.f32 1.442695, %v6467_v4 }
 0x661   : > { %1851 = vst.msk [vmem:[#allocation4] sm:$0xff] %vm1095_vm3, %v1835_v37  ;;  %v1707_v22 = vmul.f32 %v1634_v31, %v1611_v33  ;;  %2663 = vadd.xlane.f32.xlu1 %v4442_v32  ;;  %4195 = vmatprep.mubr.bf16.mxu0 %v2836_v36  ;;  %v6461_v32 = vld [vmem:[#allocation41_spill] sm:$0xff]  ;;  %v6468_v33 = vld [vmem:[#allocation40_spill] sm:$0xff]  ;;  %v6469_v36 = vld [vmem:[#allocation42_spill] sm:$0xff] }
 0x662   : > { %v4456_v0 = vpop.eup %4455  ;;  %4467 = vpow2.f32 %v2490_v42  ;;  %v1619_v31 = vld [vmem:[#allocation4 + $0x48] sm:$0xff]  ;;  %v6476_v42 = vld [vmem:[#allocation48_spill] sm:$0xff] }
 0x663   : > { %v1836_v8 = vadd.f32 %v6458_v9, %v1707_v22  ;;  %2677 = vadd.xlane.f32.xlu0 %v4456_v0  ;;  %v2837_v6 = vpack.c.bf16 %v4456_v0, %v4454_v48  ;;  %v4458_v13 = vpop.eup %4457  ;;  %v1528_v0 = vld [vmem:[#allocation3 + $0x78] sm:$0xff]  ;;  %v1620_v9 = vld [vmem:[#allocation4 + $0x50] sm:$0xff] }
 0x664   : > { %v1639_v45 = vpop.permute.xlu1 %1638 }
 0x665   : > { %1852 = vst.msk [vmem:[#allocation4 + $0x8] sm:$0xff] %vm1095_vm3, %v1836_v8  ;;  %v1708_v12 = vmul.f32 %v1639_v45, %v1612_v20  ;;  %2675 = vadd.xlane.f32.xlu1 %v4454_v48  ;;  %4196 = vmatmul.mubr.bf16.gmra.mxu0 %v2837_v6  ;;  %v6470_v8 = vld [vmem:[#allocation47_spill] sm:$0xff] }
 0x666   : > { %v4460_v18 = vpop.eup %4459 }
 0x667   : > { %v1837_v2 = vadd.f32 %v6459_v30, %v1708_v12  ;;  %2673 = vadd.xlane.f32.xlu0 %v4452_v3  ;;  %v2838_v58 = vpack.c.bf16 %v4460_v18, %v4458_v13  ;;  %v4462_v21 = vpop.eup %4461  ;;  %v1544_v12 = vmul.f32 %v5957_v59, %v1528_v0 }
 0x668   : > { %v1644_v60 = vpop.permute.xlu1 %1643 }
 0x669   : > { %1853 = vst.msk [vmem:[#allocation4 + $0x10] sm:$0xff] %vm1095_vm3, %v1837_v2  ;;  %v1709_v61 = vmul.f32 %v1644_v60, %v1613_v51  ;;  %2671 = vadd.xlane.f32.xlu1 %v4450_v11  ;;  %4199 = vmatprep.mubr.bf16.mxu0 %v2838_v58  ;;  %v1621_v2 = vld [vmem:[#allocation4 + $0x58] sm:$0xff]  ;;  %v6471_v60 = vld [vmem:[#allocation44_spill] sm:$0xff] }
 0x66a   : > { %v4464_v43 = vpop.eup %4463 }
 0x66b   : > { %v1838_v26 = vadd.f32 %v6460_v23, %v1709_v61  ;;  %v2839_v16 = vpack.c.bf16 %v4464_v43, %v4462_v21  ;;  %2685 = vadd.xlane.f32.xlu0 %v4464_v43  ;;  %v1622_v43 = vld [vmem:[#allocation4 + $0x60] sm:$0xff] }
 0x66c   : > { %v1649_v10 = vpop.permute.xlu1 %1648 }
 0x66d   : > { %1854 = vst.msk [vmem:[#allocation4 + $0x18] sm:$0xff] %vm1095_vm3, %v1838_v26  ;;  %v1710_v44 = vmul.f32 %v1649_v10, %v1614_v28  ;;  %2683 = vadd.xlane.f32.xlu1 %v4462_v21  ;;  %4200 = vmatmul.mubr.bf16.gmra.mxu0 %v2839_v16  ;;  %v6472_v28 = vld [vmem:[#allocation46_spill] sm:$0xff]  ;;  %v1618_v26 = vld [vmem:[#allocation4 + $0x40] sm:$0xff] }
 0x66f   : > { %v1839_v49 = vadd.f32 %v6461_v32, %v1710_v44  ;;  %2681 = vadd.xlane.f32.xlu0 %v4460_v18  ;;  %v1623_v32 = vld [vmem:[#allocation4 + $0x68] sm:$0xff] }
 0x670   : > { %v1654_v35 = vpop.permute.xlu1 %1653 }
 0x671   : > { %1855 = vst.msk [vmem:[#allocation4 + $0x20] sm:$0xff] %vm1095_vm3, %v1839_v49  ;;  %v1711_v39 = vmul.f32 %v1654_v35, %v1615_v56  ;;  %2679 = vadd.xlane.f32.xlu1 %v4458_v13  ;;  %v6060_v13 = vpop.eup %4465  ;;  %v6473_v49 = vld [vmem:[#allocation49_spill] sm:$0xff] }
 0x672   : > { %v6066_v61 = vpop.eup %4467 }
 0x673   : > { %v1840_v62 = vadd.f32 %v6464_v25, %v1711_v39 }
 0x674   : > { %v1659_v15 = vpop.permute.xlu1 %1658 }
 0x675   : > { %1856 = vst.msk [vmem:[#allocation4 + $0x28] sm:$0xff] %vm1095_vm3, %v1840_v62  ;;  %v1712_v11 = vmul.f32 %v1659_v15, %v1616_v40 }
 0x677   : > { %v1841_v3 = vadd.f32 %v6468_v33, %v1712_v11  ;;  %v6477_v33 = vld [vmem:[#allocation50_spill] sm:$0xff] }
 0x678   : > { %v1664_v7 = vpop.permute.xlu1 %1663 }
 0x679   : > { %1857 = vst.msk [vmem:[#allocation4 + $0x30] sm:$0xff] %vm1095_vm3, %v1841_v3  ;;  %v1713_v37 = vmul.f32 %v1664_v7, %v1617_v41 }
 0x67b   : > { %v1842_v22 = vadd.f32 %v6469_v36, %v1713_v37 }
 0x67c   : > { %v1674_v48 = vpop.permute.xlu1 %1673 }
 0x67d   : > { %1858 = vst.msk [vmem:[#allocation4 + $0x38] sm:$0xff] %vm1095_vm3, %v1842_v22  ;;  %v1715_v20 = vmul.f32 %v1674_v48, %v1619_v31 }
 0x67f   : > { %v1844_v45 = vadd.f32 %v6470_v8, %v1715_v20 }
 0x680   : > { %v1679_v6 = vpop.permute.xlu1 %1678 }
 0x681   : > { %1860 = vst.msk [vmem:[#allocation4 + $0x48] sm:$0xff] %vm1095_vm3, %v1844_v45  ;;  %v1716_v51 = vmul.f32 %v1679_v6, %v1620_v9  ;;  %v1576_v18 = vpop.xlane.xlu0 %1575  ;;  %v2625_v6 = vld [vmem:[#allocation3 + $0x90] sm:$0xff] }
 0x682   : > { %v1592_v30 = vadd.f32 %v1576_v18, %v1544_v12  ;;  %2813 = vperm.xlu1 %4318, %v6060_v13  }
 0x683   : > { %v1845_v58 = vadd.f32 %v6471_v60, %v1716_v51  ;;  %v2641_v51 = vmul.f32 %v5981_v54, %v2625_v6  ;;  %v2624_v54 = vld [vmem:[#allocation3 + $0x88] sm:$0xff] }
 0x684   : > { %1609 = vst.msk [vmem:[#allocation3 + $0x78] sm:$0xff] %vm1593_vm15, %v1592_v30  ;;  %v1684_v21 = vpop.permute.xlu1 %1683  ;;  %v2623_v30 = vld [vmem:[#allocation3 + $0x80] sm:$0xff] }
 0x685   : > { %1861 = vst.msk [vmem:[#allocation4 + $0x50] sm:$0xff] %vm1095_vm3, %v1845_v58  ;;  %v1717_v59 = vmul.f32 %v1684_v21, %v1621_v2  ;;  %2808 = vperm.xlu0 %4317, %v6066_v61   ;;  %v2639_v60 = vmul.f32 %v5969_v47, %v2623_v30 }
 0x687   : > { %v1846_v23 = vadd.f32 %v6472_v28, %v1717_v59  ;;  %v2626_v59 = vld [vmem:[#allocation3 + $0x98] sm:$0xff] }
 0x688   : > { %v1689_v16 = vpop.permute.xlu1 %1688  ;;  %v2642_v28 = vmul.f32 %v5990_v52, %v2626_v59 }
 0x689   : > { %1862 = vst.msk [vmem:[#allocation4 + $0x58] sm:$0xff] %vm1095_vm3, %v1846_v23  ;;  %v1718_v10 = vmul.f32 %v1689_v16, %v1622_v43  ;;  %v1669_v44 = vpop.permute.xlu0 %1668 }
 0x68a   : > { %v1714_v56 = vmul.f32 %v1669_v44, %v1618_v26  ;;  %v2630_v44 = vld [vmem:[#allocation3 + $0xb8] sm:$0xff] }
 0x68b   : > { %v1847_v53 = vadd.f32 %v6473_v49, %v1718_v10  ;;  %v2640_v10 = vmul.f32 %v5962_v17, %v2624_v54  ;;  %v2646_v49 = vmul.f32 %v5999_v14, %v2630_v44  ;;  %v2634_v14 = vld [vmem:[#allocation3 + $0xd8] sm:$0xff] }
 0x68c   : > { %v1843_v35 = vadd.f32 %v6474_v5, %v1714_v56  ;;  %v1694_v39 = vpop.permute.xlu1 %1693  ;;  %v2629_v56 = vld [vmem:[#allocation3 + $0xb0] sm:$0xff] }
 0x68d   : > { %1863 = vst.msk [vmem:[#allocation4 + $0x60] sm:$0xff] %vm1095_vm3, %v1847_v53  ;;  %v1719_v40 = vmul.f32 %v1694_v39, %v1623_v32  ;;  %v1699_v25 = vpop.permute.xlu0 %1698  ;;  %v2645_v52 = vmul.f32 %v5983_v57, %v2629_v56  ;;  %v2627_v39 = vld [vmem:[#allocation3 + $0xa0] sm:$0xff]  ;;  %v2650_v57 = vmul.f32 %v6011_v27, %v2634_v14  ;;  %v2638_v27 = vld [vmem:[#allocation3 + $0xf8] sm:$0xff]  ;;  %v2726_v14 = vld [vmem:[#allocation4 + $0xb0] sm:$0xff] }
 0x68e   : > { %1859 = vst.msk [vmem:[#allocation4 + $0x40] sm:$0xff] %vm1095_vm3, %v1843_v35  ;;  %v1720_v62 = vmul.f32 %v1699_v25, %v1624_v24  ;;  %v2628_v24 = vld [vmem:[#allocation3 + $0xa8] sm:$0xff] }
 0x68f   : > { %v1848_v4 = vadd.f32 %v6475_v19, %v1719_v40  ;;  %v2644_v17 = vmul.f32 %v6005_v63, %v2628_v24  ;;  %v2632_v63 = vld [vmem:[#allocation3 + $0xc8] sm:$0xff] }
 0x690   : > { %v1849_v15 = vadd.f32 %v6476_v42, %v1720_v62  ;;  %v1704_v11 = vpop.permute.xlu1 %1703  ;;  %v2643_v62 = vmul.f32 %v5974_v34, %v2627_v39  ;;  %v2648_v34 = vmul.f32 %v6014_v46, %v2632_v63  ;;  %v2636_v46 = vld [vmem:[#allocation3 + $0xe8] sm:$0xff]  ;;  %v2730_v63 = vld [vmem:[#allocation4 + $0xd0] sm:$0xff] }
 0x691   : > { %1864 = vst.msk [vmem:[#allocation4 + $0x68] sm:$0xff] %vm1095_vm3, %v1848_v4  ;;  %v1721_v41 = vmul.f32 %v1704_v11, %v1625_v50  ;;  %v6082_v7 = vpop.permute.xlu0 %2743  ;;  %v2633_v4 = vld [vmem:[#allocation3 + $0xd0] sm:$0xff] }
 0x692   : > { %1865 = vst.msk [vmem:[#allocation4 + $0x70] sm:$0xff] %vm1095_vm3, %v1849_v15  ;;  %v2649_v11 = vmul.f32 %v5992_v1, %v2633_v4  ;;  %v2654_v1 = vmul.f32 %v6060_v13, %v2638_v27 }
 0x693   : > { %v1850_v3 = vadd.f32 %v6477_v33, %v1721_v41 }
 0x694   : > { %v6084_v37 = vpop.permute.xlu1 %2738 }
 0x695   : > { %1866 = vst.msk [vmem:[#allocation4 + $0x78] sm:$0xff] %vm1095_vm3, %v1850_v3  ;;  %v6086_v31 = vpop.permute.xlu0 %2758  ;;  %v2631_v3 = vld [vmem:[#allocation3 + $0xc0] sm:$0xff] }
 0x698   : > { %v6088_v36 = vpop.permute.xlu1 %2748 }
 0x699   : > { %v6090_v22 = vpop.permute.xlu0 %2768 }
 0x69c   : > { %v6092_v48 = vpop.permute.xlu1 %2753 }
 0x69d   : > { %v6094_v20 = vpop.permute.xlu0 %2788 }
 0x6a0   : > { %v6096_v0 = vpop.permute.xlu1 %2773 }
 0x6a1   : > { %v6098_v9 = vpop.permute.xlu0 %2778 }
 0x6a4   : > { %v6100_v8 = vpop.permute.xlu1 %2763 }
 0x6a5   : > { %v6102_v45 = vpop.permute.xlu0 %2798 }
 0x6a8   : > { %v6104_v12 = vpop.permute.xlu1 %2793 }
 0x6ac   : > { %v6109_v58 = vpop.permute.xlu1 %2783 }
 0x6b0   : > { %v6113_v16 = vpop.permute.xlu1 %2803 }
 0x6d4   : > { %v2660_v18 = vpop.xlane.xlu0 %2659 }
 0x6d5   : > { %v2689_v2 = vadd.f32 %v2660_v18, %v2641_v51  ;;  %v2647_v18 = vmul.f32 %v6001_v38, %v2631_v3  ;;  %v2652_v38 = vmul.f32 %v6017_v29, %v2636_v46  ;;  %v2732_v46 = vld [vmem:[#allocation4 + $0xe0] sm:$0xff] }
 0x6d7   : > { %2705 = vst.msk [vmem:[#allocation3 + $0x90] sm:$0xff] %vm1593_vm15, %v2689_v2 }
 0x6d8   : > { %v2656_v21 = vpop.xlane.xlu0 %2655 }
 0x6d9   : > { %v2687_v43 = vadd.f32 %v2656_v21, %v2639_v60  ;;  %v2637_v60 = vld [vmem:[#allocation3 + $0xf0] sm:$0xff] }
 0x6db   : > { %2703 = vst.msk [vmem:[#allocation3 + $0x80] sm:$0xff] %vm1593_vm15, %v2687_v43  ;;  %v2653_v43 = vmul.f32 %v6066_v61, %v2637_v60  ;;  %v2722_v61 = vld [vmem:[#allocation4 + $0x90] sm:$0xff] }
 0x6dc   : > { %v2662_v23 = vpop.xlane.xlu0 %2661 }
 0x6dd   : > { %v2690_v26 = vadd.f32 %v2662_v23, %v2642_v28 }
 0x6df   : > { %2706 = vst.msk [vmem:[#allocation3 + $0x98] sm:$0xff] %vm1593_vm15, %v2690_v26  ;;  %v2635_v26 = vld [vmem:[#allocation3 + $0xe0] sm:$0xff] }
 0x6e0   : > { %v2651_v44 = vmul.f32 %v6007_v55, %v2635_v26  ;;  %v2735_v26 = vld [vmem:[#allocation4 + $0xf8] sm:$0xff] }
 0x6e2   : > { %v2658_v47 = vpop.xlane.xlu1 %2657 }
 0x6e3   : > { %v2688_v32 = vadd.f32 %v2658_v47, %v2640_v10 }
 0x6e4   : > { %v2670_v53 = vpop.xlane.xlu0 %2669 }
 0x6e5   : > { %2704 = vst.msk [vmem:[#allocation3 + $0x88] sm:$0xff] %vm1593_vm15, %v2688_v32  ;;  %v2694_v5 = vadd.f32 %v2670_v53, %v2646_v49  ;;  %v2720_v32 = vld [vmem:[#allocation4 + $0x80] sm:$0xff]  ;;  %v2818_v49 = vmul.f32 %v6088_v36, %v2722_v61  ;;  %v2723_v53 = vld [vmem:[#allocation4 + $0x98] sm:$0xff] }
 0x6e6   : > { %v2668_v35 = vpop.xlane.xlu1 %2667  ;;  %v2816_v29 = vmul.f32 %v6084_v37, %v2720_v32  ;;  %v2819_v55 = vmul.f32 %v6092_v48, %v2723_v53  ;;  %v2724_v37 = vld [vmem:[#allocation4 + $0xa0] sm:$0xff]  ;;  %v2727_v48 = vld [vmem:[#allocation4 + $0xb8] sm:$0xff] }
 0x6e7   : > { %v2693_v40 = vadd.f32 %v2668_v35, %v2645_v52  ;;  %2710 = vst.msk [vmem:[#allocation3 + $0xb8] sm:$0xff] %vm1593_vm15, %v2694_v5  ;;  %v2721_v5 = vld [vmem:[#allocation4 + $0x88] sm:$0xff]  ;;  %v2820_v4 = vmul.f32 %v6086_v31, %v2724_v37 }
 0x6e8   : > { %v2666_v25 = vpop.xlane.xlu0 %2665 }
 0x6e9   : > { %2709 = vst.msk [vmem:[#allocation3 + $0xb0] sm:$0xff] %vm1593_vm15, %v2693_v40  ;;  %v2692_v50 = vadd.f32 %v2666_v25, %v2644_v17  ;;  %v2817_v17 = vmul.f32 %v6082_v7, %v2721_v5 }
 0x6ea   : > { %v2664_v19 = vpop.xlane.xlu1 %2663 }
 0x6eb   : > { %v2691_v42 = vadd.f32 %v2664_v19, %v2643_v62  ;;  %2708 = vst.msk [vmem:[#allocation3 + $0xa8] sm:$0xff] %vm1593_vm15, %v2692_v50  ;;  %v2822_v50 = vmul.f32 %v6090_v22, %v2726_v14  ;;  %v2728_v22 = vld [vmem:[#allocation4 + $0xc0] sm:$0xff] }
 0x6ec   : > { %v2678_v15 = vpop.xlane.xlu0 %2677 }
 0x6ed   : > { %2707 = vst.msk [vmem:[#allocation3 + $0xa0] sm:$0xff] %vm1593_vm15, %v2691_v42  ;;  %v2698_v41 = vadd.f32 %v2678_v15, %v2650_v57  ;;  %v2725_v57 = vld [vmem:[#allocation4 + $0xa8] sm:$0xff]  ;;  %v2823_v15 = vmul.f32 %v6096_v0, %v2727_v48  ;;  %v2824_v0 = vmul.f32 %v6098_v9, %v2728_v22 }
 0x6ee   : > { %v2676_v33 = vpop.xlane.xlu1 %2675 }
 0x6ef   : > { %v2697_v6 = vadd.f32 %v2676_v33, %v2649_v11  ;;  %2714 = vst.msk [vmem:[#allocation3 + $0xd8] sm:$0xff] %vm1593_vm15, %v2698_v41  ;;  %v2821_v33 = vmul.f32 %v6100_v8, %v2725_v57 }
 0x6f0   : > { %v2674_v51 = vpop.xlane.xlu0 %2673 }
 0x6f1   : > { %2713 = vst.msk [vmem:[#allocation3 + $0xd0] sm:$0xff] %vm1593_vm15, %v2697_v6  ;;  %v2696_v30 = vadd.f32 %v2674_v51, %v2648_v34  ;;  %v2826_v34 = vmul.f32 %v6094_v20, %v2730_v63  ;;  %v2731_v51 = vld [vmem:[#allocation4 + $0xd8] sm:$0xff] }
 0x6f2   : > { %v2672_v2 = vpop.xlane.xlu1 %2671  ;;  %v2827_v8 = vmul.f32 %v6104_v12, %v2731_v51 }
 0x6f3   : > { %v2695_v21 = vadd.f32 %v2672_v2, %v2647_v18  ;;  %2712 = vst.msk [vmem:[#allocation3 + $0xc8] sm:$0xff] %vm1593_vm15, %v2696_v30  ;;  %v2729_v30 = vld [vmem:[#allocation4 + $0xc8] sm:$0xff] }
 0x6f4   : > { %v2686_v59 = vpop.xlane.xlu0 %2685 }
 0x6f5   : > { %2711 = vst.msk [vmem:[#allocation3 + $0xc0] sm:$0xff] %vm1593_vm15, %v2695_v21  ;;  %v2702_v28 = vadd.f32 %v2686_v59, %v2654_v1  ;;  %v2734_v21 = vld [vmem:[#allocation4 + $0xf0] sm:$0xff]  ;;  %v2825_v59 = vmul.f32 %v6109_v58, %v2729_v30 }
 0x6f6   : > { %v2684_v23 = vpop.xlane.xlu1 %2683 }
 0x6f7   : > { %v2701_v54 = vadd.f32 %v2684_v23, %v2653_v43  ;;  %2718 = vst.msk [vmem:[#allocation3 + $0xf8] sm:$0xff] %vm1593_vm15, %v2702_v28 }
 0x6f8   : > { %v2682_v10 = vpop.xlane.xlu0 %2681 }
 0x6f9   : > { %2717 = vst.msk [vmem:[#allocation3 + $0xf0] sm:$0xff] %vm1593_vm15, %v2701_v54  ;;  %v2700_v13 = vadd.f32 %v2682_v10, %v2652_v38  ;;  %v2828_v38 = vmul.f32 %v6102_v45, %v2732_v46 }
 0x6fa   : > { %v2680_v47 = vpop.xlane.xlu1 %2679 }
 0x6fb   : > { %v2699_v56 = vadd.f32 %v2680_v47, %v2651_v44  ;;  %2716 = vst.msk [vmem:[#allocation3 + $0xe8] sm:$0xff] %vm1593_vm15, %v2700_v13  ;;  %v2733_v44 = vld [vmem:[#allocation4 + $0xe8] sm:$0xff] }
 0x6fc   : > { %v2829_v61 = vmul.f32 %v6113_v16, %v2733_v44 }
 0x6fd   : > { %2715 = vst.msk [vmem:[#allocation3 + $0xe0] sm:$0xff] %vm1593_vm15, %v2699_v56 }
 0x6fe   : > { %v2814_v54 = vpop.permute.xlu1 %2813 }
 0x6ff   : > { %v2831_v58 = vmul.f32 %v2814_v54, %v2735_v26 }
 0x700   : > { %v2809_v1 = vpop.permute.xlu0 %2808 }
 0x701   : > { %v2830_v28 = vmul.f32 %v2809_v1, %v2734_v21 }
 0x712   : > { %v4189_v52 = vpop.f32.mrf.mxu0 }
 0x713   : > { %v2947_v24 = vadd.f32 %v4189_v52, %v2818_v49 }
 0x714   : > { %v2882_v35 = vpop.f32.mrf.mxu0 }
 0x715   : > { %2963 = vst.msk [vmem:[#allocation4 + $0x90] sm:$0xff] %vm1095_vm3, %v2947_v24  ;;  %v2945_v39 = vadd.f32 %v2882_v35, %v2816_v29 }
 0x716   : > { %v4190_v40 = vpop.f32.mrf.mxu0 }
 0x717   : > { %2961 = vst.msk [vmem:[#allocation4 + $0x80] sm:$0xff] %vm1095_vm3, %v2945_v39  ;;  %v2948_v25 = vadd.f32 %v4190_v40, %v2819_v55 }
 0x718   : > { %v2885_v62 = vpop.f32.mrf.mxu0 }
 0x719   : > { %2964 = vst.msk [vmem:[#allocation4 + $0x98] sm:$0xff] %vm1095_vm3, %v2948_v25  ;;  %v2946_v36 = vadd.f32 %v2885_v62, %v2817_v17 }
 0x71b   : > { %2962 = vst.msk [vmem:[#allocation4 + $0x88] sm:$0xff] %vm1095_vm3, %v2946_v36 }
 0x71d   : > { %v4193_v19 = vpop.f32.mrf.mxu0 }
 0x71e   : > { %v2951_v42 = vadd.f32 %v4193_v19, %v2822_v50 }
 0x71f   : > { %v2898_v7 = vpop.f32.mrf.mxu0 }
 0x720   : > { %2967 = vst.msk [vmem:[#allocation4 + $0xb0] sm:$0xff] %vm1095_vm3, %v2951_v42  ;;  %v2949_v11 = vadd.f32 %v2898_v7, %v2820_v4 }
 0x721   : > { %v4194_v41 = vpop.f32.mrf.mxu0 }
 0x722   : > { %2965 = vst.msk [vmem:[#allocation4 + $0xa0] sm:$0xff] %vm1095_vm3, %v2949_v11  ;;  %v2952_v3 = vadd.f32 %v4194_v41, %v2823_v15 }
 0x723   : > { %v2901_v6 = vpop.f32.mrf.mxu0 }
 0x724   : > { %2968 = vst.msk [vmem:[#allocation4 + $0xb8] sm:$0xff] %vm1095_vm3, %v2952_v3  ;;  %v2950_v31 = vadd.f32 %v2901_v6, %v2821_v33 }
 0x725   : > { %v4197_v18 = vpop.f32.mrf.mxu0 }
 0x726   : > { %2966 = vst.msk [vmem:[#allocation4 + $0xa8] sm:$0xff] %vm1095_vm3, %v2950_v31  ;;  %v2955_v27 = vadd.f32 %v4197_v18, %v2826_v34 }
 0x727   : > { %v2914_v2 = vpop.f32.mrf.mxu0 }
 0x728   : > { %2971 = vst.msk [vmem:[#allocation4 + $0xd0] sm:$0xff] %vm1095_vm3, %v2955_v27  ;;  %v2953_v60 = vadd.f32 %v2914_v2, %v2824_v0 }
 0x729   : > { %v4198_v20 = vpop.f32.mrf.mxu0 }
 0x72a   : > { %2969 = vst.msk [vmem:[#allocation4 + $0xc0] sm:$0xff] %vm1095_vm3, %v2953_v60  ;;  %v2956_v43 = vadd.f32 %v4198_v20, %v2827_v8 }
 0x72b   : > { %v2917_v9 = vpop.f32.mrf.mxu0 }
 0x72c   : > { %2972 = vst.msk [vmem:[#allocation4 + $0xd8] sm:$0xff] %vm1095_vm3, %v2956_v43  ;;  %v2954_v23 = vadd.f32 %v2917_v9, %v2825_v59 }
 0x72d   : > { %v4201_v12 = vpop.f32.mrf.mxu0 }
 0x72e   : > { %2970 = vst.msk [vmem:[#allocation4 + $0xc8] sm:$0xff] %vm1095_vm3, %v2954_v23  ;;  %v2959_v10 = vadd.f32 %v4201_v12, %v2830_v28 }
 0x72f   : > { %v2930_v13 = vpop.f32.mrf.mxu0 }
 0x730   : > { %2975 = vst.msk [vmem:[#allocation4 + $0xf0] sm:$0xff] %vm1095_vm3, %v2959_v10  ;;  %v2957_v47 = vadd.f32 %v2930_v13, %v2828_v38 }
 0x731   : > { %v4202_v56 = vpop.f32.mrf.mxu0 }
 0x732   : > { %2973 = vst.msk [vmem:[#allocation4 + $0xe0] sm:$0xff] %vm1095_vm3, %v2957_v47  ;;  %v2960_v32 = vadd.f32 %v4202_v56, %v2831_v58  ;;  %2996 = sbr.rel (%p3810_p13) target bundleno = 2258 (0x8d2), region = 102 }
 0x733   : > { %v2933_v49 = vpop.f32.mrf.mxu0 }
 0x734   : > { %2976 = vst.msk [vmem:[#allocation4 + $0xf8] sm:$0xff] %vm1095_vm3, %v2960_v32  ;;  %v2958_v53 = vadd.f32 %v2933_v49, %v2829_v61 }
 0x736   : > { %2974 = vst.msk [vmem:[#allocation4 + $0xe8] sm:$0xff] %vm1095_vm3, %v2958_v53 }
 0x737   : > { %v3167_v45 = vld [vmem:[#allocation3 + $0x80] sm:$0xff]  ;;  %v4612_v29 = vmov 0   ;;  %v3168_v16 = vld [vmem:[#allocation3 + $0x88] sm:$0xff]  ;;  %v3018_v5 = vld [vmem:[#allocation3 + $0x18] sm:$0xff]  ;;  %vm3327_vm7 = vcmask 1043456  }
 0x738   : > { %v3015_v52 = vld [vmem:[#allocation3] sm:$0xff]  ;;  %4488 = vset.pattern.permute.xlu1 %v4612_v29  ;;  %4487 = vset.pattern.permute.xlu0 %v4612_v29  ;;  %v3016_v24 = vld [vmem:[#allocation3 + $0x8] sm:$0xff]  ;;  %v3017_v35 = vld [vmem:[#allocation3 + $0x10] sm:$0xff] }
 0x739   : > { %3185 = vperm.xlu1 %4488, %v3167_v45   ;;  %3033 = vperm.xlu0 %4487, %v3015_v52   ;;  %v3170_v55 = vld [vmem:[#allocation3 + $0x98] sm:$0xff]  ;;  %v3169_v39 = vld [vmem:[#allocation3 + $0x90] sm:$0xff]  ;;  %v3020_v40 = vld [vmem:[#allocation3 + $0x28] sm:$0xff] }
 0x73a   : > { %v3019_v17 = vld [vmem:[#allocation3 + $0x20] sm:$0xff]  ;;  %v3172_v25 = vld [vmem:[#allocation3 + $0xa8] sm:$0xff]  ;;  %v3022_v37 = vld [vmem:[#allocation3 + $0x38] sm:$0xff] }
 0x73b   : > { %v3171_v62 = vld [vmem:[#allocation3 + $0xa0] sm:$0xff]  ;;  %v3021_v50 = vld [vmem:[#allocation3 + $0x30] sm:$0xff]  ;;  %v3174_v4 = vld [vmem:[#allocation3 + $0xb8] sm:$0xff] }
 0x73c   : > { %v2997_v36 = vld [vmem:[%s6276_s7] sm:$0xf]  ;;  %v2998_v48 = vld [vmem:[%s6276_s7 + $0x4] sm:$0xf]  ;;  %v3173_v42 = vld [vmem:[#allocation3 + $0xb0] sm:$0xff] }
 0x73d   : > { %3190 = vperm.xlu1 %4488, %v3168_v16   ;;  %3038 = vperm.xlu0 %4487, %v3016_v24   ;;  %v3453_v14 = vsel %vm3327_vm7, %v2997_v36, 0  ;;  %v3329_v19 = vsel %vm3327_vm7, %v2998_v48, 0  ;;  %v3024_v57 = vld [vmem:[#allocation3 + $0x48] sm:$0xff]  ;;  %v3023_v7 = vld [vmem:[#allocation3 + $0x40] sm:$0xff]  ;;  %v3026_v63 = vld [vmem:[#allocation3 + $0x58] sm:$0xff] }
 0x73e   : > { %4256 = vmatprep.subr.msk.bf16.mxu1 %vm3327_vm7, %v2997_v36  ;;  %4255 = vmatprep.subr.msk.bf16.mxu0 %vm3327_vm7, %v2998_v48  ;;  %v3176_v15 = vld [vmem:[#allocation3 + $0xc8] sm:$0xff]  ;;  %v3175_v11 = vld [vmem:[#allocation3 + $0xc0] sm:$0xff]  ;;  %v3025_v41 = vld [vmem:[#allocation3 + $0x50] sm:$0xff] }
 0x73f   : > { %4222 = vmatpush3.bf16.msra.mxu1 %v3453_v14  ;;  %4204 = vmatpush3.bf16.msra.mxu0 %v3329_v19  ;;  %v3178_v33 = vld [vmem:[#allocation3 + $0xd8] sm:$0xff]  ;;  %v3177_v3 = vld [vmem:[#allocation3 + $0xd0] sm:$0xff]  ;;  %v3028_v22 = vld [vmem:[#allocation3 + $0x68] sm:$0xff] }
 0x740   : > { %v3027_v6 = vld [vmem:[#allocation3 + $0x60] sm:$0xff]  ;;  %v3180_v34 = vld [vmem:[#allocation3 + $0xe8] sm:$0xff]  ;;  %v3030_v51 = vld [vmem:[#allocation3 + $0x78] sm:$0xff] }
 0x741   : > { %3048 = vperm.xlu1 %4488, %v3018_v5   ;;  %3043 = vperm.xlu0 %4487, %v3017_v35   ;;  %v3179_v31 = vld [vmem:[#allocation3 + $0xe0] sm:$0xff]  ;;  %v3029_v18 = vld [vmem:[#allocation3 + $0x70] sm:$0xff]  ;;  %v3182_v0 = vld [vmem:[#allocation3 + $0xf8] sm:$0xff] }
 0x742   : > { %v3181_v27 = vld [vmem:[#allocation3 + $0xf0] sm:$0xff]  ;;  %v3151_v28 = vld [vmem:[#allocation4 + $0x80] sm:$0xff]  ;;  %v3152_v23 = vld [vmem:[#allocation4 + $0x88] sm:$0xff] }
 0x743   : > { %v2999_v54 = vld [vmem:[#allocation4] sm:$0xff]  ;;  %v3000_v12 = vld [vmem:[#allocation4 + $0x8] sm:$0xff]  ;;  %v3002_v32 = vld [vmem:[#allocation4 + $0x18] sm:$0xff] }
 0x744   : > { %v3001_v53 = vld [vmem:[#allocation4 + $0x10] sm:$0xff]  ;;  %v3003_v48 = vld [vmem:[#allocation4 + $0x20] sm:$0xff] }
 0x745   : > { %3200 = vperm.xlu1 %4488, %v3170_v55   ;;  %3195 = vperm.xlu0 %4487, %v3169_v39   ;;  %v3154_v55 = vld [vmem:[#allocation4 + $0x98] sm:$0xff]  ;;  %v3153_v39 = vld [vmem:[#allocation4 + $0x90] sm:$0xff] }
 0x749   : > { %3058 = vperm.xlu1 %4488, %v3020_v40   ;;  %3053 = vperm.xlu0 %4487, %v3019_v17  }
 0x74d   : > { %3210 = vperm.xlu1 %4488, %v3172_v25   ;;  %3205 = vperm.xlu0 %4487, %v3171_v62  }
 0x751   : > { %3068 = vperm.xlu1 %4488, %v3022_v37   ;;  %3063 = vperm.xlu0 %4487, %v3021_v50   ;;  %v3004_v50 = vld [vmem:[#allocation4 + $0x28] sm:$0xff] }
 0x755   : > { %3220 = vperm.xlu1 %4488, %v3174_v4   ;;  %3215 = vperm.xlu0 %4487, %v3173_v42  }
 0x759   : > { %3078 = vperm.xlu1 %4488, %v3024_v57   ;;  %3073 = vperm.xlu0 %4487, %v3023_v7  }
 0x75d   : > { %3230 = vperm.xlu1 %4488, %v3176_v15   ;;  %3225 = vperm.xlu0 %4487, %v3175_v11  }
 0x761   : > { %3088 = vperm.xlu1 %4488, %v3026_v63   ;;  %3083 = vperm.xlu0 %4487, %v3025_v41   ;;  %v3156_v63 = vld [vmem:[#allocation4 + $0xa8] sm:$0xff]  ;;  %v3155_v41 = vld [vmem:[#allocation4 + $0xa0] sm:$0xff] }
 0x765   : > { %3240 = vperm.xlu1 %4488, %v3178_v33   ;;  %3235 = vperm.xlu0 %4487, %v3177_v3  }
 0x769   : > { %3098 = vperm.xlu1 %4488, %v3028_v22   ;;  %3093 = vperm.xlu0 %4487, %v3027_v6  }
 0x76d   : > { %3250 = vperm.xlu1 %4488, %v3180_v34   ;;  %3245 = vperm.xlu0 %4487, %v3179_v31  }
 0x771   : > { %3108 = vperm.xlu1 %4488, %v3030_v51   ;;  %3103 = vperm.xlu0 %4487, %v3029_v18   ;;  %v3006_v18 = vld [vmem:[#allocation4 + $0x38] sm:$0xff] }
 0x775   : > { %3260 = vperm.xlu1 %4488, %v3182_v0   ;;  %3255 = vperm.xlu0 %4487, %v3181_v27   ;;  %v3005_v0 = vld [vmem:[#allocation4 + $0x30] sm:$0xff] }
 0x7b4   : > { %v3186_v30 = vpop.permute.xlu1 %3185  ;;  %v3034_v2 = vpop.permute.xlu0 %3033 }
 0x7b5   : > { %4489 = vrcp.f32 %v3186_v30 }
 0x7b6   : > { %4491 = vrcp.f32 %v3034_v2 }
 0x7b8   : > { %v3191_v8 = vpop.permute.xlu1 %3190  ;;  %v3039_v60 = vpop.permute.xlu0 %3038 }
 0x7b9   : > { %4493 = vrcp.f32 %v3191_v8 }
 0x7ba   : > { %4495 = vrcp.f32 %v3039_v60 }
 0x7bc   : > { %v3049_v21 = vpop.permute.xlu1 %3048  ;;  %v3044_v1 = vpop.permute.xlu0 %3043 }
 0x7bd   : > { %4497 = vrcp.f32 %v3049_v21 }
 0x7be   : > { %4499 = vrcp.f32 %v3044_v1 }
 0x7c0   : > { %v3201_v20 = vpop.permute.xlu1 %3200  ;;  %v3196_v59 = vpop.permute.xlu0 %3195 }
 0x7c1   : > { %4501 = vrcp.f32 %v3201_v20  ;;  %v3158_v20 = vld [vmem:[#allocation4 + $0xb8] sm:$0xff] }
 0x7c2   : > { %4503 = vrcp.f32 %v3196_v59  ;;  %v4490_v43 = vpop.eup %4489  ;;  %v3157_v59 = vld [vmem:[#allocation4 + $0xb0] sm:$0xff] }
 0x7c3   : > { %v4492_v26 = vpop.eup %4491  ;;  %v3264_v44 = vmul.f32 %v4490_v43, %v3151_v28 }
 0x7c4   : > { %v3059_v46 = vpop.permute.xlu1 %3058  ;;  %v3054_v9 = vpop.permute.xlu0 %3053  ;;  %v3112_v56 = vmul.f32 %v4492_v26, %v2999_v54 }
 0x7c5   : > { %4505 = vrcp.f32 %v3059_v46 }
 0x7c6   : > { %v4494_v38 = vpop.eup %4493  ;;  %4507 = vrcp.f32 %v3054_v9 }
 0x7c7   : > { %v4496_v10 = vpop.eup %4495  ;;  %v3266_v13 = vmul.f32 %v4494_v38, %v3152_v23  ;;  %v3007_v38 = vld [vmem:[#allocation4 + $0x40] sm:$0xff] }
 0x7c8   : > { %v3211_v58 = vpop.permute.xlu1 %3210  ;;  %v3206_v47 = vpop.permute.xlu0 %3205  ;;  %v3114_v61 = vmul.f32 %v4496_v10, %v3000_v12  ;;  %v3008_v12 = vld [vmem:[#allocation4 + $0x48] sm:$0xff] }
 0x7c9   : > { %4509 = vrcp.f32 %v3211_v58  ;;  %v3295_v49 = vpack.c.bf16 %v3266_v13, %v3264_v44 }
 0x7ca   : > { %v4498_v45 = vpop.eup %4497  ;;  %4511 = vrcp.f32 %v3206_v47  ;;  %v3143_v52 = vpack.c.bf16 %v3114_v61, %v3112_v56 }
 0x7cb   : > { %v4500_v29 = vpop.eup %4499  ;;  %4205 = vmatprep.mubr.msk.bf16.mxu0 %vm1095_vm3, %v3295_v49  ;;  %v3118_v16 = vmul.f32 %v4498_v45, %v3002_v32  ;;  %v3160_v32 = vld [vmem:[#allocation4 + $0xc8] sm:$0xff]  ;;  %v3159_v49 = vld [vmem:[#allocation4 + $0xc0] sm:$0xff] }
 0x7cc   : > { %4223 = vmatprep.mubr.msk.bf16.mxu1 %vm1095_vm3, %v3143_v52  ;;  %v3069_v24 = vpop.permute.xlu1 %3068  ;;  %v3064_v5 = vpop.permute.xlu0 %3063  ;;  %v3116_v35 = vmul.f32 %v4500_v29, %v3001_v53 }
 0x7cd   : > { %4513 = vrcp.f32 %v3069_v24 }
 0x7ce   : > { %v4502_v40 = vpop.eup %4501  ;;  %4515 = vrcp.f32 %v3064_v5  ;;  %v3144_v17 = vpack.c.bf16 %v3118_v16, %v3116_v35  ;;  %v3010_v35 = vld [vmem:[#allocation4 + $0x58] sm:$0xff] }
 0x7cf   : > { %v4504_v25 = vpop.eup %4503  ;;  %v3270_v62 = vmul.f32 %v4502_v40, %v3154_v55  ;;  %v3009_v55 = vld [vmem:[#allocation4 + $0x50] sm:$0xff] }
 0x7d0   : > { %4224 = vmatmul.mubr.msk.bf16.vlgmr.msra.gmra.mxu1 %vm1095_vm3, %v3144_v17  ;;  %v3221_v36 = vpop.permute.xlu1 %3220  ;;  %v3216_v14 = vpop.permute.xlu0 %3215  ;;  %v3268_v37 = vmul.f32 %v4504_v25, %v3153_v39 }
 0x7d1   : > { %4517 = vrcp.f32 %v3221_v36 }
 0x7d2   : > { %v4506_v19 = vpop.eup %4505  ;;  %4519 = vrcp.f32 %v3216_v14  ;;  %v3296_v4 = vpack.c.bf16 %v3270_v62, %v3268_v37  ;;  %v3162_v37 = vld [vmem:[#allocation4 + $0xd8] sm:$0xff] }
 0x7d3   : > { %v4508_v42 = vpop.eup %4507  ;;  %v3122_v57 = vmul.f32 %v4506_v19, %v3004_v50  ;;  %v3161_v50 = vld [vmem:[#allocation4 + $0xd0] sm:$0xff] }
 0x7d4   : > { %4206 = vmatmul.mubr.msk.bf16.vlgmr.msra.gmra.mxu0 %vm1095_vm3, %v3296_v4  ;;  %v3079_v7 = vpop.permute.xlu1 %3078  ;;  %v3074_v15 = vpop.permute.xlu0 %3073  ;;  %v3120_v11 = vmul.f32 %v4508_v42, %v3003_v48 }
 0x7d5   : > { %4521 = vrcp.f32 %v3079_v7 }
 0x7d6   : > { %v4510_v33 = vpop.eup %4509  ;;  %4523 = vrcp.f32 %v3074_v15  ;;  %v3145_v3 = vpack.c.bf16 %v3122_v57, %v3120_v11  ;;  %v3012_v11 = vld [vmem:[#allocation4 + $0x68] sm:$0xff] }
 0x7d7   : > { %v4512_v22 = vpop.eup %4511  ;;  %v3274_v6 = vmul.f32 %v4510_v33, %v3156_v63  ;;  %v3011_v63 = vld [vmem:[#allocation4 + $0x60] sm:$0xff] }
 0x7d8   : > { %4227 = vmatprep.mubr.msk.bf16.mxu1 %vm1095_vm3, %v3145_v3  ;;  %v3231_v34 = vpop.permute.xlu1 %3230  ;;  %v3226_v31 = vpop.permute.xlu0 %3225  ;;  %v3272_v51 = vmul.f32 %v4512_v22, %v3155_v41 }
 0x7d9   : > { %4525 = vrcp.f32 %v3231_v34  ;;  %v3164_v34 = vld [vmem:[#allocation4 + $0xe8] sm:$0xff] }
 0x7da   : > { %v4514_v27 = vpop.eup %4513  ;;  %4527 = vrcp.f32 %v3226_v31  ;;  %v3297_v30 = vpack.c.bf16 %v3274_v6, %v3272_v51  ;;  %v3163_v31 = vld [vmem:[#allocation4 + $0xe0] sm:$0xff] }
 0x7db   : > { %v4516_v2 = vpop.eup %4515  ;;  %v3126_v8 = vmul.f32 %v4514_v27, %v3006_v18 }
 0x7dc   : > { %4209 = vmatprep.mubr.msk.bf16.mxu0 %vm1095_vm3, %v3297_v30  ;;  %v3089_v60 = vpop.permute.xlu1 %3088  ;;  %v3084_v21 = vpop.permute.xlu0 %3083  ;;  %v3124_v1 = vmul.f32 %v4516_v2, %v3005_v0  ;;  %v3014_v2 = vld [vmem:[#allocation4 + $0x78] sm:$0xff] }
 0x7dd   : > { %4529 = vrcp.f32 %v3089_v60 }
 0x7de   : > { %v4518_v43 = vpop.eup %4517  ;;  %4531 = vrcp.f32 %v3084_v21  ;;  %v3146_v46 = vpack.c.bf16 %v3126_v8, %v3124_v1  ;;  %v3013_v8 = vld [vmem:[#allocation4 + $0x70] sm:$0xff] }
 0x7df   : > { %v4520_v9 = vpop.eup %4519  ;;  %v3278_v28 = vmul.f32 %v4518_v43, %v3158_v20  ;;  %v3166_v43 = vld [vmem:[#allocation4 + $0xf8] sm:$0xff] }
 0x7e0   : > { %4228 = vmatmul.mubr.msk.bf16.gmra.mxu1 %vm1095_vm3, %v3146_v46  ;;  %v3241_v23 = vpop.permute.xlu1 %3240  ;;  %v3236_v26 = vpop.permute.xlu0 %3235  ;;  %v3276_v54 = vmul.f32 %v4520_v9, %v3157_v59  ;;  %v3165_v46 = vld [vmem:[#allocation4 + $0xf0] sm:$0xff] }
 0x7e1   : > { %4533 = vrcp.f32 %v3241_v23 }
 0x7e2   : > { %v4522_v10 = vpop.eup %4521  ;;  %4535 = vrcp.f32 %v3236_v26  ;;  %v3298_v44 = vpack.c.bf16 %v3278_v28, %v3276_v54 }
 0x7e3   : > { %v4524_v13 = vpop.eup %4523  ;;  %v3130_v58 = vmul.f32 %v4522_v10, %v3008_v12 }
 0x7e4   : > { %4210 = vmatmul.mubr.msk.bf16.gmra.mxu0 %vm1095_vm3, %v3298_v44  ;;  %v3099_v47 = vpop.permute.xlu1 %3098  ;;  %v3094_v56 = vpop.permute.xlu0 %3093  ;;  %v3128_v61 = vmul.f32 %v4524_v13, %v3007_v38  ;;  %v6198_v13 = vld [vmem:[%s6277_s8] ss:$0 sm:$0xff] }
 0x7e5   : > { %4537 = vrcp.f32 %v3099_v47 }
 0x7e6   : > { %v4526_v53 = vpop.eup %4525  ;;  %4539 = vrcp.f32 %v3094_v56  ;;  %v3147_v45 = vpack.c.bf16 %v3130_v58, %v3128_v61 }
 0x7e7   : > { %v4528_v52 = vpop.eup %4527  ;;  %v3282_v29 = vmul.f32 %v4526_v53, %v3160_v32 }
 0x7e8   : > { %4231 = vmatprep.mubr.msk.bf16.mxu1 %vm1095_vm3, %v3147_v45  ;;  %v3251_v16 = vpop.permute.xlu1 %3250  ;;  %v3246_v24 = vpop.permute.xlu0 %3245  ;;  %v3280_v5 = vmul.f32 %v4528_v52, %v3159_v49 }
 0x7e9   : > { %4541 = vrcp.f32 %v3251_v16 }
 0x7ea   : > { %v4530_v39 = vpop.eup %4529  ;;  %4543 = vrcp.f32 %v3246_v24  ;;  %v3299_v40 = vpack.c.bf16 %v3282_v29, %v3280_v5 }
 0x7eb   : > { %v4532_v17 = vpop.eup %4531  ;;  %v3134_v25 = vmul.f32 %v4530_v39, %v3010_v35 }
 0x7ec   : > { %4213 = vmatprep.mubr.msk.bf16.mxu0 %vm1095_vm3, %v3299_v40  ;;  %v3109_v62 = vpop.permute.xlu1 %3108  ;;  %v3104_v36 = vpop.permute.xlu0 %3103  ;;  %v3132_v14 = vmul.f32 %v4532_v17, %v3009_v55 }
 0x7ed   : > { %4545 = vrcp.f32 %v3109_v62 }
 0x7ee   : > { %v4534_v48 = vpop.eup %4533  ;;  %4547 = vrcp.f32 %v3104_v36  ;;  %v3148_v19 = vpack.c.bf16 %v3134_v25, %v3132_v14 }
 0x7ef   : > { %v4536_v4 = vpop.eup %4535  ;;  %v3286_v42 = vmul.f32 %v4534_v48, %v3162_v37 }
 0x7f0   : > { %4232 = vmatmul.mubr.msk.bf16.gmra.mxu1 %vm1095_vm3, %v3148_v19  ;;  %v3261_v57 = vpop.permute.xlu1 %3260  ;;  %v3256_v7 = vpop.permute.xlu0 %3255  ;;  %v3284_v15 = vmul.f32 %v4536_v4, %v3161_v50 }
 0x7f1   : > { %4549 = vrcp.f32 %v3261_v57 }
 0x7f2   : > { %v4538_v41 = vpop.eup %4537  ;;  %4551 = vrcp.f32 %v3256_v7  ;;  %v3300_v33 = vpack.c.bf16 %v3286_v42, %v3284_v15 }
 0x7f3   : > { %v4540_v3 = vpop.eup %4539  ;;  %v3138_v22 = vmul.f32 %v4538_v41, %v3012_v11 }
 0x7f4   : > { %4214 = vmatmul.mubr.msk.bf16.gmra.mxu0 %vm1095_vm3, %v3300_v33  ;;  %v3136_v6 = vmul.f32 %v4540_v3, %v3011_v63 }
 0x7f6   : > { %v4542_v51 = vpop.eup %4541  ;;  %v3149_v18 = vpack.c.bf16 %v3138_v22, %v3136_v6 }
 0x7f7   : > { %v4544_v0 = vpop.eup %4543  ;;  %v3290_v27 = vmul.f32 %v4542_v51, %v3164_v34 }
 0x7f8   : > { %4235 = vmatprep.mubr.msk.bf16.mxu1 %vm1095_vm3, %v3149_v18  ;;  %v3288_v30 = vmul.f32 %v4544_v0, %v3163_v31 }
 0x7fa   : > { %v4546_v60 = vpop.eup %4545  ;;  %v3301_v21 = vpack.c.bf16 %v3290_v27, %v3288_v30 }
 0x7fb   : > { %v4548_v1 = vpop.eup %4547  ;;  %v3142_v20 = vmul.f32 %v4546_v60, %v3014_v2 }
 0x7fc   : > { %4217 = vmatprep.mubr.msk.bf16.mxu0 %vm1095_vm3, %v3301_v21  ;;  %v3140_v59 = vmul.f32 %v4548_v1, %v3013_v8 }
 0x7fe   : > { %v4550_v9 = vpop.eup %4549  ;;  %v3150_v28 = vpack.c.bf16 %v3142_v20, %v3140_v59 }
 0x7ff   : > { %v4552_v23 = vpop.eup %4551  ;;  %v3294_v26 = vmul.f32 %v4550_v9, %v3166_v43 }
 0x800   : > { %4236 = vmatmul.mubr.msk.bf16.gmra.mxu1 %vm1095_vm3, %v3150_v28  ;;  %v3292_v54 = vmul.f32 %v4552_v23, %v3165_v46 }
 0x802   : > { %v3302_v12 = vpack.c.bf16 %v3294_v26, %v3292_v54 }
 0x804   : > { %4218 = vmatmul.mubr.msk.bf16.gmra.mxu0 %vm1095_vm3, %v3302_v12 }
 0x890   : > { %v4225_v38 = vpop.f32.mrf.mxu1 }
 0x892   : > { %v3489_v10 = vpop.f32.mrf.mxu1 }
 0x894   : > { %v4207_v44 = vpop.f32.mrf.mxu0  ;;  %v4226_v47 = vpop.f32.mrf.mxu1 }
 0x895   : > { %v3498_v58 = vadd.f32 %v4225_v38, %v4207_v44 }
 0x896   : > { %v3365_v56 = vpop.f32.mrf.mxu0  ;;  %v3492_v29 = vpop.f32.mrf.mxu1 }
 0x897   : > { %v3561_v61 = vadd.f32 %v6198_v13, %v3498_v58  ;;  %v3490_v32 = vadd.f32 %v3489_v10, %v3365_v56 }
 0x898   : > { %v4208_v49 = vpop.f32.mrf.mxu0 }
 0x899   : > { %v3577_v53 = vmax.f32 %v3561_v61, 0.0  ;;  %v3559_v45 = vadd.f32 %v6198_v13, %v3490_v32  ;;  %v3501_v52 = vadd.f32 %v4226_v47, %v4208_v49 }
 0x89a   : > { %v3368_v16 = vpop.f32.mrf.mxu0 }
 0x89b   : > { %3593 = vst.msk [vmem:[%s4736_s2 + $0x10] sm:$0xff] %vm679_vm2, %v3577_v53  ;;  %v3575_v24 = vmax.f32 %v3559_v45, 0.0  ;;  %v3562_v5 = vadd.f32 %v6198_v13, %v3501_v52  ;;  %v3493_v35 = vadd.f32 %v3492_v29, %v3368_v16 }
 0x89d   : > { %3591 = vst.msk [vmem:[%s4736_s2] sm:$0xff] %vm679_vm2, %v3575_v24  ;;  %v3578_v55 = vmax.f32 %v3562_v5, 0.0  ;;  %v3560_v39 = vadd.f32 %v6198_v13, %v3493_v35 }
 0x89f   : > { %3594 = vst.msk [vmem:[%s4736_s2 + $0x18] sm:$0xff] %vm679_vm2, %v3578_v55  ;;  %v3576_v40 = vmax.f32 %v3560_v39, 0.0 }
 0x8a0   : > { %v4229_v17 = vpop.f32.mrf.mxu1 }
 0x8a1   : > { %3592 = vst.msk [vmem:[%s4736_s2 + $0x8] sm:$0xff] %vm679_vm2, %v3576_v40 }
 0x8a2   : > { %v3505_v25 = vpop.f32.mrf.mxu1 }
 0x8a4   : > { %v4211_v62 = vpop.f32.mrf.mxu0  ;;  %v4230_v14 = vpop.f32.mrf.mxu1 }
 0x8a5   : > { %v3514_v36 = vadd.f32 %v4229_v17, %v4211_v62 }
 0x8a6   : > { %v3381_v37 = vpop.f32.mrf.mxu0  ;;  %v3508_v7 = vpop.f32.mrf.mxu1 }
 0x8a7   : > { %v3565_v50 = vadd.f32 %v6198_v13, %v3514_v36  ;;  %v3506_v48 = vadd.f32 %v3505_v25, %v3381_v37 }
 0x8a8   : > { %v4212_v19 = vpop.f32.mrf.mxu0 }
 0x8a9   : > { %v3581_v4 = vmax.f32 %v3565_v50, 0.0  ;;  %v3563_v42 = vadd.f32 %v6198_v13, %v3506_v48  ;;  %v3517_v57 = vadd.f32 %v4230_v14, %v4212_v19 }
 0x8aa   : > { %v3384_v15 = vpop.f32.mrf.mxu0 }
 0x8ab   : > { %3597 = vst.msk [vmem:[%s4736_s2 + $0x30] sm:$0xff] %vm679_vm2, %v3581_v4  ;;  %v3579_v11 = vmax.f32 %v3563_v42, 0.0  ;;  %v3566_v63 = vadd.f32 %v6198_v13, %v3517_v57  ;;  %v3509_v41 = vadd.f32 %v3508_v7, %v3384_v15 }
 0x8ad   : > { %3595 = vst.msk [vmem:[%s4736_s2 + $0x20] sm:$0xff] %vm679_vm2, %v3579_v11  ;;  %v3582_v33 = vmax.f32 %v3566_v63, 0.0  ;;  %v3564_v3 = vadd.f32 %v6198_v13, %v3509_v41 }
 0x8af   : > { %3598 = vst.msk [vmem:[%s4736_s2 + $0x38] sm:$0xff] %vm679_vm2, %v3582_v33  ;;  %v3580_v22 = vmax.f32 %v3564_v3, 0.0 }
 0x8b0   : > { %v4233_v6 = vpop.f32.mrf.mxu1 }
 0x8b1   : > { %3596 = vst.msk [vmem:[%s4736_s2 + $0x28] sm:$0xff] %vm679_vm2, %v3580_v22 }
 0x8b2   : > { %v3521_v34 = vpop.f32.mrf.mxu1 }
 0x8b4   : > { %v4215_v31 = vpop.f32.mrf.mxu0  ;;  %v4234_v18 = vpop.f32.mrf.mxu1 }
 0x8b5   : > { %v3530_v51 = vadd.f32 %v4233_v6, %v4215_v31 }
 0x8b6   : > { %v3397_v0 = vpop.f32.mrf.mxu0  ;;  %v3524_v1 = vpop.f32.mrf.mxu1 }
 0x8b7   : > { %v3569_v27 = vadd.f32 %v6198_v13, %v3530_v51  ;;  %v3522_v30 = vadd.f32 %v3521_v34, %v3397_v0 }
 0x8b8   : > { %v4216_v2 = vpop.f32.mrf.mxu0 }
 0x8b9   : > { %v3585_v8 = vmax.f32 %v3569_v27, 0.0  ;;  %v3567_v60 = vadd.f32 %v6198_v13, %v3522_v30  ;;  %v3533_v21 = vadd.f32 %v4234_v18, %v4216_v2 }
 0x8ba   : > { %v3400_v20 = vpop.f32.mrf.mxu0 }
 0x8bb   : > { %3601 = vst.msk [vmem:[%s4736_s2 + $0x50] sm:$0xff] %vm679_vm2, %v3585_v8  ;;  %v3583_v59 = vmax.f32 %v3567_v60, 0.0  ;;  %v3570_v43 = vadd.f32 %v6198_v13, %v3533_v21  ;;  %v3525_v46 = vadd.f32 %v3524_v1, %v3400_v20 }
 0x8bd   : > { %3599 = vst.msk [vmem:[%s4736_s2 + $0x40] sm:$0xff] %vm679_vm2, %v3583_v59  ;;  %v3586_v9 = vmax.f32 %v3570_v43, 0.0  ;;  %v3568_v28 = vadd.f32 %v6198_v13, %v3525_v46 }
 0x8bf   : > { %3602 = vst.msk [vmem:[%s4736_s2 + $0x58] sm:$0xff] %vm679_vm2, %v3586_v9  ;;  %v3584_v23 = vmax.f32 %v3568_v28, 0.0 }
 0x8c0   : > { %v4237_v26 = vpop.f32.mrf.mxu1 }
 0x8c1   : > { %3600 = vst.msk [vmem:[%s4736_s2 + $0x48] sm:$0xff] %vm679_vm2, %v3584_v23 }
 0x8c2   : > { %v3537_v54 = vpop.f32.mrf.mxu1 }
 0x8c4   : > { %v4219_v12 = vpop.f32.mrf.mxu0  ;;  %v4238_v10 = vpop.f32.mrf.mxu1 }
 0x8c5   : > { %v3546_v38 = vadd.f32 %v4237_v26, %v4219_v12 }
 0x8c6   : > { %v3413_v44 = vpop.f32.mrf.mxu0  ;;  %v3540_v53 = vpop.f32.mrf.mxu1 }
 0x8c7   : > { %v3573_v58 = vadd.f32 %v6198_v13, %v3546_v38  ;;  %v3538_v47 = vadd.f32 %v3537_v54, %v3413_v44 }
 0x8c8   : > { %v4220_v56 = vpop.f32.mrf.mxu0 }
 0x8c9   : > { %v3589_v61 = vmax.f32 %v3573_v58, 0.0  ;;  %v3571_v32 = vadd.f32 %v6198_v13, %v3538_v47  ;;  %v3549_v49 = vadd.f32 %v4238_v10, %v4220_v56 }
 0x8ca   : > { %v3416_v45 = vpop.f32.mrf.mxu0 }
 0x8cb   : > { %3605 = vst.msk [vmem:[%s4736_s2 + $0x70] sm:$0xff] %vm679_vm2, %v3589_v61  ;;  %v3587_v52 = vmax.f32 %v3571_v32, 0.0  ;;  %v3574_v29 = vadd.f32 %v6198_v13, %v3549_v49  ;;  %v3541_v16 = vadd.f32 %v3540_v53, %v3416_v45 }
 0x8cd   : > { %3603 = vst.msk [vmem:[%s4736_s2 + $0x60] sm:$0xff] %vm679_vm2, %v3587_v52  ;;  %v3590_v24 = vmax.f32 %v3574_v29, 0.0  ;;  %v3572_v5 = vadd.f32 %v6198_v13, %v3541_v16 }
 0x8cf   : > { %3606 = vst.msk [vmem:[%s4736_s2 + $0x78] sm:$0xff] %vm679_vm2, %v3590_v24  ;;  %v3588_v35 = vmax.f32 %v3572_v5, 0.0 }
 0x8d1   : > { %3604 = vst.msk [vmem:[%s4736_s2 + $0x68] sm:$0xff] %vm679_vm2, %v3588_v35 }
 0x8d2 PF: > { %s19_s15 = sadd.s32 1, %s4607_s15   ;;  %s6478_s20 = sld [smem:[#allocation6_spill]] }
 0x8d3   : > { %p16_p0 = scmp.ge.s32.totalorder %s19_s15, 6   ;;  %s6479_s21 = sld [smem:[#allocation7_spill]] }
 0x8d4   : > { %s6480_s30 = smov %s4587_s10  ;;  %s6481_s10 = smov %s4714_s22 }
 0x8d5   : > { %s6482_s11 = smov %s4599_s13  ;;  %s6483_s12 = smov %s4603_s14 }
 0x8d6   :  { %18 = sbr.rel (!%p16_p0) target bundleno = 6 (0x6), region = 146 }
 0x8d8   : > { %s6484_s13 = smov %s6478_s20 }
 0x8d9   : > { %s6485_s14 = smov %s6479_s21 }

</bundles_post_ra>
